<compile_context>
chip_gen: v7x
topology: tpu7x:2x2x1
jax: 0.10.0
libtpu: 0.0.40
codegen_flags: <defaults>
</compile_context>

<pallas_src>
import jax
import jax.numpy as jnp
from jax.experimental import pallas as pl
from jax.experimental.pallas import tpu as pltpu

NUM_SEGMENTS = 10
IN_DIM = 1 + NUM_SEGMENTS            # 11
H1, H2, H3, H4, OUT = 256, 256, 128, 64, 1
LN_EPS = 1e-5


def _mlp_kernel(x_ref, m_ref,
                w1x_ref, w1m_ref, b1_ref, g_ref, beta_ref,
                w2_ref, b2_ref, w3_ref, b3_ref, w4_ref, b4_ref,
                w5_ref, b5_ref,
                out_ref):
    """One batch tile. Activations are (features, block_m): batch on lanes."""
    md = w1m_ref.dtype                       # matmul input dtype (bf16 or f32)
    f32 = jnp.float32
    dn = (((1,), (1,)), ((), ()))            # contract feature axis of both

    # fc1 entirely on the MXU: W1[:,1:] . mask^T  +  W1[:,:1] . x^T  -> (256, BM)
    m_md = m_ref[...].astype(md)             # (BM, 10)
    x_md = x_ref[...].astype(md)             # (BM, 1)
    h = jax.lax.dot_general(w1m_ref[...], m_md, dn, preferred_element_type=f32)
    h = h + jax.lax.dot_general(w1x_ref[...], x_md, dn,
                                preferred_element_type=f32)
    h = h + b1_ref[...]                      # (256, BM) f32

    # Single-pass LayerNorm over the feature axis (axis 0), stats in f32.
    inv_n = 1.0 / H1
    mu = jnp.sum(h, axis=0, keepdims=True) * inv_n             # (1, BM)
    ms = jnp.sum(h * h, axis=0, keepdims=True) * inv_n         # (1, BM)
    inv_std = jax.lax.rsqrt(ms - mu * mu + LN_EPS)
    h = (h - mu) * inv_std * g_ref[...] + beta_ref[...]
    h = jnp.maximum(h, 0.0)

    # fc2..fc4 on the MXU (bf16/f32 inputs, f32 accumulation) + ReLU.
    h = jnp.maximum(
        jnp.dot(w2_ref[...], h.astype(md), preferred_element_type=f32)
        + b2_ref[...], 0.0)
    h = jnp.maximum(
        jnp.dot(w3_ref[...], h.astype(md), preferred_element_type=f32)
        + b3_ref[...], 0.0)
    h = jnp.maximum(
        jnp.dot(w4_ref[...], h.astype(md), preferred_element_type=f32)
        + b4_ref[...], 0.0)

    # fc5 (out_features == 1): VPU multiply + sublane reduction -> lane-dense
    # (1, BM) output row.
    y = jnp.sum(h * w5_ref[...], axis=0, keepdims=True) + b5_ref[...]
    out_ref[...] = jnp.tanh(y)


def _round_up(n, m):
    return ((n + m - 1) // m) * m


def _tile_config(batch, block_m, vmem_limit_bytes):
    """Per-generation tile / VMEM-limit defaults."""
    try:
        kind = jax.devices()[0].device_kind.lower()
    except Exception:  # pragma: no cover - defensive
        kind = ""
    two_core = ("v7" in kind) or ("tpu7" in kind)       # 2 TCs, 64 MiB VMEM
    small_vmem = (" v2" in kind) or (" v3" in kind) or kind in ("tpu v2", "tpu v3")

    if block_m is None:
        block_m = 512 if small_vmem else (1024 if two_core else 2048)
    if vmem_limit_bytes is None:
        vmem_limit_bytes = (16 if small_vmem else (48 if two_core else 64)) << 20

    # On 2-TensorCore chips keep >= 2 blocks so the "parallel" axis can shard.
    if two_core and batch > 128:
        block_m = min(block_m, max(128, _round_up(-(-batch // 2), 128)))

    if batch <= block_m:
        block_m = batch                       # single exact block, no padding
    else:
        block_m = max(128, (block_m // 128) * 128)   # lane-dense output tiles
    return block_m, vmem_limit_bytes


def avoid_mask_nn_v2(x, mask_encoding, params, *, block_m=None,
                     vmem_limit_bytes=None, matmul_dtype=jnp.bfloat16):
    """x: (B, 1), mask_encoding: (B, NUM_SEGMENTS) -> (B, 1) float32."""
    (w1, b1, w2, b2, w3, b3, w4, b4, w5, b5, g, beta) = params

    x = x.astype(jnp.float32)
    mask_encoding = mask_encoding.astype(jnp.float32)
    B = x.shape[0]
    assert x.shape == (B, 1) and mask_encoding.shape == (B, NUM_SEGMENTS)

    block_m, vmem_limit_bytes = _tile_config(B, block_m, vmem_limit_bytes)
    num_blocks = pl.cdiv(B, block_m)

    md = jnp.dtype(matmul_dtype)
    f32 = jnp.float32

    # Weights kept in PyTorch (out_features, in_features) layout; matmul
    # operands cast to matmul_dtype, everything touched by the VPU stays f32.
    w1x = w1[:, :1].astype(md)                 # (256, 1)
    w1m = w1[:, 1:].astype(md)                 # (256, 10)
    w2m = w2.astype(md)                        # (256, 256)
    w3m = w3.astype(md)                        # (128, 256)
    w4m = w4.astype(md)                        # (64, 128)
    w5c = w5.reshape(H4, 1).astype(f32)        # (64, 1)
    b1c = b1.reshape(H1, 1).astype(f32)
    b2c = b2.reshape(H2, 1).astype(f32)
    b3c = b3.reshape(H3, 1).astype(f32)
    b4c = b4.reshape(H4, 1).astype(f32)
    b5c = b5.reshape(1, 1).astype(f32)
    gc = g.reshape(H1, 1).astype(f32)
    betac = beta.reshape(H1, 1).astype(f32)

    def batch_spec(cols):
        return pl.BlockSpec((block_m, cols), lambda i: (i, 0))

    def resident_spec(arr):                    # full array, VMEM-resident
        shape = arr.shape
        return pl.BlockSpec(shape, lambda i: (0,) * len(shape))

    out = pl.pallas_call(
        _mlp_kernel,
        out_shape=jax.ShapeDtypeStruct((1, B), jnp.float32),
        grid_spec=pl.GridSpec(
            grid=(num_blocks,),
            in_specs=[
                batch_spec(1),                       # x       (B, 1)
                batch_spec(NUM_SEGMENTS),            # mask    (B, 10)
                resident_spec(w1x), resident_spec(w1m), resident_spec(b1c),
                resident_spec(gc), resident_spec(betac),
                resident_spec(w2m), resident_spec(b2c),
                resident_spec(w3m), resident_spec(b3c),
                resident_spec(w4m), resident_spec(b4c),
                resident_spec(w5c), resident_spec(b5c),
            ],
            out_specs=pl.BlockSpec((1, block_m), lambda i: (0, i)),
        ),
        compiler_params=pltpu.CompilerParams(
            dimension_semantics=("parallel",),
            vmem_limit_bytes=vmem_limit_bytes,
        ),
    )(x, mask_encoding, w1x, w1m, b1c, gc, betac,
      w2m, b2c, w3m, b3c, w4m, b4c, w5c, b5c)

    return out.reshape(B, OUT)


def init_params(key):
    """PyTorch-default init: weights/biases ~ U(-1/sqrt(fan_in), 1/sqrt(fan_in)),
    stored in nn.Linear's (out_features, in_features) layout."""
    dims = [(IN_DIM, H1), (H1, H2), (H2, H3), (H3, H4), (H4, OUT)]
    keys = jax.random.split(key, 2 * len(dims))
    ws, bs = [], []
    for li, (fi, fo) in enumerate(dims):
        bound = 1.0 / float(fi) ** 0.5
        ws.append(jax.random.uniform(keys[2 * li], (fo, fi), jnp.float32,
                                     -bound, bound))
        bs.append(jax.random.uniform(keys[2 * li + 1], (fo,), jnp.float32,
                                     -bound, bound))
    gamma = jnp.ones((H1,), jnp.float32)
    beta = jnp.zeros((H1,), jnp.float32)
    return (ws[0], bs[0], ws[1], bs[1], ws[2], bs[2],
            ws[3], bs[3], ws[4], bs[4], gamma, beta)


def reference(x, mask_encoding, params, matmul_dtype=jnp.float32):
    """Pure-JAX reference mirroring the kernel's math and cast points."""
    (w1, b1, w2, b2, w3, b3, w4, b4, w5, b5, g, beta) = params
    md = jnp.dtype(matmul_dtype)

    def dot32(a, b):
        return jnp.dot(a, b, preferred_element_type=jnp.float32)

    xm = jnp.concatenate([x, mask_encoding], axis=1)        # (B, 11)
    h = dot32(xm.astype(md), w1.T.astype(md)) + b1[None, :]
    mu = h.mean(-1, keepdims=True)
    var = (h * h).mean(-1, keepdims=True) - mu * mu
    h = (h - mu) * jax.lax.rsqrt(var + LN_EPS) * g[None, :] + beta[None, :]
    h = jnp.maximum(h, 0.0)
    h = jnp.maximum(dot32(h.astype(md), w2.T.astype(md)) + b2[None, :], 0.0)
    h = jnp.maximum(dot32(h.astype(md), w3.T.astype(md)) + b3[None, :], 0.0)
    h = jnp.maximum(dot32(h.astype(md), w4.T.astype(md)) + b4[None, :], 0.0)
    y = jnp.sum(h * w5, axis=-1, keepdims=True) + b5[None, :]
    return jnp.tanh(y)


if __name__ == "__main__":
    key = jax.random.PRNGKey(0)
    kp, kx, km, kx2, km2 = jax.random.split(key, 5)
    params = init_params(kp)

    # Small batch (single exact block).
    B = 16
    x = jax.random.normal(kx, (B, 1), jnp.float32)
    mask_encoding = jax.random.normal(km, (B, NUM_SEGMENTS), jnp.float32)

    # Production path: bf16 matmul inputs, f32 accumulation.
    out_bf16 = jax.block_until_ready(avoid_mask_nn_v2(x, mask_encoding, params))
    ref_bf16 = reference(x, mask_encoding, params, matmul_dtype=jnp.bfloat16)
    assert out_bf16.shape == (B, OUT)
    assert jnp.allclose(out_bf16, ref_bf16, atol=5e-3, rtol=5e-3), "bf16 mismatch"

    # Debug/reference f32 path (tight tolerance).
    out_f32 = jax.block_until_ready(
        avoid_mask_nn_v2(x, mask_encoding, params, matmul_dtype=jnp.float32))
    ref_f32 = reference(x, mask_encoding, params, matmul_dtype=jnp.float32)
    assert jnp.allclose(out_f32, ref_f32, atol=1e-4, rtol=1e-4), "f32 mismatch"

    # Multi-block grid with a ragged tail block (partial-block read/write).
    B2 = 300
    x2 = jax.random.normal(kx2, (B2, 1), jnp.float32)
    mask2 = jax.random.normal(km2, (B2, NUM_SEGMENTS), jnp.float32)
    out2 = jax.block_until_ready(
        avoid_mask_nn_v2(x2, mask2, params, block_m=128))
    ref2 = reference(x2, mask2, params, matmul_dtype=jnp.bfloat16)
    assert out2.shape == (B2, OUT)
    assert jnp.allclose(out2, ref2, atol=5e-3, rtol=5e-3), "multi-block mismatch"

    print("KERNEL_OK")
</pallas_src>

<mosaic_0001>
module attributes {stable_mosaic.version = 11 : i64} {
  func.func @_mlp_kernel(%arg0: i32, %arg1: memref<16x1xf32, #tpu.memory_space<vmem>>, %arg2: memref<16x10xf32, #tpu.memory_space<vmem>>, %arg3: memref<256x1xbf16, #tpu.memory_space<vmem>>, %arg4: memref<256x10xbf16, #tpu.memory_space<vmem>>, %arg5: memref<256x1xf32, #tpu.memory_space<vmem>>, %arg6: memref<256x1xf32, #tpu.memory_space<vmem>>, %arg7: memref<256x1xf32, #tpu.memory_space<vmem>>, %arg8: memref<256x256xbf16, #tpu.memory_space<vmem>>, %arg9: memref<256x1xf32, #tpu.memory_space<vmem>>, %arg10: memref<128x256xbf16, #tpu.memory_space<vmem>>, %arg11: memref<128x1xf32, #tpu.memory_space<vmem>>, %arg12: memref<64x128xbf16, #tpu.memory_space<vmem>>, %arg13: memref<64x1xf32, #tpu.memory_space<vmem>>, %arg14: memref<64x1xf32, #tpu.memory_space<vmem>>, %arg15: memref<1x1xf32, #tpu.memory_space<vmem>>, %arg16: memref<1x16xf32, #tpu.memory_space<vmem>>) attributes {dimension_semantics = [#tpu.dimension_semantics<parallel>], iteration_bounds = array<i64: 1>, scalar_prefetch = 0 : i64, scratch_operands = 0 : i64, tpu.core_type = #tpu.core_type<tc>, window_params = [{transform_indices = @transform_0, window_bounds = array<i64: 16, 1>}, {transform_indices = @transform_1, window_bounds = array<i64: 16, 10>}, {pipeline_mode = #tpu.pipeline_mode<synchronous>, transform_indices = @transform_2, window_bounds = array<i64: 256, 1>}, {pipeline_mode = #tpu.pipeline_mode<synchronous>, transform_indices = @transform_3, window_bounds = array<i64: 256, 10>}, {pipeline_mode = #tpu.pipeline_mode<synchronous>, transform_indices = @transform_4, window_bounds = array<i64: 256, 1>}, {pipeline_mode = #tpu.pipeline_mode<synchronous>, transform_indices = @transform_5, window_bounds = array<i64: 256, 1>}, {pipeline_mode = #tpu.pipeline_mode<synchronous>, transform_indices = @transform_6, window_bounds = array<i64: 256, 1>}, {pipeline_mode = #tpu.pipeline_mode<synchronous>, transform_indices = @transform_7, window_bounds = array<i64: 256, 256>}, {pipeline_mode = #tpu.pipeline_mode<synchronous>, transform_indices = @transform_8, window_bounds = array<i64: 256, 1>}, {pipeline_mode = #tpu.pipeline_mode<synchronous>, transform_indices = @transform_9, window_bounds = array<i64: 128, 256>}, {pipeline_mode = #tpu.pipeline_mode<synchronous>, transform_indices = @transform_10, window_bounds = array<i64: 128, 1>}, {pipeline_mode = #tpu.pipeline_mode<synchronous>, transform_indices = @transform_11, window_bounds = array<i64: 64, 128>}, {pipeline_mode = #tpu.pipeline_mode<synchronous>, transform_indices = @transform_12, window_bounds = array<i64: 64, 1>}, {pipeline_mode = #tpu.pipeline_mode<synchronous>, transform_indices = @transform_13, window_bounds = array<i64: 64, 1>}, {pipeline_mode = #tpu.pipeline_mode<synchronous>, transform_indices = @transform_14, window_bounds = array<i64: 1, 1>}, {transform_indices = @transform_15, window_bounds = array<i64: 1, 16>}]} {
    %c0 = arith.constant 0 : index
    %c0_0 = arith.constant 0 : index
    %0 = vector.load %arg2[%c0, %c0_0] : memref<16x10xf32, #tpu.memory_space<vmem>>, vector<16x10xf32>
    %1 = arith.truncf %0 : vector<16x10xf32> to vector<16x10xbf16>
    %c0_1 = arith.constant 0 : index
    %c0_2 = arith.constant 0 : index
    %2 = vector.load %arg1[%c0_1, %c0_2] : memref<16x1xf32, #tpu.memory_space<vmem>>, vector<16x1xf32>
    %3 = arith.truncf %2 : vector<16x1xf32> to vector<16x1xbf16>
    %c0_3 = arith.constant 0 : index
    %c0_4 = arith.constant 0 : index
    %4 = vector.load %arg4[%c0_3, %c0_4] : memref<256x10xbf16, #tpu.memory_space<vmem>>, vector<256x10xbf16>
    %cst = arith.constant dense<0.000000e+00> : vector<256x16xf32>
    %5 = tpu.matmul %4, %1, %cst {dimension_numbers = #tpu.dot_dimension_numbers<[1], [1], [0], [0], [0, 0, 1, 0], [], []>} : vector<256x10xbf16>, vector<16x10xbf16>, vector<256x16xf32> -> vector<256x16xf32>
    %c0_5 = arith.constant 0 : index
    %c0_6 = arith.constant 0 : index
    %6 = vector.load %arg3[%c0_5, %c0_6] : memref<256x1xbf16, #tpu.memory_space<vmem>>, vector<256x1xbf16>
    %cst_7 = arith.constant dense<0.000000e+00> : vector<256x16xf32>
    %7 = tpu.matmul %6, %3, %cst_7 {dimension_numbers = #tpu.dot_dimension_numbers<[1], [1], [0], [0], [0, 0, 1, 0], [], []>} : vector<256x1xbf16>, vector<16x1xbf16>, vector<256x16xf32> -> vector<256x16xf32>
    %8 = arith.addf %5, %7 : vector<256x16xf32>
    %c0_8 = arith.constant 0 : index
    %c0_9 = arith.constant 0 : index
    %9 = vector.load %arg5[%c0_8, %c0_9] : memref<256x1xf32, #tpu.memory_space<vmem>>, vector<256x1xf32>
    %10 = vector.broadcast %9 : vector<256x1xf32> to vector<256x16xf32>
    %11 = arith.addf %8, %10 : vector<256x16xf32>
    %cst_10 = arith.constant dense<0.000000e+00> : vector<16xf32>
    %12 = vector.multi_reduction <add>, %11, %cst_10 [0] : vector<256x16xf32> to vector<16xf32>
    %13 = vector.shape_cast %12 : vector<16xf32> to vector<1x16xf32>
    %cst_11 = arith.constant 3.906250e-03 : f32
    %14 = vector.broadcast %cst_11 : f32 to vector<1x16xf32>
    %15 = arith.mulf %13, %14 : vector<1x16xf32>
    %16 = arith.mulf %11, %11 : vector<256x16xf32>
    %cst_12 = arith.constant dense<0.000000e+00> : vector<16xf32>
    %17 = vector.multi_reduction <add>, %16, %cst_12 [0] : vector<256x16xf32> to vector<16xf32>
    %18 = vector.shape_cast %17 : vector<16xf32> to vector<1x16xf32>
    %cst_13 = arith.constant 3.906250e-03 : f32
    %19 = vector.broadcast %cst_13 : f32 to vector<1x16xf32>
    %20 = arith.mulf %18, %19 : vector<1x16xf32>
    %21 = arith.mulf %15, %15 : vector<1x16xf32>
    %22 = arith.subf %20, %21 : vector<1x16xf32>
    %cst_14 = arith.constant 9.99999974E-6 : f32
    %23 = vector.broadcast %cst_14 : f32 to vector<1x16xf32>
    %24 = arith.addf %22, %23 : vector<1x16xf32>
    %25 = math.rsqrt %24 : vector<1x16xf32>
    %26 = vector.broadcast %15 : vector<1x16xf32> to vector<256x16xf32>
    %27 = arith.subf %11, %26 : vector<256x16xf32>
    %28 = vector.broadcast %25 : vector<1x16xf32> to vector<256x16xf32>
    %29 = arith.mulf %27, %28 : vector<256x16xf32>
    %c0_15 = arith.constant 0 : index
    %c0_16 = arith.constant 0 : index
    %30 = vector.load %arg6[%c0_15, %c0_16] : memref<256x1xf32, #tpu.memory_space<vmem>>, vector<256x1xf32>
    %31 = vector.broadcast %30 : vector<256x1xf32> to vector<256x16xf32>
    %32 = arith.mulf %29, %31 : vector<256x16xf32>
    %c0_17 = arith.constant 0 : index
    %c0_18 = arith.constant 0 : index
    %33 = vector.load %arg7[%c0_17, %c0_18] : memref<256x1xf32, #tpu.memory_space<vmem>>, vector<256x1xf32>
    %34 = vector.broadcast %33 : vector<256x1xf32> to vector<256x16xf32>
    %35 = arith.addf %32, %34 : vector<256x16xf32>
    %cst_19 = arith.constant 0.000000e+00 : f32
    %36 = vector.broadcast %cst_19 : f32 to vector<256x16xf32>
    %37 = arith.maximumf %35, %36 : vector<256x16xf32>
    %c0_20 = arith.constant 0 : index
    %c0_21 = arith.constant 0 : index
    %38 = vector.load %arg8[%c0_20, %c0_21] : memref<256x256xbf16, #tpu.memory_space<vmem>>, vector<256x256xbf16>
    %39 = arith.truncf %37 : vector<256x16xf32> to vector<256x16xbf16>
    %cst_22 = arith.constant dense<0.000000e+00> : vector<256x16xf32>
    %40 = tpu.matmul %38, %39, %cst_22 {dimension_numbers = #tpu.dot_dimension_numbers<[1], [0], [0], [1], [0, 0, 1, 1], [], []>} : vector<256x256xbf16>, vector<256x16xbf16>, vector<256x16xf32> -> vector<256x16xf32>
    %c0_23 = arith.constant 0 : index
    %c0_24 = arith.constant 0 : index
    %41 = vector.load %arg9[%c0_23, %c0_24] : memref<256x1xf32, #tpu.memory_space<vmem>>, vector<256x1xf32>
    %42 = vector.broadcast %41 : vector<256x1xf32> to vector<256x16xf32>
    %43 = arith.addf %40, %42 : vector<256x16xf32>
    %cst_25 = arith.constant 0.000000e+00 : f32
    %44 = vector.broadcast %cst_25 : f32 to vector<256x16xf32>
    %45 = arith.maximumf %43, %44 : vector<256x16xf32>
    %c0_26 = arith.constant 0 : index
    %c0_27 = arith.constant 0 : index
    %46 = vector.load %arg10[%c0_26, %c0_27] : memref<128x256xbf16, #tpu.memory_space<vmem>>, vector<128x256xbf16>
    %47 = arith.truncf %45 : vector<256x16xf32> to vector<256x16xbf16>
    %cst_28 = arith.constant dense<0.000000e+00> : vector<128x16xf32>
    %48 = tpu.matmul %46, %47, %cst_28 {dimension_numbers = #tpu.dot_dimension_numbers<[1], [0], [0], [1], [0, 0, 1, 1], [], []>} : vector<128x256xbf16>, vector<256x16xbf16>, vector<128x16xf32> -> vector<128x16xf32>
    %c0_29 = arith.constant 0 : index
    %c0_30 = arith.constant 0 : index
    %49 = vector.load %arg11[%c0_29, %c0_30] : memref<128x1xf32, #tpu.memory_space<vmem>>, vector<128x1xf32>
    %50 = vector.broadcast %49 : vector<128x1xf32> to vector<128x16xf32>
    %51 = arith.addf %48, %50 : vector<128x16xf32>
    %cst_31 = arith.constant 0.000000e+00 : f32
    %52 = vector.broadcast %cst_31 : f32 to vector<128x16xf32>
    %53 = arith.maximumf %51, %52 : vector<128x16xf32>
    %c0_32 = arith.constant 0 : index
    %c0_33 = arith.constant 0 : index
    %54 = vector.load %arg12[%c0_32, %c0_33] : memref<64x128xbf16, #tpu.memory_space<vmem>>, vector<64x128xbf16>
    %55 = arith.truncf %53 : vector<128x16xf32> to vector<128x16xbf16>
    %cst_34 = arith.constant dense<0.000000e+00> : vector<64x16xf32>
    %56 = tpu.matmul %54, %55, %cst_34 {dimension_numbers = #tpu.dot_dimension_numbers<[1], [0], [0], [1], [0, 0, 1, 1], [], []>} : vector<64x128xbf16>, vector<128x16xbf16>, vector<64x16xf32> -> vector<64x16xf32>
    %c0_35 = arith.constant 0 : index
    %c0_36 = arith.constant 0 : index
    %57 = vector.load %arg13[%c0_35, %c0_36] : memref<64x1xf32, #tpu.memory_space<vmem>>, vector<64x1xf32>
    %58 = vector.broadcast %57 : vector<64x1xf32> to vector<64x16xf32>
    %59 = arith.addf %56, %58 : vector<64x16xf32>
    %cst_37 = arith.constant 0.000000e+00 : f32
    %60 = vector.broadcast %cst_37 : f32 to vector<64x16xf32>
    %61 = arith.maximumf %59, %60 : vector<64x16xf32>
    %c0_38 = arith.constant 0 : index
    %c0_39 = arith.constant 0 : index
    %62 = vector.load %arg14[%c0_38, %c0_39] : memref<64x1xf32, #tpu.memory_space<vmem>>, vector<64x1xf32>
    %63 = vector.broadcast %62 : vector<64x1xf32> to vector<64x16xf32>
    %64 = arith.mulf %61, %63 : vector<64x16xf32>
    %cst_40 = arith.constant dense<0.000000e+00> : vector<16xf32>
    %65 = vector.multi_reduction <add>, %64, %cst_40 [0] : vector<64x16xf32> to vector<16xf32>
    %66 = vector.shape_cast %65 : vector<16xf32> to vector<1x16xf32>
    %c0_41 = arith.constant 0 : index
    %c0_42 = arith.constant 0 : index
    %67 = vector.load %arg15[%c0_41, %c0_42] : memref<1x1xf32, #tpu.memory_space<vmem>>, vector<1x1xf32>
    %68 = vector.broadcast %67 : vector<1x1xf32> to vector<1x16xf32>
    %69 = arith.addf %66, %68 : vector<1x16xf32>
    %70 = math.tanh %69 : vector<1x16xf32>
    %c0_43 = arith.constant 0 : index
    %c0_44 = arith.constant 0 : index
    %71 = vector.load %arg16[%c0_43, %c0_44] : memref<1x16xf32, #tpu.memory_space<vmem>>, vector<1x16xf32>
    tpu.vector_store %arg16[%c0_43, %c0_44], %70 {strides = array<i32>} : memref<1x16xf32, #tpu.memory_space<vmem>>, vector<1x16xf32>,
    return
  }
  func.func @transform_0(%arg0: i32) -> (i32, i32) {
    %c0_i32 = arith.constant 0 : i32
    %c0_i32_0 = arith.constant 0 : i32
    return %arg0, %c0_i32 : i32, i32
  }
  func.func @transform_1(%arg0: i32) -> (i32, i32) {
    %c0_i32 = arith.constant 0 : i32
    %c0_i32_0 = arith.constant 0 : i32
    return %arg0, %c0_i32 : i32, i32
  }
  func.func @transform_2(%arg0: i32) -> (i32, i32) {
    %c0_i32 = arith.constant 0 : i32
    %c0_i32_0 = arith.constant 0 : i32
    %c0_i32_1 = arith.constant 0 : i32
    return %c0_i32, %c0_i32_0 : i32, i32
  }
  func.func @transform_3(%arg0: i32) -> (i32, i32) {
    %c0_i32 = arith.constant 0 : i32
    %c0_i32_0 = arith.constant 0 : i32
    %c0_i32_1 = arith.constant 0 : i32
    return %c0_i32, %c0_i32_0 : i32, i32
  }
  func.func @transform_4(%arg0: i32) -> (i32, i32) {
    %c0_i32 = arith.constant 0 : i32
    %c0_i32_0 = arith.constant 0 : i32
    %c0_i32_1 = arith.constant 0 : i32
    return %c0_i32, %c0_i32_0 : i32, i32
  }
  func.func @transform_5(%arg0: i32) -> (i32, i32) {
    %c0_i32 = arith.constant 0 : i32
    %c0_i32_0 = arith.constant 0 : i32
    %c0_i32_1 = arith.constant 0 : i32
    return %c0_i32, %c0_i32_0 : i32, i32
  }
  func.func @transform_6(%arg0: i32) -> (i32, i32) {
    %c0_i32 = arith.constant 0 : i32
    %c0_i32_0 = arith.constant 0 : i32
    %c0_i32_1 = arith.constant 0 : i32
    return %c0_i32, %c0_i32_0 : i32, i32
  }
  func.func @transform_7(%arg0: i32) -> (i32, i32) {
    %c0_i32 = arith.constant 0 : i32
    %c0_i32_0 = arith.constant 0 : i32
    %c0_i32_1 = arith.constant 0 : i32
    return %c0_i32, %c0_i32_0 : i32, i32
  }
  func.func @transform_8(%arg0: i32) -> (i32, i32) {
    %c0_i32 = arith.constant 0 : i32
    %c0_i32_0 = arith.constant 0 : i32
    %c0_i32_1 = arith.constant 0 : i32
    return %c0_i32, %c0_i32_0 : i32, i32
  }
  func.func @transform_9(%arg0: i32) -> (i32, i32) {
    %c0_i32 = arith.constant 0 : i32
    %c0_i32_0 = arith.constant 0 : i32
    %c0_i32_1 = arith.constant 0 : i32
    return %c0_i32, %c0_i32_0 : i32, i32
  }
  func.func @transform_10(%arg0: i32) -> (i32, i32) {
    %c0_i32 = arith.constant 0 : i32
    %c0_i32_0 = arith.constant 0 : i32
    %c0_i32_1 = arith.constant 0 : i32
    return %c0_i32, %c0_i32_0 : i32, i32
  }
  func.func @transform_11(%arg0: i32) -> (i32, i32) {
    %c0_i32 = arith.constant 0 : i32
    %c0_i32_0 = arith.constant 0 : i32
    %c0_i32_1 = arith.constant 0 : i32
    return %c0_i32, %c0_i32_0 : i32, i32
  }
  func.func @transform_12(%arg0: i32) -> (i32, i32) {
    %c0_i32 = arith.constant 0 : i32
    %c0_i32_0 = arith.constant 0 : i32
    %c0_i32_1 = arith.constant 0 : i32
    return %c0_i32, %c0_i32_0 : i32, i32
  }
  func.func @transform_13(%arg0: i32) -> (i32, i32) {
    %c0_i32 = arith.constant 0 : i32
    %c0_i32_0 = arith.constant 0 : i32
    %c0_i32_1 = arith.constant 0 : i32
    return %c0_i32, %c0_i32_0 : i32, i32
  }
  func.func @transform_14(%arg0: i32) -> (i32, i32) {
    %c0_i32 = arith.constant 0 : i32
    %c0_i32_0 = arith.constant 0 : i32
    %c0_i32_1 = arith.constant 0 : i32
    return %c0_i32, %c0_i32_0 : i32, i32
  }
  func.func @transform_15(%arg0: i32) -> (i32, i32) {
    %c0_i32 = arith.constant 0 : i32
    %c0_i32_0 = arith.constant 0 : i32
    return %c0_i32, %arg0 : i32, i32
  }
}

</mosaic_0001>

<bundles_post_ra>
// kernel: tpu_custom_call.1
= control target key start
LH: loop header
LB: loop body
LE: loop exit
PB: predicated region body
PF: predicated region fallthrough
CT: control target
= control target key end

     0   :  { %s5113_s0 = inlined_call_operand.hbm [shape: f32[16,1], index: 0, kind: input, shape index: {}]   ;;  %s5114_s1 = inlined_call_operand.hbm [shape: f32[16,10], index: 1, kind: input, shape index: {}]   ;;  %s5115_s2 = inlined_call_operand.hbm [shape: bf16[256,1], index: 2, kind: input, shape index: {}]   ;;  %s5116_s3 = inlined_call_operand.hbm [shape: bf16[256,10], index: 3, kind: input, shape index: {}]   ;;  %s5117_s4 = inlined_call_operand.hbm [shape: f32[256,1], index: 4, kind: input, shape index: {}]   ;;  %s5118_s5 = inlined_call_operand.hbm [shape: f32[256,1], index: 5, kind: input, shape index: {}]   ;;  %s5119_s6 = inlined_call_operand.hbm [shape: f32[256,1], index: 6, kind: input, shape index: {}]   ;;  %s5120_s7 = inlined_call_operand.hbm [shape: bf16[256,256], index: 7, kind: input, shape index: {}]   ;;  %s5121_s8 = inlined_call_operand.hbm [shape: f32[256,1], index: 8, kind: input, shape index: {}]   ;;  %s5122_s9 = inlined_call_operand.hbm [shape: bf16[128,256], index: 9, kind: input, shape index: {}]   ;;  %s5123_s10 = inlined_call_operand.hbm [shape: f32[128,1], index: 10, kind: input, shape index: {}]   ;;  %s5124_s11 = inlined_call_operand.hbm [shape: bf16[64,128], index: 11, kind: input, shape index: {}]   ;;  %s5125_s12 = inlined_call_operand.hbm [shape: f32[64,1], index: 12, kind: input, shape index: {}]   ;;  %s5126_s13 = inlined_call_operand.hbm [shape: f32[64,1], index: 13, kind: input, shape index: {}]   ;;  %s5127_s14 = inlined_call_operand.<no memory space> [shape: f32[1,1], index: 14, kind: input, shape index: {}]   ;;  %s5128_s15 = inlined_call_operand.hbm [shape: f32[1,16], index: 15, kind: output, shape index: {}]  }
   0x1   :  { %v20_v0 = vstv %s5127_s14 }
   0x2   :  { %21 = vst [vmem:[#allocation2] sm:$0x1] %v20_v0 }
   0x3   :  { %22 = vsyncpa [#allocation4], 0 }
   0x4   :  { %23 = vsyncpa [#allocation7], 0 }
   0x5   :  { %24 = vsyncpa [#allocation10], 0 }
   0x6   :  { %25 = vsyncpa [#allocation13], 0 }
   0x7   :  { %26 = vsyncpa [#allocation16], 0 }
   0x8   :  { %27 = vsyncpa [#allocation19], 0 }
   0x9   :  { %28 = vsyncpa [#allocation22], 0 }
   0xa   :  { %29 = vsyncpa [#allocation25], 0 }
   0xb   :  { %30 = vsyncpa [#allocation5], 0  ;;  %s3998_s20 = smov [#allocation6]   ;;  %s3650_s24 = scalar_lea.hbm %s5114_s1, 256 }
   0xc   :  { %s48_s21 = sshll.u32 %s3998_s20, 4  ;;  %p3651_p0 = scmp.ne.s32.totalorder %s5114_s1, %s3650_s24  ;;  %s49_s21 = int_to_ptr.vmem [resolvable:$true] %s48_s21 }
   0xd   :  { %p3654_p1 = scmp.lt.u32.totalorder %s3650_s24, %s5114_s1 }
   0xf   :  { %p3656_p2 = pnand %p3654_p1, %p3651_p0 }
  0x11   :  { %3659 = shalt.err (!%p3656_p2)
}
  0x12   :  { %s3660_s28 = scalar_lea.vmem %s49_s21, 256  ;;  %p3665_p4 = scmp.lt.s32.totalorder %s49_s21, %s49_s21 }
  0x13   :  { %p3661_p3 = scmp.ne.s32.totalorder %s49_s21, %s3660_s28  ;;  %p3666_p5 = scmp.lt.s32.totalorder %s3660_s28, %s3660_s28 }
  0x15   :  { %p3667_p6 = por %p3666_p5, %p3665_p4 }
  0x17   :  { %p3668_p7 = pnand %p3667_p6, %p3661_p3 }
  0x19   :  { %3671 = shalt.err (!%p3668_p7)
}
  0x1a   :  { %s3999_s29 = smov 128   ;;  %s4000_s30 = smov 8  }
  0x1b   :  { %54 = dma.hbm_to_vmem [thread:$0]  %s5114_s1, 256, %s49_s21, [#allocation7], %s3999_s29, %s3999_s29, %s4000_s30  }
  0x1c   :  { %s4001_s18 = smov [#allocation9]   ;;  %s4002_s20 = smov [#allocation12]  }
  0x1d   :  { %s72_s19 = sshll.u32 %s4001_s18, 4  ;;  %s96_s22 = sshll.u32 %s4002_s20, 4  ;;  %s73_s19 = int_to_ptr.vmem [resolvable:$true] %s72_s19  ;;  %s97_s22 = int_to_ptr.vmem [resolvable:$true] %s96_s22 }
  0x1e   :  { %s3672_s25 = scalar_lea.hbm %s5116_s3, 2048 }
  0x1f   :  { %p3673_p8 = scmp.ne.s32.totalorder %s5116_s3, %s3672_s25  ;;  %p3676_p9 = scmp.lt.u32.totalorder %s3672_s25, %s5116_s3 }
  0x21   :  { %p3678_p10 = pnand %p3676_p9, %p3673_p8 }
  0x23   :  { %3681 = shalt.err (!%p3678_p10)
}
  0x24   :  { %s3682_s1 = scalar_lea.vmem %s73_s19, 2048  ;;  %p3687_p12 = scmp.lt.s32.totalorder %s73_s19, %s73_s19 }
  0x25   :  { %p3683_p11 = scmp.ne.s32.totalorder %s73_s19, %s3682_s1  ;;  %p3688_p13 = scmp.lt.s32.totalorder %s3682_s1, %s3682_s1 }
  0x27   :  { %p3689_p0 = por %p3688_p13, %p3687_p12 }
  0x29   :  { %p3690_p1 = pnand %p3689_p0, %p3683_p11 }
  0x2b   :  { %3693 = shalt.err (!%p3690_p1)
}
  0x2c   :  { %s4003_s21 = smov 64   ;;  %s4004_s16 = smov 4  }
  0x2d   :  { %78 = dma.hbm_to_vmem [thread:$0]  %s5116_s3, 2048, %s73_s19, [#allocation10], %s4003_s21, %s4003_s21, %s4004_s16  }
  0x2e   :  { %s3694_s24 = scalar_lea.hbm %s5118_s5, 4096 }
  0x2f   :  { %p3695_p2 = scmp.ne.s32.totalorder %s5118_s5, %s3694_s24  ;;  %p3698_p3 = scmp.lt.u32.totalorder %s3694_s24, %s5118_s5 }
  0x31   :  { %p3700_p4 = pnand %p3698_p3, %p3695_p2 }
  0x33   :  { %3703 = shalt.err (!%p3700_p4)
}
  0x34   :  { %s3704_s28 = scalar_lea.vmem %s97_s22, 4096  ;;  %p3709_p6 = scmp.lt.s32.totalorder %s97_s22, %s97_s22 }
  0x35   :  { %p3705_p5 = scmp.ne.s32.totalorder %s97_s22, %s3704_s28  ;;  %p3710_p7 = scmp.lt.s32.totalorder %s3704_s28, %s3704_s28 }
  0x37   :  { %p3711_p8 = por %p3710_p7, %p3709_p6 }
  0x39   :  { %p3712_p9 = pnand %p3711_p8, %p3705_p5 }
  0x3b   :  { %3715 = shalt.err (!%p3712_p9)
}
  0x3c   :  { %102 = dma.hbm_to_vmem [thread:$0]  %s5118_s5, 4096, %s97_s22, [#allocation13], %s3999_s29, %s3999_s29, %s4000_s30  }
  0x3d   :  { %s4005_s1 = smov [#allocation15]   ;;  %s4006_s18 = smov [#allocation18]  }
  0x3e   :  { %s120_s17 = sshll.u32 %s4005_s1, 4  ;;  %s144_s20 = sshll.u32 %s4006_s18, 4  ;;  %s121_s17 = int_to_ptr.vmem [resolvable:$true] %s120_s17  ;;  %s145_s20 = int_to_ptr.vmem [resolvable:$true] %s144_s20 }
  0x3f   :  { %s3716_s25 = scalar_lea.hbm %s5120_s7, 4096 }
  0x40   :  { %p3717_p10 = scmp.ne.s32.totalorder %s5120_s7, %s3716_s25  ;;  %p3720_p11 = scmp.lt.u32.totalorder %s3716_s25, %s5120_s7 }
  0x42   :  { %p3722_p12 = pnand %p3720_p11, %p3717_p10 }
  0x44   :  { %3725 = shalt.err (!%p3722_p12)
}
  0x45   :  { %s3726_s5 = scalar_lea.vmem %s121_s17, 4096  ;;  %p3731_p0 = scmp.lt.s32.totalorder %s121_s17, %s121_s17 }
  0x46   :  { %p3727_p13 = scmp.ne.s32.totalorder %s121_s17, %s3726_s5  ;;  %p3732_p1 = scmp.lt.s32.totalorder %s3726_s5, %s3726_s5 }
  0x48   :  { %p3733_p2 = por %p3732_p1, %p3731_p0 }
  0x4a   :  { %p3734_p3 = pnand %p3733_p2, %p3727_p13 }
  0x4c   :  { %3737 = shalt.err (!%p3734_p3)
}
  0x4d   :  { %126 = dma.hbm_to_vmem [thread:$0]  %s5120_s7, 4096, %s121_s17, [#allocation16], %s3999_s29, %s3999_s29, %s4000_s30  }
  0x4e   :  { %s3738_s18 = scalar_lea.hbm %s5122_s9, 2048 }
  0x4f   :  { %p3739_p4 = scmp.ne.s32.totalorder %s5122_s9, %s3738_s18  ;;  %p3742_p5 = scmp.lt.u32.totalorder %s3738_s18, %s5122_s9 }
  0x51   :  { %p3744_p6 = pnand %p3742_p5, %p3739_p4 }
  0x53   :  { %3747 = shalt.err (!%p3744_p6)
}
  0x54   :  { %s3748_s14 = scalar_lea.vmem %s145_s20, 2048  ;;  %p3753_p8 = scmp.lt.s32.totalorder %s145_s20, %s145_s20 }
  0x55   :  { %p3749_p7 = scmp.ne.s32.totalorder %s145_s20, %s3748_s14  ;;  %p3754_p9 = scmp.lt.s32.totalorder %s3748_s14, %s3748_s14 }
  0x57   :  { %p3755_p10 = por %p3754_p9, %p3753_p8 }
  0x59   :  { %p3756_p11 = pnand %p3755_p10, %p3749_p7 }
  0x5b   :  { %3759 = shalt.err (!%p3756_p11)
}
  0x5c   :  { %150 = dma.hbm_to_vmem [thread:$0]  %s5122_s9, 2048, %s145_s20, [#allocation19], %s3999_s29, %s3999_s29, %s4000_s30  }
  0x5d   :  { %s4007_s27 = smov [#allocation21]   ;;  %s4008_s5 = smov [#allocation3]  }
  0x5e   :  { %s168_s28 = sshll.u32 %s4007_s27, 4  ;;  %s36_s22 = sshll.u32 %s4008_s5, 4  ;;  %s169_s28 = int_to_ptr.vmem [resolvable:$true] %s168_s28  ;;  %s37_s22 = int_to_ptr.vmem [resolvable:$true] %s36_s22 }
  0x5f   :  { %s3760_s1 = scalar_lea.hbm %s5124_s11, 512 }
  0x60   :  { %p3761_p12 = scmp.ne.s32.totalorder %s5124_s11, %s3760_s1  ;;  %p3764_p13 = scmp.lt.u32.totalorder %s3760_s1, %s5124_s11 }
  0x62   :  { %p3766_p0 = pnand %p3764_p13, %p3761_p12 }
  0x64   :  { %3769 = shalt.err (!%p3766_p0)
}
  0x65   :  { %s3770_s9 = scalar_lea.vmem %s169_s28, 512  ;;  %p3775_p2 = scmp.lt.s32.totalorder %s169_s28, %s169_s28 }
  0x66   :  { %p3771_p1 = scmp.ne.s32.totalorder %s169_s28, %s3770_s9  ;;  %p3776_p3 = scmp.lt.s32.totalorder %s3770_s9, %s3770_s9 }
  0x68   :  { %p3777_p4 = por %p3776_p3, %p3775_p2 }
  0x6a   :  { %p3778_p5 = pnand %p3777_p4, %p3771_p1 }
  0x6c   :  { %3781 = shalt.err (!%p3778_p5)
}
  0x6d   :  { %174 = dma.hbm_to_vmem [thread:$0]  %s5124_s11, 512, %s169_s28, [#allocation22], %s4003_s21, %s4003_s21, %s4004_s16  }
  0x6e   :  { %s3782_s17 = scalar_lea.hbm %s5113_s0, 256 }
  0x6f   :  { %p3783_p6 = scmp.ne.s32.totalorder %s5113_s0, %s3782_s17  ;;  %p3786_p7 = scmp.lt.u32.totalorder %s3782_s17, %s5113_s0 }
  0x71   :  { %p3788_p8 = pnand %p3786_p7, %p3783_p6 }
  0x73   :  { %3791 = shalt.err (!%p3788_p8)
}
  0x74   :  { %s3792_s1 = scalar_lea.vmem %s37_s22, 256  ;;  %p3797_p10 = scmp.lt.s32.totalorder %s37_s22, %s37_s22 }
  0x75   :  { %p3793_p9 = scmp.ne.s32.totalorder %s37_s22, %s3792_s1  ;;  %p3798_p11 = scmp.lt.s32.totalorder %s3792_s1, %s3792_s1 }
  0x77   :  { %p3799_p12 = por %p3798_p11, %p3797_p10 }
  0x79   :  { %p3800_p13 = pnand %p3799_p12, %p3793_p9 }
  0x7b   :  { %3803 = shalt.err (!%p3800_p13)
}
  0x7c   :  { %42 = dma.hbm_to_vmem [thread:$0]  %s5113_s0, 256, %s37_s22, [#allocation4], %s3999_s29, %s3999_s29, %s4000_s30  }
  0x7d   :  { %s4009_s18 = smov [#allocation8]   ;;  %s4010_s24 = smov [#allocation11]  }
  0x7e   :  { %s60_s23 = sshll.u32 %s4009_s18, 4  ;;  %s84_s25 = sshll.u32 %s4010_s24, 4  ;;  %s61_s23 = int_to_ptr.vmem [resolvable:$true] %s60_s23  ;;  %s85_s25 = int_to_ptr.vmem [resolvable:$true] %s84_s25 }
  0x7f   :  { %s3804_s26 = scalar_lea.hbm %s5115_s2, 2048 }
  0x80   :  { %p3805_p0 = scmp.ne.s32.totalorder %s5115_s2, %s3804_s26  ;;  %p3808_p1 = scmp.lt.u32.totalorder %s3804_s26, %s5115_s2 }
  0x82   :  { %p3810_p2 = pnand %p3808_p1, %p3805_p0 }
  0x84   :  { %3813 = shalt.err (!%p3810_p2)
}
  0x85   :  { %s3814_s0 = scalar_lea.vmem %s61_s23, 2048  ;;  %p3819_p4 = scmp.lt.s32.totalorder %s61_s23, %s61_s23 }
  0x86   :  { %p3815_p3 = scmp.ne.s32.totalorder %s61_s23, %s3814_s0  ;;  %p3820_p5 = scmp.lt.s32.totalorder %s3814_s0, %s3814_s0 }
  0x88   :  { %p3821_p6 = por %p3820_p5, %p3819_p4 }
  0x8a   :  { %p3822_p7 = pnand %p3821_p6, %p3815_p3 }
  0x8c   :  { %3825 = shalt.err (!%p3822_p7)
}
  0x8d   :  { %66 = dma.hbm_to_vmem [thread:$0]  %s5115_s2, 2048, %s61_s23, [#allocation7], %s4003_s21, %s4003_s21, %s4004_s16  }
  0x8e   :  { %s3826_s1 = scalar_lea.hbm %s5117_s4, 4096 }
  0x8f   :  { %p3827_p8 = scmp.ne.s32.totalorder %s5117_s4, %s3826_s1  ;;  %p3830_p9 = scmp.lt.u32.totalorder %s3826_s1, %s5117_s4 }
  0x91   :  { %p3832_p10 = pnand %p3830_p9, %p3827_p8 }
  0x93   :  { %3835 = shalt.err (!%p3832_p10)
}
  0x94   :  { %s3836_s9 = scalar_lea.vmem %s85_s25, 4096  ;;  %p3841_p12 = scmp.lt.s32.totalorder %s85_s25, %s85_s25 }
  0x95   :  { %p3837_p11 = scmp.ne.s32.totalorder %s85_s25, %s3836_s9  ;;  %p3842_p13 = scmp.lt.s32.totalorder %s3836_s9, %s3836_s9 }
  0x97   :  { %p3843_p0 = por %p3842_p13, %p3841_p12 }
  0x99   :  { %p3844_p1 = pnand %p3843_p0, %p3837_p11 }
  0x9b   :  { %3847 = shalt.err (!%p3844_p1)
}
  0x9c   :  { %90 = dma.hbm_to_vmem [thread:$0]  %s5117_s4, 4096, %s85_s25, [#allocation10], %s3999_s29, %s3999_s29, %s4000_s30  }
  0x9d   :  { %s4011_s16 = smov [#allocation14]   ;;  %s4012_s20 = smov [#allocation17]  }
  0x9e   :  { %s108_s23 = sshll.u32 %s4011_s16, 4  ;;  %s132_s26 = sshll.u32 %s4012_s20, 4  ;;  %s109_s23 = int_to_ptr.vmem [resolvable:$true] %s108_s23  ;;  %s133_s26 = int_to_ptr.vmem [resolvable:$true] %s132_s26 }
  0x9f   :  { %s3848_s17 = scalar_lea.hbm %s5119_s6, 4096 }
  0xa0   :  { %p3849_p2 = scmp.ne.s32.totalorder %s5119_s6, %s3848_s17  ;;  %p3852_p3 = scmp.lt.u32.totalorder %s3848_s17, %s5119_s6 }
  0xa2   :  { %p3854_p4 = pnand %p3852_p3, %p3849_p2 }
  0xa4   :  { %3857 = shalt.err (!%p3854_p4)
}
  0xa5   :  { %s3858_s4 = scalar_lea.vmem %s109_s23, 4096  ;;  %p3863_p6 = scmp.lt.s32.totalorder %s109_s23, %s109_s23 }
  0xa6   :  { %p3859_p5 = scmp.ne.s32.totalorder %s109_s23, %s3858_s4  ;;  %p3864_p7 = scmp.lt.s32.totalorder %s3858_s4, %s3858_s4 }
  0xa8   :  { %p3865_p8 = por %p3864_p7, %p3863_p6 }
  0xaa   :  { %p3866_p9 = pnand %p3865_p8, %p3859_p5 }
  0xac   :  { %3869 = shalt.err (!%p3866_p9)
}
  0xad   :  { %114 = dma.hbm_to_vmem [thread:$0]  %s5119_s6, 4096, %s109_s23, [#allocation13], %s3999_s29, %s3999_s29, %s4000_s30  }
  0xae   :  { %s3870_s11 = scalar_lea.hbm %s5121_s8, 4096 }
  0xaf   :  { %p3871_p10 = scmp.ne.s32.totalorder %s5121_s8, %s3870_s11  ;;  %p3874_p11 = scmp.lt.u32.totalorder %s3870_s11, %s5121_s8 }
  0xb1   :  { %p3876_p12 = pnand %p3874_p11, %p3871_p10 }
  0xb3   :  { %3879 = shalt.err (!%p3876_p12)
}
  0xb4   :  { %s3880_s2 = scalar_lea.vmem %s133_s26, 4096  ;;  %p3885_p0 = scmp.lt.s32.totalorder %s133_s26, %s133_s26 }
  0xb5   :  { %p3881_p13 = scmp.ne.s32.totalorder %s133_s26, %s3880_s2  ;;  %p3886_p1 = scmp.lt.s32.totalorder %s3880_s2, %s3880_s2 }
  0xb7   :  { %p3887_p2 = por %p3886_p1, %p3885_p0 }
  0xb9   :  { %p3888_p3 = pnand %p3887_p2, %p3881_p13 }
  0xbb   :  { %3891 = shalt.err (!%p3888_p3)
}
  0xbc   :  { %138 = dma.hbm_to_vmem [thread:$0]  %s5121_s8, 4096, %s133_s26, [#allocation16], %s3999_s29, %s3999_s29, %s4000_s30  }
  0xbd   :  { %s4013_s16 = smov [#allocation20]   ;;  %s4014_s20 = smov [#allocation23]  }
  0xbe   :  { %s156_s23 = sshll.u32 %s4013_s16, 4  ;;  %s180_s14 = sshll.u32 %s4014_s20, 4  ;;  %s157_s23 = int_to_ptr.vmem [resolvable:$true] %s156_s23  ;;  %s181_s14 = int_to_ptr.vmem [resolvable:$true] %s180_s14 }
  0xbf   :  { %s3892_s27 = scalar_lea.hbm %s5123_s10, 2048 }
  0xc0   :  { %p3893_p4 = scmp.ne.s32.totalorder %s5123_s10, %s3892_s27  ;;  %p3896_p5 = scmp.lt.u32.totalorder %s3892_s27, %s5123_s10 }
  0xc2   :  { %p3898_p6 = pnand %p3896_p5, %p3893_p4 }
  0xc4   :  { %3901 = shalt.err (!%p3898_p6)
}
  0xc5   :  { %s3902_s8 = scalar_lea.vmem %s157_s23, 2048  ;;  %p3907_p8 = scmp.lt.s32.totalorder %s157_s23, %s157_s23 }
  0xc6   :  { %p3903_p7 = scmp.ne.s32.totalorder %s157_s23, %s3902_s8  ;;  %p3908_p9 = scmp.lt.s32.totalorder %s3902_s8, %s3902_s8 }
  0xc8   :  { %p3909_p10 = por %p3908_p9, %p3907_p8 }
  0xca   :  { %p3910_p11 = pnand %p3909_p10, %p3903_p7 }
  0xcc   :  { %3913 = shalt.err (!%p3910_p11)
}
  0xcd   :  { %162 = dma.hbm_to_vmem [thread:$0]  %s5123_s10, 2048, %s157_s23, [#allocation19], %s3999_s29, %s3999_s29, %s4000_s30  }
  0xce   :  { %s3914_s1 = scalar_lea.hbm %s5125_s12, 1024 }
  0xcf   :  { %p3915_p12 = scmp.ne.s32.totalorder %s5125_s12, %s3914_s1  ;;  %p3918_p13 = scmp.lt.u32.totalorder %s3914_s1, %s5125_s12 }
  0xd1   :  { %p3920_p0 = pnand %p3918_p13, %p3915_p12 }
  0xd3   :  { %3923 = shalt.err (!%p3920_p0)
}
  0xd4   :  { %s3924_s9 = scalar_lea.vmem %s181_s14, 1024  ;;  %p3929_p2 = scmp.lt.s32.totalorder %s181_s14, %s181_s14 }
  0xd5   :  { %p3925_p1 = scmp.ne.s32.totalorder %s181_s14, %s3924_s9  ;;  %p3930_p3 = scmp.lt.s32.totalorder %s3924_s9, %s3924_s9 }
  0xd7   :  { %p3931_p4 = por %p3930_p3, %p3929_p2 }
  0xd9   :  { %p3932_p5 = pnand %p3931_p4, %p3925_p1 }
  0xdb   :  { %3935 = shalt.err (!%p3932_p5)
}
  0xdc   :  { %186 = dma.hbm_to_vmem [thread:$0]  %s5125_s12, 1024, %s181_s14, [#allocation22], %s3999_s29, %s3999_s29, %s4000_s30  }
  0xdd   :  { %s4015_s6 = smov [#allocation24]   ;;  %s3936_s20 = scalar_lea.hbm %s5126_s13, 1024 }
  0xde   :  { %s192_s21 = sshll.u32 %s4015_s6, 4  ;;  %p3937_p6 = scmp.ne.s32.totalorder %s5126_s13, %s3936_s20  ;;  %s193_s21 = int_to_ptr.vmem [resolvable:$true] %s192_s21 }
  0xdf   :  { %p3940_p7 = scmp.lt.u32.totalorder %s3936_s20, %s5126_s13 }
  0xe1   :  { %p3942_p8 = pnand %p3940_p7, %p3937_p6 }
  0xe3   :  { %3945 = shalt.err (!%p3942_p8)
}
  0xe4   :  { %s3946_s22 = scalar_lea.vmem %s193_s21, 1024  ;;  %p3951_p10 = scmp.lt.s32.totalorder %s193_s21, %s193_s21 }
  0xe5   :  { %p3947_p9 = scmp.ne.s32.totalorder %s193_s21, %s3946_s22  ;;  %p3952_p11 = scmp.lt.s32.totalorder %s3946_s22, %s3946_s22 }
  0xe7   :  { %p3953_p12 = por %p3952_p11, %p3951_p10 }
  0xe9   :  { %p3954_p13 = pnand %p3953_p12, %p3947_p9 }
  0xeb   :  { %3957 = shalt.err (!%p3954_p13)
}
  0xec   :  { %198 = dma.hbm_to_vmem [thread:$0]  %s5126_s13, 1024, %s193_s21, [#allocation25], %s3999_s29, %s3999_s29, %s4000_s30  }
  0xed   :  { %3980 = dma.done.wait [#allocation4], 256  }
  0xee   :  { %3981 = vsyncadd [#allocation4], 4294967040 }
  0xef   :  { %3982 = dma.done.wait [#allocation7], 2304  }
  0xf0   :  { %3983 = vsyncadd [#allocation7], 4294964992 }
  0xf1   :  { %3984 = dma.done.wait [#allocation10], 6144  }
  0xf2   :  { %3985 = vsyncadd [#allocation10], 4294961152 }
  0xf3   :  { %3986 = dma.done.wait [#allocation13], 8192  }
  0xf4   :  { %3987 = vsyncadd [#allocation13], 4294959104 }
  0xf5   :  { %3988 = dma.done.wait [#allocation16], 8192  }
  0xf6   :  { %3989 = vsyncadd [#allocation16], 4294959104 }
  0xf7   :  { %3990 = dma.done.wait [#allocation19], 4096  }
  0xf8   :  { %3991 = vsyncadd [#allocation19], 4294963200 }
  0xf9   :  { %3992 = dma.done.wait [#allocation22], 1536  }
  0xfa   :  { %3993 = vsyncadd [#allocation22], 4294965760 }
  0xfb   :  { %3994 = dma.done.wait [#allocation25], 1024  }
  0xfc   :  { %3995 = vsyncadd [#allocation25], 4294966272  ;;  %v4016_v1 = vmov 0   ;;  %v902_v2 = vld [vmem:[#allocation11 + $0x10] sm:$0xff]  ;;  %v900_v3 = vld [vmem:[#allocation11] sm:$0xff]  ;;  %vm394_vm0 = vcmask 7168  }
  0xfd   :  { %3537 = vset.pattern.permute.xlu1 %v4016_v1  ;;  %3536 = vset.pattern.permute.xlu0 %v4016_v1  ;;  %v247_v4 = vld [vmem:[#allocation3] sm:$0xff]  ;;  %v248_v5 = vld [vmem:[#allocation3 + $0x8] sm:$0xff]  ;;  %v903_v7 = vld [vmem:[#allocation11 + $0x18] sm:$0xff]  ;;  %vm687_vm1 = vcmask 80896   ;;  %vm1124_vm2 = vcmask 130048   ;;  %s4017_s13 = smov [#allocation26]  }
  0xfe   :  { %944 = vperm.xlu1 %3537, %v902_v2   ;;  %934 = vperm.xlu0 %3536, %v900_v3   ;;  %v249_v6 = vpack.c.bf16 %v248_v5, %v247_v4  ;;  %v901_v8 = vld [vmem:[#allocation11 + $0x8] sm:$0xff]  ;;  %v3538_v9 = vld [vmem:[#allocation8] sm:$0xff]   ;;  %v3540_v14 = vld [vmem:[#allocation8 + $0x10] sm:$0xff]   ;;  %s3017_s29 = sshll.u32 %s4017_s13, 4  ;;  %vm3009_vm3 = vcmask 122880   ;;  %s3018_s29 = int_to_ptr.vmem [resolvable:$true] %s3017_s29 }
  0xff   :  { %v905_v11 = vld [vmem:[#allocation11 + $0x28] sm:$0xff]  ;;  %3373 = vmatprep.mubr.msk.bf16.mxu0 %vm394_vm0, %v3538_v9  ;;  %v904_v12 = vld [vmem:[#allocation11 + $0x20] sm:$0xff]  ;;  %v907_v15 = vld [vmem:[#allocation11 + $0x38] sm:$0xff]  ;;  %s3958_s30 = scalar_lea.vmem %s3018_s29, 16  ;;  %s3962_s5 = scalar_lea.vmem %s3018_s29, 32 }
 0x100   :  { %3513 = vmatprep.subr.msk.bf16.mxu0 %vm394_vm0, %v249_v6  ;;  %v444_v10 = vsel %vm394_vm0, %v249_v6, 0  ;;  %v3539_v13 = vld [vmem:[#allocation8 + $0x8] sm:$0xff]   ;;  %v906_v16 = vld [vmem:[#allocation11 + $0x30] sm:$0xff]  ;;  %v908_v19 = vld [vmem:[#allocation11 + $0x40] sm:$0xff]  ;;  %p3959_p0 = scmp.ne.s32.totalorder %s3018_s29, %s3958_s30  ;;  %p3963_p1 = scmp.lt.s32.totalorder %s3018_s29, %s3018_s29 }
 0x101   :  { %3372 = vmatpush3.bf16.xpose.msra.mxu0 %v444_v10  ;;  %v909_v17 = vld [vmem:[#allocation11 + $0x48] sm:$0xff]  ;;  %v244_v18 = vld [vmem:[#allocation6] sm:$0xff]  ;;  %v245_v20 = vld [vmem:[#allocation6 + $0x8] sm:$0xff]  ;;  %p3964_p2 = scmp.lt.s32.totalorder %s3962_s5, %s3958_s30 }
 0x102   :  { %949 = vperm.xlu1 %3537, %v903_v7   ;;  %939 = vperm.xlu0 %3536, %v901_v8   ;;  %v3541_v21 = vld [vmem:[#allocation8 + $0x18] sm:$0xff]   ;;  %v246_v23 = vpack.c.bf16 %v245_v20, %v244_v18  ;;  %v3542_v24 = vld [vmem:[#allocation8 + $0x20] sm:$0xff]   ;;  %v910_v27 = vld [vmem:[#allocation11 + $0x50] sm:$0xff] }
 0x103   :  { %v911_v22 = vld [vmem:[#allocation11 + $0x58] sm:$0xff]  ;;  %v3547_v26 = vld [vmem:[#allocation9 + $0x40] sm:$0xff]   ;;  %v913_v28 = vld [vmem:[#allocation11 + $0x68] sm:$0xff]  ;;  %p3965_p3 = por %p3964_p2, %p3963_p1 }
 0x104   :  { %3515 = vmatprep.subr.msk.bf16.mxu1 %vm687_vm1, %v246_v23  ;;  %v737_v25 = vsel %vm687_vm1, %v246_v23, 0  ;;  %3514 = vmatprep.subr.msk.bf16.mxu0 %vm687_vm1, %v246_v23  ;;  %v912_v29 = vld [vmem:[#allocation11 + $0x60] sm:$0xff]  ;;  %v3549_v30 = vld [vmem:[#allocation9 + $0x48] sm:$0xff]   ;;  %v3551_v31 = vld [vmem:[#allocation9 + $0x50] sm:$0xff]  }
 0x105   :  { %3464 = vmatpush3.bf16.xpose.msra.mxu1 %v737_v25  ;;  %3423 = vmatprep.mubr.msk.bf16.mxu1 %vm687_vm1, %v3547_v26  ;;  %v3543_v32 = vld [vmem:[#allocation8 + $0x28] sm:$0xff]   ;;  %v3544_v33 = vld [vmem:[#allocation8 + $0x30] sm:$0xff]   ;;  %v915_v34 = vld [vmem:[#allocation11 + $0x78] sm:$0xff]  ;;  %p3966_p4 = pnand %p3965_p3, %p3959_p0 }
 0x106   :  { %959 = vperm.xlu1 %3537, %v905_v11   ;;  %954 = vperm.xlu0 %3536, %v904_v12   ;;  %v914_v35 = vld [vmem:[#allocation11 + $0x70] sm:$0xff]  ;;  %v917_v36 = vld [vmem:[#allocation11 + $0x88] sm:$0xff]  ;;  %v3553_v37 = vld [vmem:[#allocation9 + $0x58] sm:$0xff]  }
 0x107   :  { %v916_v38 = vld [vmem:[#allocation11 + $0x80] sm:$0xff]  ;;  %v3545_v40 = vld [vmem:[#allocation8 + $0x38] sm:$0xff]   ;;  %v918_v43 = vld [vmem:[#allocation11 + $0x90] sm:$0xff] }
 0x108   :  { %3374 = vmatmul.mubr.msk.bf16.vlgmr.msra.gmra.mrb[0].mxu0 %vm394_vm0, %v3539_v13  ;;  %v3555_v39 = vld [vmem:[#allocation9 + $0x60] sm:$0xff]   ;;  %v919_v42 = vld [vmem:[#allocation11 + $0x98] sm:$0xff]  ;;  %v921_v44 = vld [vmem:[#allocation11 + $0xa8] sm:$0xff] }
 0x109   :  { %3377 = vmatprep.mubr.msk.bf16.mxu0 %vm394_vm0, %v3540_v14  ;;  %3406 = vmatpush3.bf16.xpose.msra.mxu0 %v737_v25  ;;  %v3546_v41 = vld [vmem:[#allocation8 + $0x40] sm:$0xff]   ;;  %v3557_v46 = vld [vmem:[#allocation9 + $0x68] sm:$0xff]   ;;  %v3559_v47 = vld [vmem:[#allocation9 + $0x70] sm:$0xff]  }
 0x10a   :  { %969 = vperm.xlu1 %3537, %v907_v15   ;;  %964 = vperm.xlu0 %3536, %v906_v16   ;;  %v920_v45 = vld [vmem:[#allocation11 + $0xa0] sm:$0xff]  ;;  %v3548_v48 = vld [vmem:[#allocation8 + $0x48] sm:$0xff]   ;;  %v3550_v49 = vld [vmem:[#allocation8 + $0x50] sm:$0xff]  }
 0x10b   :  { %v923_v50 = vld [vmem:[#allocation11 + $0xb8] sm:$0xff]  ;;  %v922_v51 = vld [vmem:[#allocation11 + $0xb0] sm:$0xff]  ;;  %v925_v52 = vld [vmem:[#allocation11 + $0xc8] sm:$0xff] }
 0x10c   :  { %3424 = vmatmul.mubr.msk.bf16.vlgmr.msra.gmra.mrb[0].mxu1 %vm687_vm1, %v3549_v30  ;;  %v3561_v53 = vld [vmem:[#allocation9 + $0x78] sm:$0xff]   ;;  %v924_v54 = vld [vmem:[#allocation11 + $0xc0] sm:$0xff]  ;;  %v926_v58 = vld [vmem:[#allocation11 + $0xd0] sm:$0xff] }
 0x10d   :  { %3427 = vmatprep.mubr.msk.bf16.mxu1 %vm687_vm1, %v3551_v31  ;;  %v3552_v55 = vld [vmem:[#allocation8 + $0x58] sm:$0xff]   ;;  %v3554_v56 = vld [vmem:[#allocation8 + $0x60] sm:$0xff]   ;;  %v929_v59 = vld [vmem:[#allocation11 + $0xe8] sm:$0xff] }
 0x10e   :  { %979 = vperm.xlu1 %3537, %v909_v17   ;;  %974 = vperm.xlu0 %3536, %v908_v19   ;;  %v927_v57 = vld [vmem:[#allocation11 + $0xd8] sm:$0xff]  ;;  %v928_v60 = vld [vmem:[#allocation11 + $0xe0] sm:$0xff]  ;;  %v3556_v61 = vld [vmem:[#allocation8 + $0x68] sm:$0xff]  }
 0x10f   :  { %v3558_v62 = vld [vmem:[#allocation8 + $0x70] sm:$0xff]   ;;  %v931_v63 = vld [vmem:[#allocation11 + $0xf8] sm:$0xff]  ;;  %v1382_v1 = vld [vmem:[#allocation12 + $0x88] sm:$0xff] }
 0x110   :  { %3378 = vmatmul.mubr.msk.bf16.gmra.mrb[4].mxu0 %vm394_vm0, %v3541_v21  ;;  %v930_v0 = vld [vmem:[#allocation11 + $0xf0] sm:$0xff]  ;;  %v1381_v2 = vld [vmem:[#allocation12 + $0x80] sm:$0xff]  ;;  %v3560_v3 = vld [vmem:[#allocation8 + $0x78] sm:$0xff]  }
 0x111   :  { %3381 = vmatprep.mubr.msk.bf16.mxu0 %vm394_vm0, %v3542_v24  ;;  %v1366_v4 = vld [vmem:[#allocation12 + $0x8] sm:$0xff]  ;;  %v1365_v5 = vld [vmem:[#allocation12] sm:$0xff]  ;;  %v3564_v12 = vld [vmem:[#allocation9 + $0x10] sm:$0xff]  }
 0x112   :  { %989 = vperm.xlu1 %3537, %v911_v22   ;;  %984 = vperm.xlu0 %3536, %v910_v27   ;;  %v3562_v6 = vld [vmem:[#allocation9] sm:$0xff]   ;;  %v1606_v7 = vld [vmem:[#allocation14 + $0x88] sm:$0xff]  ;;  %v1384_v13 = vld [vmem:[#allocation12 + $0x98] sm:$0xff] }
 0x113   :  { %v1605_v8 = vld [vmem:[#allocation14 + $0x80] sm:$0xff]  ;;  %v3563_v9 = vld [vmem:[#allocation9 + $0x8] sm:$0xff]   ;;  %v1383_v14 = vld [vmem:[#allocation12 + $0x90] sm:$0xff] }
 0x114   :  { %3428 = vmatmul.mubr.msk.bf16.gmra.mrb[4].mxu1 %vm687_vm1, %v3553_v37  ;;  %v1590_v10 = vld [vmem:[#allocation14 + $0x8] sm:$0xff]  ;;  %v1589_v11 = vld [vmem:[#allocation14] sm:$0xff]  ;;  %v3565_v15 = vld [vmem:[#allocation9 + $0x18] sm:$0xff]  }
 0x115   :  { %3431 = vmatprep.mubr.msk.bf16.mxu1 %vm687_vm1, %v3555_v39  ;;  %v1368_v16 = vld [vmem:[#allocation12 + $0x18] sm:$0xff]  ;;  %v1367_v17 = vld [vmem:[#allocation12 + $0x10] sm:$0xff]  ;;  %v3566_v18 = vld [vmem:[#allocation9 + $0x20] sm:$0xff]  }
 0x116   :  { %999 = vperm.xlu1 %3537, %v913_v28   ;;  %994 = vperm.xlu0 %3536, %v912_v29   ;;  %v1608_v19 = vld [vmem:[#allocation14 + $0x98] sm:$0xff]  ;;  %v1607_v20 = vld [vmem:[#allocation14 + $0x90] sm:$0xff]  ;;  %v3567_v21 = vld [vmem:[#allocation9 + $0x28] sm:$0xff]  }
 0x117   :  { %v3568_v22 = vld [vmem:[#allocation9 + $0x30] sm:$0xff]   ;;  %v1592_v23 = vld [vmem:[#allocation14 + $0x18] sm:$0xff]  ;;  %v1386_v25 = vld [vmem:[#allocation12 + $0xa8] sm:$0xff] }
 0x118   :  { %3382 = vmatmul.mubr.msk.bf16.gmra.mrb[8].mxu0 %vm394_vm0, %v3543_v32  ;;  %v1591_v24 = vld [vmem:[#allocation14 + $0x10] sm:$0xff]  ;;  %v1385_v26 = vld [vmem:[#allocation12 + $0xa0] sm:$0xff]  ;;  %v3569_v27 = vld [vmem:[#allocation9 + $0x38] sm:$0xff]  }
 0x119   :  { %3385 = vmatprep.mubr.msk.bf16.mxu0 %vm394_vm0, %v3544_v33  ;;  %v1370_v28 = vld [vmem:[#allocation12 + $0x28] sm:$0xff]  ;;  %v1369_v29 = vld [vmem:[#allocation12 + $0x20] sm:$0xff]  ;;  %v1371_v37 = vld [vmem:[#allocation12 + $0x30] sm:$0xff] }
 0x11a   :  { %1009 = vperm.xlu1 %3537, %v915_v34   ;;  %1004 = vperm.xlu0 %3536, %v914_v35   ;;  %v1610_v30 = vld [vmem:[#allocation14 + $0xa8] sm:$0xff]  ;;  %v1609_v31 = vld [vmem:[#allocation14 + $0xa0] sm:$0xff]  ;;  %v1388_v34 = vld [vmem:[#allocation12 + $0xb8] sm:$0xff] }
 0x11b   :  { %v1594_v32 = vld [vmem:[#allocation14 + $0x28] sm:$0xff]  ;;  %v1593_v33 = vld [vmem:[#allocation14 + $0x20] sm:$0xff]  ;;  %v1387_v35 = vld [vmem:[#allocation12 + $0xb0] sm:$0xff] }
 0x11c   :  { %3432 = vmatmul.mubr.msk.bf16.gmra.mrb[8].mxu1 %vm687_vm1, %v3557_v46  ;;  %v1611_v39 = vld [vmem:[#allocation14 + $0xb0] sm:$0xff]  ;;  %v1374_v46 = vld [vmem:[#allocation12 + $0x48] sm:$0xff] }
 0x11d   :  { %3435 = vmatprep.mubr.msk.bf16.mxu1 %vm687_vm1, %v3559_v47  ;;  %v1373_v47 = vld [vmem:[#allocation12 + $0x40] sm:$0xff] }
 0x11e   :  { %1019 = vperm.xlu1 %3537, %v917_v36   ;;  %1014 = vperm.xlu0 %3536, %v916_v38   ;;  %v1372_v36 = vld [vmem:[#allocation12 + $0x38] sm:$0xff] }
 0x11f   :  { %v1612_v38 = vld [vmem:[#allocation14 + $0xb8] sm:$0xff] }
 0x120   :  { %3386 = vmatmul.mubr.msk.bf16.gmra.mrb[12].mxu0 %vm394_vm0, %v3545_v40  ;;  %v1596_v40 = vld [vmem:[#allocation14 + $0x38] sm:$0xff] }
 0x121   :  { %3389 = vmatprep.mubr.msk.bf16.mxu0 %vm394_vm0, %v3546_v41  ;;  %v1595_v41 = vld [vmem:[#allocation14 + $0x30] sm:$0xff] }
 0x122   :  { %1029 = vperm.xlu1 %3537, %v919_v42   ;;  %1024 = vperm.xlu0 %3536, %v918_v43   ;;  %v1390_v42 = vld [vmem:[#allocation12 + $0xc8] sm:$0xff]  ;;  %v1389_v43 = vld [vmem:[#allocation12 + $0xc0] sm:$0xff] }
 0x124   :  { %3436 = vmatmul.mubr.msk.bf16.gmra.mrb[12].mxu1 %vm687_vm1, %v3561_v53 }
 0x126   :  { %1039 = vperm.xlu1 %3537, %v921_v44   ;;  %1034 = vperm.xlu0 %3536, %v920_v45  }
 0x128   :  { %3390 = vmatmul.mubr.msk.bf16.gmra.mrb[16].mxu0 %vm394_vm0, %v3548_v48 }
 0x129   :  { %3393 = vmatprep.mubr.msk.bf16.mxu0 %vm394_vm0, %v3550_v49 }
 0x12a   :  { %1049 = vperm.xlu1 %3537, %v923_v50   ;;  %1044 = vperm.xlu0 %3536, %v922_v51   ;;  %v1614_v50 = vld [vmem:[#allocation14 + $0xc8] sm:$0xff]  ;;  %v1613_v51 = vld [vmem:[#allocation14 + $0xc0] sm:$0xff] }
 0x12e   :  { %1059 = vperm.xlu1 %3537, %v925_v52   ;;  %1054 = vperm.xlu0 %3536, %v924_v54   ;;  %v1598_v54 = vld [vmem:[#allocation14 + $0x48] sm:$0xff] }
 0x130   :  { %3394 = vmatmul.mubr.msk.bf16.gmra.mrb[20].mxu0 %vm394_vm0, %v3552_v55  ;;  %v1597_v55 = vld [vmem:[#allocation14 + $0x40] sm:$0xff] }
 0x131   :  { %3397 = vmatprep.mubr.msk.bf16.mxu0 %vm394_vm0, %v3554_v56 }
 0x132   :  { %1069 = vperm.xlu1 %3537, %v927_v57   ;;  %1064 = vperm.xlu0 %3536, %v926_v58   ;;  %v1392_v58 = vld [vmem:[#allocation12 + $0xd8] sm:$0xff] }
 0x136   :  { %1079 = vperm.xlu1 %3537, %v929_v59   ;;  %1074 = vperm.xlu0 %3536, %v928_v60   ;;  %v1391_v59 = vld [vmem:[#allocation12 + $0xd0] sm:$0xff] }
 0x138   :  { %3398 = vmatmul.mubr.msk.bf16.gmra.mrb[24].mxu0 %vm394_vm0, %v3556_v61 }
 0x139   :  { %3401 = vmatprep.mubr.msk.bf16.mxu0 %vm394_vm0, %v3558_v62  ;;  %v1376_v62 = vld [vmem:[#allocation12 + $0x58] sm:$0xff] }
 0x13a   :  { %1089 = vperm.xlu1 %3537, %v931_v63   ;;  %1084 = vperm.xlu0 %3536, %v930_v0   ;;  %v1375_v63 = vld [vmem:[#allocation12 + $0x50] sm:$0xff] }
 0x13e   :  { %1484 = vperm.xlu1 %3537, %v1382_v1   ;;  %1479 = vperm.xlu0 %3536, %v1381_v2   ;;  %v1616_v2 = vld [vmem:[#allocation14 + $0xd8] sm:$0xff] }
 0x140   :  { %3402 = vmatmul.mubr.msk.bf16.gmra.mrb[28].mxu0 %vm394_vm0, %v3560_v3  ;;  %v1615_v3 = vld [vmem:[#allocation14 + $0xd0] sm:$0xff] }
 0x141   :  { %3407 = vmatprep.mubr.msk.bf16.mxu0 %vm687_vm1, %v3562_v6  ;;  %v1600_v6 = vld [vmem:[#allocation14 + $0x58] sm:$0xff] }
 0x142   :  { %1404 = vperm.xlu1 %3537, %v1366_v4   ;;  %1399 = vperm.xlu0 %3536, %v1365_v5  }
 0x146   :  { %1708 = vperm.xlu1 %3537, %v1606_v7   ;;  %1703 = vperm.xlu0 %3536, %v1605_v8   ;;  %v1599_v7 = vld [vmem:[#allocation14 + $0x50] sm:$0xff] }
 0x148   :  { %3408 = vmatmul.mubr.msk.bf16.vlgmr.msra.gmra.mrb[0].mxu0 %vm687_vm1, %v3563_v9 }
 0x149   :  { %3411 = vmatprep.mubr.msk.bf16.mxu0 %vm687_vm1, %v3564_v12 }
 0x14a   :  { %1628 = vperm.xlu1 %3537, %v1590_v10   ;;  %1623 = vperm.xlu0 %3536, %v1589_v11   ;;  %v1394_v10 = vld [vmem:[#allocation12 + $0xe8] sm:$0xff]  ;;  %v1393_v11 = vld [vmem:[#allocation12 + $0xe0] sm:$0xff] }
 0x14e   :  { %1494 = vperm.xlu1 %3537, %v1384_v13   ;;  %1489 = vperm.xlu0 %3536, %v1383_v14   ;;  %v1378_v13 = vld [vmem:[#allocation12 + $0x68] sm:$0xff]  ;;  %v1377_v14 = vld [vmem:[#allocation12 + $0x60] sm:$0xff] }
 0x150   :  { %3412 = vmatmul.mubr.msk.bf16.gmra.mrb[4].mxu0 %vm687_vm1, %v3565_v15 }
 0x151   :  { %3415 = vmatprep.mubr.msk.bf16.mxu0 %vm687_vm1, %v3566_v18  ;;  %v1617_v18 = vld [vmem:[#allocation14 + $0xe0] sm:$0xff] }
 0x152   :  { %1414 = vperm.xlu1 %3537, %v1368_v16   ;;  %1409 = vperm.xlu0 %3536, %v1367_v17   ;;  %v1618_v17 = vld [vmem:[#allocation14 + $0xe8] sm:$0xff] }
 0x156   :  { %1718 = vperm.xlu1 %3537, %v1608_v19   ;;  %1713 = vperm.xlu0 %3536, %v1607_v20  }
 0x158   :  { %3416 = vmatmul.mubr.msk.bf16.gmra.mrb[8].mxu0 %vm687_vm1, %v3567_v21  ;;  %v1602_v21 = vld [vmem:[#allocation14 + $0x68] sm:$0xff] }
 0x159   :  { %3419 = vmatprep.mubr.msk.bf16.mxu0 %vm687_vm1, %v3568_v22  ;;  %v1601_v22 = vld [vmem:[#allocation14 + $0x60] sm:$0xff] }
 0x15a   :  { %1638 = vperm.xlu1 %3537, %v1592_v23   ;;  %1633 = vperm.xlu0 %3536, %v1591_v24   ;;  %v1396_v23 = vld [vmem:[#allocation12 + $0xf8] sm:$0xff] }
 0x15e   :  { %1504 = vperm.xlu1 %3537, %v1386_v25   ;;  %1499 = vperm.xlu0 %3536, %v1385_v26   ;;  %v1395_v25 = vld [vmem:[#allocation12 + $0xf0] sm:$0xff] }
 0x160   :  { %3420 = vmatmul.mubr.msk.bf16.gmra.mrb[12].mxu0 %vm687_vm1, %v3569_v27  ;;  %v1380_v27 = vld [vmem:[#allocation12 + $0x78] sm:$0xff] }
 0x162   :  { %1424 = vperm.xlu1 %3537, %v1370_v28   ;;  %1419 = vperm.xlu0 %3536, %v1369_v29   ;;  %v1379_v28 = vld [vmem:[#allocation12 + $0x70] sm:$0xff] }
 0x166   :  { %1728 = vperm.xlu1 %3537, %v1610_v30   ;;  %1723 = vperm.xlu0 %3536, %v1609_v31   ;;  %v1620_v31 = vld [vmem:[#allocation14 + $0xf8] sm:$0xff] }
 0x16a   :  { %1648 = vperm.xlu1 %3537, %v1594_v32   ;;  %1643 = vperm.xlu0 %3536, %v1593_v33   ;;  %v1619_v32 = vld [vmem:[#allocation14 + $0xf0] sm:$0xff]  ;;  %v1604_v33 = vld [vmem:[#allocation14 + $0x78] sm:$0xff] }
 0x16e   :  { %1514 = vperm.xlu1 %3537, %v1388_v34   ;;  %1509 = vperm.xlu0 %3536, %v1387_v35   ;;  %v1603_v35 = vld [vmem:[#allocation14 + $0x70] sm:$0xff] }
 0x172   :  { %1434 = vperm.xlu1 %3537, %v1372_v36   ;;  %1429 = vperm.xlu0 %3536, %v1371_v37   ;;  %v1910_v37 = vld [vmem:[#allocation17 + $0x88] sm:$0xff] }
 0x176   :  { %1738 = vperm.xlu1 %3537, %v1612_v38   ;;  %1733 = vperm.xlu0 %3536, %v1611_v39   ;;  %v1909_v38 = vld [vmem:[#allocation17 + $0x80] sm:$0xff] }
 0x17a   :  { %1658 = vperm.xlu1 %3537, %v1596_v40   ;;  %1653 = vperm.xlu0 %3536, %v1595_v41   ;;  %v1894_v41 = vld [vmem:[#allocation17 + $0x8] sm:$0xff] }
 0x17d   :  { %v4348_v44 = vpop.permute.xlu1 %944  ;;  %v4350_v45 = vpop.permute.xlu0 %934 }
 0x17e   :  { %1524 = vperm.xlu1 %3537, %v1390_v42   ;;  %1519 = vperm.xlu0 %3536, %v1389_v43   ;;  %v1893_v42 = vld [vmem:[#allocation17] sm:$0xff]  ;;  %v1912_v43 = vld [vmem:[#allocation17 + $0x98] sm:$0xff] }
 0x181   :  { %v4352_v48 = vpop.permute.xlu1 %949  ;;  %v4354_v49 = vpop.permute.xlu0 %939 }
 0x182   :  { %1444 = vperm.xlu1 %3537, %v1374_v46   ;;  %1439 = vperm.xlu0 %3536, %v1373_v47   ;;  %v1911_v47 = vld [vmem:[#allocation17 + $0x90] sm:$0xff] }
 0x185   :  { %v4356_v52 = vpop.permute.xlu1 %959  ;;  %v4358_v53 = vpop.permute.xlu0 %954 }
 0x186   :  { %1748 = vperm.xlu1 %3537, %v1614_v50   ;;  %1743 = vperm.xlu0 %3536, %v1613_v51   ;;  %v1896_v51 = vld [vmem:[#allocation17 + $0x18] sm:$0xff] }
 0x189   :  { %v4360_v56 = vpop.permute.xlu1 %969  ;;  %v4362_v57 = vpop.permute.xlu0 %964 }
 0x18a   :  { %1668 = vperm.xlu1 %3537, %v1598_v54   ;;  %1663 = vperm.xlu0 %3536, %v1597_v55   ;;  %v1895_v54 = vld [vmem:[#allocation17 + $0x10] sm:$0xff] }
 0x18d   :  { %v4364_v60 = vpop.permute.xlu1 %979  ;;  %v4366_v61 = vpop.permute.xlu0 %974 }
 0x18e   :  { %1534 = vperm.xlu1 %3537, %v1392_v58   ;;  %1529 = vperm.xlu0 %3536, %v1391_v59   ;;  %v1914_v59 = vld [vmem:[#allocation17 + $0xa8] sm:$0xff] }
 0x191   :  { %v4368_v0 = vpop.permute.xlu1 %989  ;;  %v4370_v1 = vpop.permute.xlu0 %984 }
 0x192   :  { %1454 = vperm.xlu1 %3537, %v1376_v62   ;;  %1449 = vperm.xlu0 %3536, %v1375_v63   ;;  %v1913_v62 = vld [vmem:[#allocation17 + $0xa0] sm:$0xff]  ;;  %v1898_v63 = vld [vmem:[#allocation17 + $0x28] sm:$0xff] }
 0x195   :  { %v4372_v4 = vpop.permute.xlu1 %999  ;;  %v4374_v5 = vpop.permute.xlu0 %994 }
 0x196   :  { %1758 = vperm.xlu1 %3537, %v1616_v2   ;;  %1753 = vperm.xlu0 %3536, %v1615_v3   ;;  %v1897_v3 = vld [vmem:[#allocation17 + $0x20] sm:$0xff] }
 0x199   :  { %v4376_v8 = vpop.permute.xlu1 %1009  ;;  %v4378_v9 = vpop.permute.xlu0 %1004 }
 0x19a   :  { %1678 = vperm.xlu1 %3537, %v1600_v6   ;;  %1673 = vperm.xlu0 %3536, %v1599_v7   ;;  %v1916_v7 = vld [vmem:[#allocation17 + $0xb8] sm:$0xff] }
 0x19d   :  { %v4380_v12 = vpop.permute.xlu1 %1019  ;;  %v4382_v15 = vpop.permute.xlu0 %1014 }
 0x19e   :  { %1544 = vperm.xlu1 %3537, %v1394_v10   ;;  %1539 = vperm.xlu0 %3536, %v1393_v11   ;;  %v1915_v10 = vld [vmem:[#allocation17 + $0xb0] sm:$0xff] }
 0x1a1   :  { %v4384_v16 = vpop.permute.xlu1 %1029  ;;  %v4388_v20 = vpop.permute.xlu0 %1024 }
 0x1a2   :  { %1464 = vperm.xlu1 %3537, %v1378_v13   ;;  %1459 = vperm.xlu0 %3536, %v1377_v14   ;;  %v1900_v14 = vld [vmem:[#allocation17 + $0x38] sm:$0xff] }
 0x1a5   :  { %v4386_v19 = vpop.permute.xlu1 %1039  ;;  %v4392_v26 = vpop.permute.xlu0 %1034 }
 0x1a6   :  { %1768 = vperm.xlu1 %3537, %v1618_v17   ;;  %1763 = vperm.xlu0 %3536, %v1617_v18   ;;  %v1899_v17 = vld [vmem:[#allocation17 + $0x30] sm:$0xff]  ;;  %v1918_v18 = vld [vmem:[#allocation17 + $0xc8] sm:$0xff] }
 0x1a9   :  { %v4390_v24 = vpop.permute.xlu1 %1049  ;;  %v4396_v30 = vpop.permute.xlu0 %1044 }
 0x1aa   :  { %1688 = vperm.xlu1 %3537, %v1602_v21   ;;  %1683 = vperm.xlu0 %3536, %v1601_v22   ;;  %v1917_v22 = vld [vmem:[#allocation17 + $0xc0] sm:$0xff] }
 0x1ad   :  { %v4394_v29 = vpop.permute.xlu1 %1059  ;;  %v4400_v36 = vpop.permute.xlu0 %1054 }
 0x1ae   :  { %1554 = vperm.xlu1 %3537, %v1396_v23   ;;  %1549 = vperm.xlu0 %3536, %v1395_v25   ;;  %v1902_v25 = vld [vmem:[#allocation17 + $0x48] sm:$0xff] }
 0x1b1   :  { %v4398_v34 = vpop.permute.xlu1 %1069  ;;  %v4404_v40 = vpop.permute.xlu0 %1064 }
 0x1b2   :  { %1474 = vperm.xlu1 %3537, %v1380_v27   ;;  %1469 = vperm.xlu0 %3536, %v1379_v28   ;;  %v1901_v27 = vld [vmem:[#allocation17 + $0x40] sm:$0xff] }
 0x1b5   :  { %v4402_v39 = vpop.permute.xlu1 %1079  ;;  %v4408_v50 = vpop.permute.xlu0 %1074 }
 0x1b6   :  { %1778 = vperm.xlu1 %3537, %v1620_v31   ;;  %1773 = vperm.xlu0 %3536, %v1619_v32   ;;  %v1920_v32 = vld [vmem:[#allocation17 + $0xd8] sm:$0xff] }
 0x1b9   :  { %v4406_v46 = vpop.permute.xlu1 %1089  ;;  %v4412_v58 = vpop.permute.xlu0 %1084 }
 0x1ba   :  { %1698 = vperm.xlu1 %3537, %v1604_v33   ;;  %1693 = vperm.xlu0 %3536, %v1603_v35   ;;  %5133 = vst [vmem:[#allocation36_spill] sm:$0xff] %v4406_v46  ;;  %v1919_v33 = vld [vmem:[#allocation17 + $0xd0] sm:$0xff]  ;;  %v1904_v35 = vld [vmem:[#allocation17 + $0x58] sm:$0xff] }
 0x1bd   :  { %v4410_v55 = vpop.permute.xlu1 %1484  ;;  %v4416_v6 = vpop.permute.xlu0 %1479 }
 0x1be   :  { %2012 = vperm.xlu1 %3537, %v1910_v37   ;;  %2007 = vperm.xlu0 %3536, %v1909_v38   ;;  %5134 = vst [vmem:[#allocation37_spill] sm:$0xff] %v4410_v55  ;;  %5136 = vst [vmem:[#allocation39_spill] sm:$0xff] %v4416_v6  ;;  %v1903_v38 = vld [vmem:[#allocation17 + $0x50] sm:$0xff] }
 0x1c1   :  { %v4414_v2 = vpop.permute.xlu1 %1404  ;;  %v4420_v13 = vpop.permute.xlu0 %1399 }
 0x1c2   :  { %1932 = vperm.xlu1 %3537, %v1894_v41   ;;  %1927 = vperm.xlu0 %3536, %v1893_v42   ;;  %5135 = vst [vmem:[#allocation38_spill] sm:$0xff] %v4414_v2  ;;  %5138 = vst [vmem:[#allocation41_spill] sm:$0xff] %v4420_v13  ;;  %v2920_v13 = vld [vmem:[#allocation24] sm:$0xff] }
 0x1c5   :  { %v4418_v11 = vpop.permute.xlu1 %1708  ;;  %v4424_v23 = vpop.permute.xlu0 %1703 }
 0x1c6   :  { %2022 = vperm.xlu1 %3537, %v1912_v43   ;;  %2017 = vperm.xlu0 %3536, %v1911_v47   ;;  %5137 = vst [vmem:[#allocation40_spill] sm:$0xff] %v4418_v11  ;;  %5140 = vst [vmem:[#allocation43_spill] sm:$0xff] %v4424_v23  ;;  %v1922_v43 = vld [vmem:[#allocation17 + $0xe8] sm:$0xff]  ;;  %v2472_v11 = vld [vmem:[#allocation20 + $0x10] sm:$0xff] }
 0x1c9   :  { %v4422_v21 = vpop.permute.xlu1 %1628  ;;  %v4428_v31 = vpop.permute.xlu0 %1623 }
 0x1ca   :  { %1942 = vperm.xlu1 %3537, %v1896_v51   ;;  %1937 = vperm.xlu0 %3536, %v1895_v54   ;;  %5139 = vst [vmem:[#allocation42_spill] sm:$0xff] %v4422_v21  ;;  %5142 = vst [vmem:[#allocation45_spill] sm:$0xff] %v4428_v31  ;;  %v1921_v51 = vld [vmem:[#allocation17 + $0xe0] sm:$0xff] }
 0x1cd   :  { %v4426_v28 = vpop.permute.xlu1 %1494  ;;  %v4432_v41 = vpop.permute.xlu0 %1489 }
 0x1ce   :  { %2032 = vperm.xlu1 %3537, %v1914_v59   ;;  %2027 = vperm.xlu0 %3536, %v1913_v62   ;;  %5141 = vst [vmem:[#allocation44_spill] sm:$0xff] %v4426_v28  ;;  %5144 = vst [vmem:[#allocation47_spill] sm:$0xff] %v4432_v41 }
 0x1d1   :  { %v4430_v37 = vpop.permute.xlu1 %1414 }
 0x1d2   :  { %1952 = vperm.xlu1 %3537, %v1898_v63   ;;  %1947 = vperm.xlu0 %3536, %v1897_v3   ;;  %5143 = vst [vmem:[#allocation46_spill] sm:$0xff] %v4430_v37  ;;  %v4436_v63 = vpop.permute.xlu0 %1409  ;;  %v1906_v3 = vld [vmem:[#allocation17 + $0x68] sm:$0xff] }
 0x1d3   :  { %5146 = vst [vmem:[#allocation49_spill] sm:$0xff] %v4436_v63  ;;  %v2476_v63 = vld [vmem:[#allocation20 + $0x30] sm:$0xff] }
 0x1d5   :  { %v4434_v62 = vpop.permute.xlu1 %1718 }
 0x1d6   :  { %2042 = vperm.xlu1 %3537, %v1916_v7   ;;  %2037 = vperm.xlu0 %3536, %v1915_v10   ;;  %5145 = vst [vmem:[#allocation48_spill] sm:$0xff] %v4434_v62  ;;  %v1905_v7 = vld [vmem:[#allocation17 + $0x60] sm:$0xff] }
 0x1da   :  { %1962 = vperm.xlu1 %3537, %v1900_v14   ;;  %1957 = vperm.xlu0 %3536, %v1899_v17   ;;  %v1924_v14 = vld [vmem:[#allocation17 + $0xf8] sm:$0xff] }
 0x1de   :  { %2052 = vperm.xlu1 %3537, %v1918_v18   ;;  %2047 = vperm.xlu0 %3536, %v1917_v22   ;;  %v4438_v18 = vpop.permute.xlu1 %1638  ;;  %v1923_v22 = vld [vmem:[#allocation17 + $0xf0] sm:$0xff] }
 0x1df   :  { %v3425_v42 = vpop.f32.mrb[0].mxu1  ;;  %5147 = vst [vmem:[#allocation50_spill] sm:$0xff] %v4438_v18  ;;  %v2470_v18 = vld [vmem:[#allocation20] sm:$0xff] }
 0x1e0   :  { %v837_v47 = vpop.f32.mrb[1].mxu1 }
 0x1e1   :  { %v3426_v54 = vpop.f32.mrb[2].mxu1 }
 0x1e2   :  { %1972 = vperm.xlu1 %3537, %v1902_v25   ;;  %1967 = vperm.xlu0 %3536, %v1901_v27   ;;  %v840_v59 = vpop.f32.mrb[3].mxu1  ;;  %v4440_v27 = vpop.permute.xlu0 %1713 }
 0x1e3   :  { %5148 = vst [vmem:[#allocation51_spill] sm:$0xff] %v4440_v27 }
 0x1e6   :  { %2062 = vperm.xlu1 %3537, %v1920_v32   ;;  %2057 = vperm.xlu0 %3536, %v1919_v33   ;;  %v1908_v33 = vld [vmem:[#allocation17 + $0x78] sm:$0xff] }
 0x1e7   :  { %v3429_v10 = vpop.f32.mrb[4].mxu1 }
 0x1e8   :  { %v853_v17 = vpop.f32.mrb[5].mxu1 }
 0x1e9   :  { %v3430_v25 = vpop.f32.mrb[6].mxu1 }
 0x1ea   :  { %1982 = vperm.xlu1 %3537, %v1904_v35   ;;  %1977 = vperm.xlu0 %3536, %v1903_v38   ;;  %v856_v32 = vpop.f32.mrb[7].mxu1  ;;  %v1907_v35 = vld [vmem:[#allocation17 + $0x70] sm:$0xff]  ;;  %v4442_v38 = vpop.permute.xlu1 %1504 }
 0x1eb   :  { %5149 = vst [vmem:[#allocation52_spill] sm:$0xff] %v4442_v38  ;;  %v2473_v38 = vld [vmem:[#allocation20 + $0x18] sm:$0xff] }
 0x1ee   :  { %2072 = vperm.xlu1 %3537, %v1922_v43   ;;  %2067 = vperm.xlu0 %3536, %v1921_v51   ;;  %v4444_v51 = vpop.permute.xlu0 %1633 }
 0x1ef   :  { %v3433_v43 = vpop.f32.mrb[8].mxu1  ;;  %5150 = vst [vmem:[#allocation53_spill] sm:$0xff] %v4444_v51  ;;  %v4452_v51 = vpop.permute.xlu1 %1424 }
 0x1f0   :  { %5151 = vst [vmem:[#allocation54_spill] sm:$0xff] %v4452_v51 }
 0x1f2   :  { %1992 = vperm.xlu1 %3537, %v1906_v3   ;;  %1987 = vperm.xlu0 %3536, %v1905_v7   ;;  %v2471_v3 = vld [vmem:[#allocation20 + $0x8] sm:$0xff]  ;;  %v869_v7 = vpop.f32.mrb[9].mxu1  ;;  %v4456_v23 = vpop.permute.xlu0 %1499 }
 0x1f3   :  { %v3434_v28 = vpop.f32.mrb[10].mxu1  ;;  %5152 = vst [vmem:[#allocation55_spill] sm:$0xff] %v4456_v23  ;;  %v4460_v55 = vpop.permute.xlu1 %1728  ;;  %v2477_v23 = vld [vmem:[#allocation20 + $0x38] sm:$0xff] }
 0x1f4   :  { %v872_v31 = vpop.f32.mrb[11].mxu1  ;;  %5153 = vst [vmem:[#allocation56_spill] sm:$0xff] %v4460_v55 }
 0x1f6   :  { %2082 = vperm.xlu1 %3537, %v1924_v14   ;;  %2077 = vperm.xlu0 %3536, %v1923_v22   ;;  %v4466_v51 = vpop.permute.xlu0 %1419 }
 0x1f7   :  { %5154 = vst [vmem:[#allocation57_spill] sm:$0xff] %v4466_v51 }
 0x1fa   :  { %2002 = vperm.xlu1 %3537, %v1908_v33   ;;  %1997 = vperm.xlu0 %3536, %v1907_v35  }
 0x1fb   :  { %v3391_v62 = vpop.f32.mrb[16].mxu0 }
 0x1fc   :  { %v4446_v41 = vadd.f32 %v3425_v42, %v3391_v62  ;;  %v544_v27 = vpop.f32.mrb[17].mxu0  ;;  %v3437_v42 = vpop.f32.mrb[12].mxu1 }
 0x1fd   :  { %v4448_v21 = vadd.f32 %v837_v47, %v544_v27  ;;  %v3392_v14 = vpop.f32.mrb[18].mxu0  ;;  %v2475_v47 = vld [vmem:[#allocation20 + $0x28] sm:$0xff]  ;;  %v885_v62 = vpop.f32.mrb[13].mxu1 }
 0x1fe   :  { %2493 = vperm.xlu1 %3537, %v2471_v3   ;;  %v4450_v22 = vadd.f32 %v3426_v54, %v3392_v14  ;;  %2488 = vperm.xlu0 %3536, %v2470_v18   ;;  %v547_v33 = vpop.f32.mrb[19].mxu0  ;;  %v2474_v3 = vld [vmem:[#allocation20 + $0x20] sm:$0xff]  ;;  %v3438_v54 = vpop.f32.mrb[14].mxu1 }
 0x1ff   :  { %v4454_v35 = vadd.f32 %v840_v59, %v547_v33 }
 0x202   :  { %2503 = vperm.xlu1 %3537, %v2473_v38   ;;  %2498 = vperm.xlu0 %3536, %v2472_v11   ;;  %v888_v11 = vpop.f32.mrb[15].mxu1 }
 0x203   :  { %v3395_v27 = vpop.f32.mrb[20].mxu0 }
 0x204   :  { %v4458_v14 = vadd.f32 %v3429_v10, %v3395_v27  ;;  %v560_v18 = vpop.f32.mrb[21].mxu0  ;;  %v2479_v10 = vld [vmem:[#allocation20 + $0x48] sm:$0xff]  ;;  %v4470_v27 = vpop.permute.xlu1 %1648 }
 0x205   :  { %v4462_v6 = vadd.f32 %v853_v17, %v560_v18  ;;  %v3396_v59 = vpop.f32.mrb[22].mxu0  ;;  %5155 = vst [vmem:[#allocation58_spill] sm:$0xff] %v4470_v27  ;;  %v2478_v18 = vld [vmem:[#allocation20 + $0x40] sm:$0xff] }
 0x206   :  { %2513 = vperm.xlu1 %3537, %v2475_v47   ;;  %v4464_v33 = vadd.f32 %v3430_v25, %v3396_v59  ;;  %2508 = vperm.xlu0 %3536, %v2474_v3   ;;  %v563_v38 = vpop.f32.mrb[23].mxu0  ;;  %v4474_v47 = vpop.permute.xlu0 %1723 }
 0x207   :  { %v4468_v37 = vadd.f32 %v856_v32, %v563_v38  ;;  %5156 = vst [vmem:[#allocation59_spill] sm:$0xff] %v4474_v47  ;;  %v2480_v38 = vld [vmem:[#allocation20 + $0x50] sm:$0xff] }
 0x208   :  { %v4482_v27 = vpop.permute.xlu1 %1514 }
 0x209   :  { %5157 = vst [vmem:[#allocation60_spill] sm:$0xff] %v4482_v27 }
 0x20a   :  { %2523 = vperm.xlu1 %3537, %v2477_v23   ;;  %2518 = vperm.xlu0 %3536, %v2476_v63   ;;  %v2481_v23 = vld [vmem:[#allocation20 + $0x58] sm:$0xff] }
 0x20b   :  { %v3399_v17 = vpop.f32.mrb[24].mxu0 }
 0x20c   :  { %v4472_v55 = vadd.f32 %v3433_v43, %v3399_v17  ;;  %v576_v25 = vpop.f32.mrb[25].mxu0  ;;  %v2483_v43 = vld [vmem:[#allocation20 + $0x68] sm:$0xff]  ;;  %v4484_v17 = vpop.permute.xlu0 %1643 }
 0x20d   :  { %v4476_v3 = vadd.f32 %v869_v7, %v576_v25  ;;  %v3400_v59 = vpop.f32.mrb[26].mxu0  ;;  %5158 = vst [vmem:[#allocation61_spill] sm:$0xff] %v4484_v17  ;;  %v2482_v7 = vld [vmem:[#allocation20 + $0x60] sm:$0xff]  ;;  %v4492_v27 = vpop.permute.xlu1 %1434 }
 0x20e   :  { %2533 = vperm.xlu1 %3537, %v2479_v10   ;;  %v4478_v51 = vadd.f32 %v3434_v28, %v3400_v59  ;;  %2528 = vperm.xlu0 %3536, %v2478_v18   ;;  %v579_v32 = vpop.f32.mrb[27].mxu0  ;;  %5159 = vst [vmem:[#allocation62_spill] sm:$0xff] %v4492_v27 }
 0x20f   :  { %v4480_v63 = vadd.f32 %v872_v31, %v579_v32  ;;  %v2485_v32 = vld [vmem:[#allocation20 + $0x78] sm:$0xff] }
 0x210   :  { %v4496_v17 = vpop.permute.xlu0 %1509 }
 0x211   :  { %5160 = vst [vmem:[#allocation63_spill] sm:$0xff] %v4496_v17  ;;  %v4498_v2 = vpop.permute.xlu1 %1738 }
 0x212   :  { %2543 = vperm.xlu1 %3537, %v2481_v23   ;;  %2538 = vperm.xlu0 %3536, %v2480_v38   ;;  %v2484_v38 = vld [vmem:[#allocation20 + $0x70] sm:$0xff]  ;;  %5161 = vst [vmem:[#allocation64_spill] sm:$0xff] %v4498_v2 }
 0x213   :  { %v3403_v47 = vpop.f32.mrb[28].mxu0 }
 0x214   :  { %v4486_v25 = vadd.f32 %v3437_v42, %v3403_v47  ;;  %v592_v10 = vpop.f32.mrb[29].mxu0  ;;  %v2776_v42 = vld [vmem:[#allocation23 + $0x8] sm:$0xff] }
 0x215   :  { %v4488_v28 = vadd.f32 %v885_v62, %v592_v10  ;;  %v3404_v18 = vpop.f32.mrb[30].mxu0  ;;  %v2775_v62 = vld [vmem:[#allocation23] sm:$0xff] }
 0x216   :  { %2553 = vperm.xlu1 %3537, %v2483_v43   ;;  %v4490_v59 = vadd.f32 %v3438_v54, %v3404_v18  ;;  %2548 = vperm.xlu0 %3536, %v2482_v7   ;;  %v595_v31 = vpop.f32.mrb[31].mxu0  ;;  %v2778_v18 = vld [vmem:[#allocation23 + $0x18] sm:$0xff] }
 0x217   :  { %v4494_v23 = vadd.f32 %v888_v11, %v595_v31  ;;  %v4506_v31 = vpop.permute.xlu0 %1429 }
 0x218   :  { %5164 = vst [vmem:[#allocation67_spill] sm:$0xff] %v4506_v31 }
 0x21a   :  { %2563 = vperm.xlu1 %3537, %v2485_v32   ;;  %2558 = vperm.xlu0 %3536, %v2484_v38  }
 0x21b   :  { %v3409_v47 = vpop.f32.mrb[0].mxu0 }
 0x21c   :  { %v773_v10 = vpop.f32.mrb[1].mxu0  ;;  %v4501_v54 = vadd.f32 %v3409_v47, %v4348_v44  ;;  %v2777_v44 = vld [vmem:[#allocation23 + $0x10] sm:$0xff] }
 0x21d   :  { %v4504_v43 = vadd.f32 %v4350_v45, %v773_v10  ;;  %v3410_v7 = vpop.f32.mrb[2].mxu0  ;;  %v2921_v10 = vld [vmem:[#allocation24 + $0x8] sm:$0xff] }
 0x21e   :  { %5162 = vst [vmem:[#allocation65_spill] sm:$0xff] %v4501_v54  ;;  %2790 = vperm.xlu1 %3537, %v2776_v42   ;;  %2785 = vperm.xlu0 %3536, %v2775_v62   ;;  %v776_v11 = vpop.f32.mrb[3].mxu0  ;;  %v4511_v38 = vadd.f32 %v3410_v7, %v4352_v48  ;;  %v1197_v45 = vmul.f32 %v4501_v54, %v4501_v54  ;;  %v1128_v7 = vsel %vm1124_vm2, %v4501_v54, 0.0 }
 0x21f   :  { %5163 = vst [vmem:[#allocation66_spill] sm:$0xff] %v4504_v43  ;;  %v1195_v32 = vmul.f32 %v4504_v43, %v4504_v43  ;;  %v4514_v2 = vadd.f32 %v4354_v49, %v776_v11  ;;  %v1125_v42 = vsel %vm1124_vm2, %v4504_v43, 0.0  ;;  %v4524_v49 = vpop.permute.xlu1 %1658 }
 0x220   :  { %5166 = vst [vmem:[#allocation69_spill] sm:$0xff] %v4524_v49  ;;  %v1198_v17 = vmul.f32 %v4511_v38, %v4511_v38 }
 0x221   :  { %5165 = vst [vmem:[#allocation68_spill] sm:$0xff] %v4514_v2  ;;  %v1126_v47 = vsel %vm1124_vm2, %v4514_v2, 0.0  ;;  %v1196_v62 = vmul.f32 %v4514_v2, %v4514_v2  ;;  %v1227_v11 = vsel %vm1124_vm2, %v1195_v32, 0.0 }
 0x222   :  { %2800 = vperm.xlu1 %3537, %v2778_v18   ;;  %v1127_v48 = vadd.f32 %v1126_v47, %v1125_v42  ;;  %2795 = vperm.xlu0 %3536, %v2777_v44   ;;  %v4532_v42 = vpop.permute.xlu0 %1733  ;;  %v1230_v44 = vsel %vm1124_vm2, %v1197_v45, 0.0  ;;  %v1130_v47 = vsel %vm1124_vm2, %v4511_v38, 0.0 }
 0x223   :  { %v1228_v27 = vsel %vm1124_vm2, %v1196_v62, 0.0  ;;  %v3413_v31 = vpop.f32.mrb[4].mxu0  ;;  %5167 = vst [vmem:[#allocation70_spill] sm:$0xff] %v4532_v42 }
 0x224   :  { %v1129_v43 = vadd.f32 %v1128_v7, %v1127_v48  ;;  %v1229_v2 = vadd.f32 %v1228_v27, %v1227_v11  ;;  %v789_v18 = vpop.f32.mrb[5].mxu0  ;;  %v4541_v62 = vadd.f32 %v3413_v31, %v4362_v57  ;;  %v2922_v48 = vld [vmem:[#allocation24 + $0x10] sm:$0xff]  ;;  %v1232_v7 = vsel %vm1124_vm2, %v1198_v17, 0.0 }
 0x225   :  { %v4538_v49 = vadd.f32 %v4358_v53, %v789_v18  ;;  %v3414_v32 = vpop.f32.mrb[6].mxu0 }
 0x226   :  { %2935 = vperm.xlu1 %3537, %v2921_v10   ;;  %v1231_v54 = vadd.f32 %v1230_v44, %v1229_v2  ;;  %v1131_v46 = vadd.f32 %v1130_v47, %v1129_v43  ;;  %2930 = vperm.xlu0 %3536, %v2920_v13   ;;  %v792_v27 = vpop.f32.mrb[7].mxu0  ;;  %v2779_v10 = vld [vmem:[#allocation23 + $0x20] sm:$0xff]  ;;  %v4552_v57 = vadd.f32 %v3414_v32, %v4360_v56  ;;  %v4554_v13 = vpop.permute.xlu1 %1524  ;;  %v1136_v47 = vsel %vm1124_vm2, %v4541_v62, 0.0 }
 0x227   :  { %v1132_v45 = vsel %vm1124_vm2, %v4538_v49, 0.0  ;;  %v1199_v11 = vmul.f32 %v4538_v49, %v4538_v49  ;;  %v4549_v53 = vadd.f32 %v4356_v52, %v792_v27  ;;  %5168 = vst [vmem:[#allocation71_spill] sm:$0xff] %v4554_v13  ;;  %v1201_v31 = vmul.f32 %v4541_v62, %v4541_v62  ;;  %v4563_v56 = vpop.permute.xlu0 %1653  ;;  %v2780_v27 = vld [vmem:[#allocation23 + $0x28] sm:$0xff] }
 0x228   :  { %v1133_v2 = vadd.f32 %v1132_v45, %v1131_v46  ;;  %v1233_v18 = vadd.f32 %v1232_v7, %v1231_v54  ;;  %v2923_v54 = vld [vmem:[#allocation24 + $0x18] sm:$0xff]  ;;  %5169 = vst [vmem:[#allocation72_spill] sm:$0xff] %v4563_v56 }
 0x229   :  { %v1234_v43 = vsel %vm1124_vm2, %v1199_v11, 0.0  ;;  %v1134_v17 = vsel %vm1124_vm2, %v4549_v53, 0.0  ;;  %v1200_v46 = vmul.f32 %v4549_v53, %v4549_v53 }
 0x22a   :  { %2940 = vperm.xlu1 %3537, %v2922_v48   ;;  %v1235_v44 = vadd.f32 %v1234_v43, %v1233_v18  ;;  %v1135_v52 = vadd.f32 %v1134_v17, %v1133_v2  ;;  %2805 = vperm.xlu0 %3536, %v2779_v10   ;;  %v1202_v48 = vmul.f32 %v4552_v57, %v4552_v57  ;;  %v1138_v2 = vsel %vm1124_vm2, %v4552_v57, 0.0 }
 0x22b   :  { %v3417_v32 = vpop.f32.mrb[8].mxu0  ;;  %v1236_v45 = vsel %vm1124_vm2, %v1200_v46, 0.0  ;;  %v1238_v17 = vsel %vm1124_vm2, %v1201_v31, 0.0  ;;  %v4579_v46 = vpop.permute.xlu1 %1444  ;;  %v2781_v31 = vld [vmem:[#allocation23 + $0x30] sm:$0xff] }
 0x22c   :  { %v1137_v7 = vadd.f32 %v1136_v47, %v1135_v52  ;;  %v805_v11 = vpop.f32.mrb[9].mxu0  ;;  %v1237_v18 = vadd.f32 %v1236_v45, %v1235_v44  ;;  %v4577_v13 = vadd.f32 %v3417_v32, %v4370_v1  ;;  %v2924_v47 = vld [vmem:[#allocation24 + $0x20] sm:$0xff]  ;;  %5171 = vst [vmem:[#allocation74_spill] sm:$0xff] %v4579_v46  ;;  %v1240_v1 = vsel %vm1124_vm2, %v1202_v48, 0.0 }
 0x22d   :  { %v4573_v10 = vadd.f32 %v4366_v61, %v805_v11  ;;  %v3418_v43 = vpop.f32.mrb[10].mxu0  ;;  %v3572_v46 = vld [vmem:[#allocation15 + $0x4] ss:$8 sps:$4 sm:$0xff]  }
 0x22e   :  { %2945 = vperm.xlu1 %3537, %v2923_v54   ;;  %5170 = vst [vmem:[#allocation73_spill] sm:$0xff] %v4577_v13  ;;  %v1139_v56 = vadd.f32 %v1138_v2, %v1137_v7  ;;  %2810 = vperm.xlu0 %3536, %v2780_v27   ;;  %v808_v52 = vpop.f32.mrb[11].mxu0  ;;  %v1239_v42 = vadd.f32 %v1238_v17, %v1237_v18  ;;  %v4592_v7 = vpop.permute.xlu0 %1519 }
 0x22f   :  { %v1140_v44 = vsel %vm1124_vm2, %v4573_v10, 0.0  ;;  %v1203_v61 = vmul.f32 %v4573_v10, %v4573_v10  ;;  %v4586_v54 = vadd.f32 %v4364_v60, %v808_v52  ;;  %v4590_v27 = vadd.f32 %v3418_v43, %v4368_v0  ;;  %5172 = vst [vmem:[#allocation75_spill] sm:$0xff] %v4592_v7  ;;  %v2782_v52 = vld [vmem:[#allocation23 + $0x38] sm:$0xff]  ;;  %2277 = vmatprep.mubr.bf16.mxu1 %v3572_v46 }
 0x230   :  { %v1141_v32 = vadd.f32 %v1140_v44, %v1139_v56  ;;  %v1241_v45 = vadd.f32 %v1240_v1, %v1239_v42  ;;  %v1205_v60 = vmul.f32 %v4577_v13, %v4577_v13  ;;  %v2925_v56 = vld [vmem:[#allocation24 + $0x28] sm:$0xff]  ;;  %v1144_v0 = vsel %vm1124_vm2, %v4577_v13, 0.0 }
 0x231   :  { %v1242_v11 = vsel %vm1124_vm2, %v1203_v61, 0.0  ;;  %v1142_v2 = vsel %vm1124_vm2, %v4586_v54, 0.0  ;;  %v1204_v18 = vmul.f32 %v4586_v54, %v4586_v54  ;;  %v1206_v44 = vmul.f32 %v4590_v27, %v4590_v27 }
 0x232   :  { %2950 = vperm.xlu1 %3537, %v2924_v47   ;;  %v1143_v48 = vadd.f32 %v1142_v2, %v1141_v32  ;;  %2815 = vperm.xlu0 %3536, %v2781_v31   ;;  %v1243_v43 = vadd.f32 %v1242_v11, %v1241_v45  ;;  %v4606_v47 = vpop.permute.xlu1 %1748  ;;  %v1146_v32 = vsel %vm1124_vm2, %v4590_v27, 0.0  ;;  %v1246_v45 = vsel %vm1124_vm2, %v1205_v60, 0.0  ;;  %v2926_v60 = vld [vmem:[#allocation24 + $0x30] sm:$0xff] }
 0x233   :  { %v1244_v42 = vsel %vm1124_vm2, %v1204_v18, 0.0  ;;  %v3421_v17 = vpop.f32.mrb[12].mxu0  ;;  %5173 = vst [vmem:[#allocation76_spill] sm:$0xff] %v4606_v47  ;;  %v4617_v47 = vpop.permute.xlu0 %1439 }
 0x234   :  { %v1145_v61 = vadd.f32 %v1144_v0, %v1143_v48  ;;  %v821_v1 = vpop.f32.mrb[13].mxu0  ;;  %v1245_v31 = vadd.f32 %v1244_v42, %v1243_v43  ;;  %v4615_v11 = vadd.f32 %v3421_v17, %v4378_v9  ;;  %v2927_v0 = vld [vmem:[#allocation24 + $0x38] sm:$0xff]  ;;  %v1248_v9 = vsel %vm1124_vm2, %v1206_v44, 0.0 }
 0x235   :  { %v4611_v2 = vadd.f32 %v4374_v5, %v821_v1  ;;  %v3422_v7 = vpop.f32.mrb[14].mxu0 }
 0x236   :  { %2955 = vperm.xlu1 %3537, %v2925_v56   ;;  %v1147_v18 = vadd.f32 %v1146_v32, %v1145_v61  ;;  %2820 = vperm.xlu0 %3536, %v2782_v52   ;;  %v824_v48 = vpop.f32.mrb[15].mxu0  ;;  %v1247_v13 = vadd.f32 %v1246_v45, %v1245_v31  ;;  %v4628_v17 = vadd.f32 %v3422_v7, %v4376_v8  ;;  %v4641_v46 = vpop.permute.xlu1 %1668  ;;  %v2997_v45 = vld [vmem:[#allocation2] sm:$0x1] }
 0x237   :  { %v1148_v43 = vsel %vm1124_vm2, %v4611_v2, 0.0  ;;  %v1207_v5 = vmul.f32 %v4611_v2, %v4611_v2  ;;  %v4624_v56 = vadd.f32 %v4372_v4, %v824_v48  ;;  %v4637_v4 = vadd.f32 %v4382_v15, %v4448_v21  ;;  %5174 = vst [vmem:[#allocation77_spill] sm:$0xff] %v4641_v46  ;;  %v4652_v48 = vpop.permute.xlu0 %1743 }
 0x238   :  { %v1149_v42 = vadd.f32 %v1148_v43, %v1147_v18  ;;  %v1249_v52 = vadd.f32 %v1248_v9, %v1247_v13  ;;  %v1209_v44 = vmul.f32 %v4615_v11, %v4615_v11  ;;  %v1152_v13 = vsel %vm1124_vm2, %v4615_v11, 0.0  ;;  %5175 = vst [vmem:[#allocation78_spill] sm:$0xff] %v4652_v48 }
 0x239   :  { %v1250_v61 = vsel %vm1124_vm2, %v1207_v5, 0.0  ;;  %v1150_v1 = vsel %vm1124_vm2, %v4624_v56, 0.0  ;;  %v1208_v32 = vmul.f32 %v4624_v56, %v4624_v56  ;;  %v4648_v18 = vadd.f32 %v4380_v12, %v4454_v35 }
 0x23a   :  { %2965 = vperm.xlu1 %3537, %v2927_v0   ;;  %v1151_v8 = vadd.f32 %v1150_v1, %v1149_v42  ;;  %2960 = vperm.xlu0 %3536, %v2926_v60   ;;  %v1251_v7 = vadd.f32 %v1250_v61, %v1249_v52  ;;  %v1210_v15 = vmul.f32 %v4628_v17, %v4628_v17  ;;  %v1154_v0 = vsel %vm1124_vm2, %v4628_v17, 0.0 }
 0x23b   :  { %v1252_v31 = vsel %vm1124_vm2, %v1208_v32, 0.0  ;;  %v4658_v5 = vadd.f32 %v4388_v20, %v4446_v41  ;;  %v1211_v60 = vmul.f32 %v4637_v4, %v4637_v4  ;;  %v1254_v12 = vsel %vm1124_vm2, %v1209_v44, 0.0  ;;  %v4674_v32 = vpop.permute.xlu1 %1534 }
 0x23c   :  { %v1153_v21 = vadd.f32 %v1152_v13, %v1151_v8  ;;  %v1253_v43 = vadd.f32 %v1252_v31, %v1251_v7  ;;  %v1156_v9 = vsel %vm1124_vm2, %v4637_v4, 0.0  ;;  %v4667_v52 = vadd.f32 %v4384_v16, %v4450_v22  ;;  %v4685_v31 = vpop.permute.xlu0 %1663 }
 0x23d   :  { %v1212_v61 = vmul.f32 %v4648_v18, %v4648_v18  ;;  %v1256_v20 = vsel %vm1124_vm2, %v1210_v15, 0.0  ;;  %v1158_v1 = vsel %vm1124_vm2, %v4648_v18, 0.0  ;;  %v1213_v8 = vmul.f32 %v4658_v5, %v4658_v5  ;;  %5176 = vst [vmem:[#allocation79_spill] sm:$0xff] %v4685_v31 }
 0x23e   :  { %v1155_v35 = vadd.f32 %v1154_v0, %v1153_v21  ;;  %3000 = vperm.xlu0 %3536, %v2997_v45   ;;  %v1255_v42 = vadd.f32 %v1254_v12, %v1253_v43  ;;  %v1258_v13 = vsel %vm1124_vm2, %v1211_v60, 0.0  ;;  %v4681_v16 = vadd.f32 %v4392_v26, %v4462_v6 }
 0x23f   :  { %v1160_v7 = vsel %vm1124_vm2, %v4658_v5, 0.0  ;;  %v1214_v15 = vmul.f32 %v4667_v52, %v4667_v52  ;;  %v1260_v21 = vsel %vm1124_vm2, %v1212_v61, 0.0  ;;  %v4692_v0 = vadd.f32 %v4386_v19, %v4468_v37  ;;  %v4705_v19 = vpop.permute.xlu1 %1454 }
 0x240   :  { %v1157_v41 = vadd.f32 %v1156_v9, %v1155_v35  ;;  %v1257_v44 = vadd.f32 %v1256_v20, %v1255_v42  ;;  %v1162_v26 = vsel %vm1124_vm2, %v4667_v52, 0.0  ;;  %v1262_v60 = vsel %vm1124_vm2, %v1213_v8, 0.0 }
 0x241   :  { %v4699_v12 = vadd.f32 %v4396_v30, %v4458_v14  ;;  %v1215_v35 = vmul.f32 %v4681_v16, %v4681_v16  ;;  %v1164_v42 = vsel %vm1124_vm2, %v4681_v16, 0.0  ;;  %v1264_v61 = vsel %vm1124_vm2, %v1214_v15, 0.0 }
 0x242   :  { %v1159_v22 = vadd.f32 %v1158_v1, %v1157_v41  ;;  %v1259_v45 = vadd.f32 %v1258_v13, %v1257_v44  ;;  %v4710_v20 = vadd.f32 %v4390_v24, %v4464_v33  ;;  %v1216_v30 = vmul.f32 %v4692_v0, %v4692_v0  ;;  %v4716_v1 = vpop.permute.xlu0 %1529 }
 0x243   :  { %v1166_v41 = vsel %vm1124_vm2, %v4692_v0, 0.0  ;;  %v1217_v8 = vmul.f32 %v4699_v12, %v4699_v12  ;;  %v1266_v13 = vsel %vm1124_vm2, %v1215_v35, 0.0  ;;  %v1168_v33 = vsel %vm1124_vm2, %v4699_v12, 0.0 }
 0x244   :  { %v1161_v43 = vadd.f32 %v1160_v7, %v1159_v22  ;;  %v1261_v6 = vadd.f32 %v1260_v21, %v1259_v45  ;;  %v4723_v22 = vadd.f32 %v4400_v36, %v4476_v3  ;;  %v1218_v45 = vmul.f32 %v4710_v20, %v4710_v20  ;;  %v4736_v36 = vpop.permute.xlu1 %1758 }
 0x245   :  { %v1268_v15 = vsel %vm1124_vm2, %v1216_v30, 0.0  ;;  %v4732_v21 = vadd.f32 %v4394_v29, %v4480_v63  ;;  %5177 = vst [vmem:[#allocation80_spill] sm:$0xff] %v4736_v36 }
 0x246   :  { %v1163_v9 = vadd.f32 %v1162_v26, %v1161_v43  ;;  %v1263_v37 = vadd.f32 %v1262_v60, %v1261_v6  ;;  %v1170_v26 = vsel %vm1124_vm2, %v4710_v20, 0.0  ;;  %v1270_v6 = vsel %vm1124_vm2, %v1217_v8, 0.0  ;;  %v4747_v63 = vpop.permute.xlu0 %1449 }
 0x247   :  { %v4741_v60 = vadd.f32 %v4404_v40, %v4472_v55  ;;  %v1219_v35 = vmul.f32 %v4723_v22, %v4723_v22  ;;  %v1172_v29 = vsel %vm1124_vm2, %v4723_v22, 0.0  ;;  %v1220_v40 = vmul.f32 %v4732_v21, %v4732_v21 }
 0x248   :  { %v1165_v14 = vadd.f32 %v1164_v42, %v1163_v9  ;;  %v1265_v44 = vadd.f32 %v1264_v61, %v1263_v37  ;;  %v1272_v37 = vsel %vm1124_vm2, %v1218_v45, 0.0  ;;  %v4752_v61 = vadd.f32 %v4398_v34, %v4478_v51  ;;  %v4767_v51 = vpop.permute.xlu1 %1678 }
 0x249   :  { %v1174_v30 = vsel %vm1124_vm2, %v4732_v21, 0.0  ;;  %v4763_v8 = vadd.f32 %v4408_v50, %v4488_v28  ;;  %v1176_v34 = vsel %vm1124_vm2, %v4741_v60, 0.0  ;;  %5178 = vst [vmem:[#allocation81_spill] sm:$0xff] %v4767_v51  ;;  %v4774_v45 = vadd.f32 %v4402_v39, %v4494_v23 }
 0x24a   :  { %v1167_v24 = vadd.f32 %v1166_v41, %v1165_v14  ;;  %v1267_v7 = vadd.f32 %v1266_v13, %v1265_v44  ;;  %v1221_v41 = vmul.f32 %v4741_v60, %v4741_v60  ;;  %v1274_v44 = vsel %vm1124_vm2, %v1219_v35, 0.0  ;;  %v4778_v28 = vpop.permute.xlu0 %1753 }
 0x24b   :  { %v1178_v50 = vsel %vm1124_vm2, %v4752_v61, 0.0  ;;  %5179 = vst [vmem:[#allocation82_spill] sm:$0xff] %v4778_v28  ;;  %v1180_v39 = vsel %vm1124_vm2, %v4763_v8, 0.0 }
 0x24c   :  { %v1169_v43 = vadd.f32 %v1168_v33, %v1167_v24  ;;  %v1269_v3 = vadd.f32 %v1268_v15, %v1267_v7  ;;  %v1222_v33 = vmul.f32 %v4752_v61, %v4752_v61  ;;  %v1276_v7 = vsel %vm1124_vm2, %v1220_v40, 0.0 }
 0x24e   :  { %v1171_v9 = vadd.f32 %v1170_v26, %v1169_v43  ;;  %v1271_v42 = vadd.f32 %v1270_v6, %v1269_v3  ;;  %v1278_v26 = vsel %vm1124_vm2, %v1221_v41, 0.0  ;;  %v4783_v3 = vadd.f32 %v4412_v58, %v4486_v25  ;;  %v4798_v25 = vpop.permute.xlu1 %1544 }
 0x24f   :  { %v1223_v6 = vmul.f32 %v4763_v8, %v4763_v8  ;;  %v1182_v58 = vsel %vm1124_vm2, %v4774_v45, 0.0 }
 0x250   :  { %v1173_v55 = vadd.f32 %v1172_v29, %v1171_v9  ;;  %v1273_v14 = vadd.f32 %v1272_v37, %v1271_v42  ;;  %v1280_v9 = vsel %vm1124_vm2, %v1222_v33, 0.0  ;;  %v5180_v29 = vld [vmem:[#allocation36_spill] sm:$0xff]  ;;  %v1224_v37 = vmul.f32 %v4774_v45, %v4774_v45 }
 0x251   :  { %v4792_v42 = vadd.f32 %v5180_v29, %v4490_v59  ;;  %v1184_v59 = vsel %vm1124_vm2, %v4783_v3, 0.0 }
 0x252   :  { %v1175_v13 = vadd.f32 %v1174_v30, %v1173_v55  ;;  %v1275_v24 = vadd.f32 %v1274_v44, %v1273_v14  ;;  %v1225_v30 = vmul.f32 %v4783_v3, %v4783_v3  ;;  %v1282_v14 = vsel %vm1124_vm2, %v1223_v6, 0.0  ;;  %v4805_v44 = vpop.permute.xlu0 %1673 }
 0x253   :  { %5181 = vst [vmem:[#allocation36_spill] sm:$0xff] %v4805_v44 }
 0x254   :  { %v1177_v15 = vadd.f32 %v1176_v34, %v1175_v13  ;;  %v1277_v43 = vadd.f32 %v1276_v7, %v1275_v24  ;;  %v1226_v34 = vmul.f32 %v4792_v42, %v4792_v42  ;;  %v1284_v24 = vsel %vm1124_vm2, %v1224_v37, 0.0 }
 0x255   :  { %v1186_v7 = vsel %vm1124_vm2, %v4792_v42, 0.0 }
 0x256   :  { %v1179_v35 = vadd.f32 %v1178_v50, %v1177_v15  ;;  %v1279_v23 = vadd.f32 %v1278_v26, %v1277_v43  ;;  %v1286_v50 = vsel %vm1124_vm2, %v1225_v30, 0.0  ;;  %v4813_v26 = vpop.permute.xlu1 %1464 }
 0x258   :  { %v1181_v40 = vadd.f32 %v1180_v39, %v1179_v35  ;;  %v1281_v55 = vadd.f32 %v1280_v9, %v1279_v23  ;;  %v1288_v35 = vsel %vm1124_vm2, %v1226_v34, 0.0  ;;  %v4816_v23 = vpop.permute.xlu0 %1539 }
 0x25a   :  { %v1183_v41 = vadd.f32 %v1182_v58, %v1181_v40  ;;  %v1283_v13 = vadd.f32 %v1282_v14, %v1281_v55  ;;  %v4818_v58 = vpop.permute.xlu1 %1768 }
 0x25b   :  { %5182 = vst [vmem:[#allocation83_spill] sm:$0xff] %v4818_v58 }
 0x25c   :  { %v1185_v33 = vadd.f32 %v1184_v59, %v1183_v41  ;;  %v1285_v15 = vadd.f32 %v1284_v24, %v1283_v13  ;;  %v4820_v41 = vpop.permute.xlu0 %1459 }
 0x25e   :  { %v1187_v43 = vadd.f32 %v1186_v7, %v1185_v33  ;;  %v1287_v6 = vadd.f32 %v1286_v50, %v1285_v15  ;;  %v4822_v33 = vpop.permute.xlu1 %1688 }
 0x25f   :  { %5183 = vst [vmem:[#allocation84_spill] sm:$0xff] %v4822_v33  ;;  %v5191_v33 = vld [vmem:[#allocation73_spill] sm:$0xff] }
 0x260   :  { %v1188_v39 = vrot.slane %v1187_v43, 4  ;;  %v1289_v9 = vadd.f32 %v1288_v35, %v1287_v6  ;;  %v4826_v15 = vpop.permute.xlu0 %1763 }
 0x261   :  { %5184 = vst [vmem:[#allocation85_spill] sm:$0xff] %v4826_v15 }
 0x262   :  { %v1189_v29 = vadd.f32 %v1188_v39, %v1187_v43  ;;  %v1290_v40 = vrot.slane %v1289_v9, 4  ;;  %v4832_v39 = vpop.permute.xlu1 %1554 }
 0x263   :  { %5185 = vst [vmem:[#allocation86_spill] sm:$0xff] %v4832_v39 }
 0x264   :  { %v1190_v37 = vrot.slane %v1189_v29, 2  ;;  %v1291_v55 = vadd.f32 %v1290_v40, %v1289_v9 }
 0x266   :  { %v1191_v14 = vadd.f32 %v1190_v37, %v1189_v29  ;;  %v1292_v30 = vrot.slane %v1291_v55, 2 }
 0x268   :  { %v1192_v59 = vrot.slane %v1191_v14, 1  ;;  %v1293_v13 = vadd.f32 %v1292_v30, %v1291_v55 }
 0x26a   :  { %v1193_v24 = vadd.f32 %v1192_v59, %v1191_v14  ;;  %v1294_v34 = vrot.slane %v1293_v13, 1 }
 0x26c   :  { %v4824_v7 = vmul.f32 0.00390625, %v1193_v24  ;;  %v1295_v50 = vadd.f32 %v1294_v34, %v1293_v13  ;;  %v1475_v34 = vpop.permute.xlu1 %1474 }
 0x26e   :  { %v1297_v43 = vmul.f32 %v4824_v7, %v4824_v7  ;;  %v1314_v6 = vsub.f32 %v4624_v56, %v4824_v7  ;;  %v1296_v35 = vmul.f32 0.00390625, %v1295_v50  ;;  %v1310_v29 = vsub.f32 %v4586_v54, %v4824_v7  ;;  %v4844_v56 = vpop.permute.xlu0 %1683 }
 0x26f   :  { %v1313_v40 = vsub.f32 %v4611_v2, %v4824_v7  ;;  %v1316_v55 = vsub.f32 %v4628_v17, %v4824_v7  ;;  %v1317_v14 = vsub.f32 %v4637_v4, %v4824_v7  ;;  %5186 = vst [vmem:[#allocation87_spill] sm:$0xff] %v4844_v56  ;;  %v1318_v59 = vsub.f32 %v4648_v18, %v4824_v7 }
 0x270   :  { %v1298_v9 = vsub.f32 %v1296_v35, %v1297_v43  ;;  %v1319_v54 = vsub.f32 %v4658_v5, %v4824_v7  ;;  %v1320_v2 = vsub.f32 %v4667_v52, %v4824_v7  ;;  %v1321_v13 = vsub.f32 %v4681_v16, %v4824_v7  ;;  %v4878_v50 = vpop.permute.xlu1 %1778  ;;  %v5189_v43 = vld [vmem:[#allocation68_spill] sm:$0xff]  ;;  %v5190_v35 = vld [vmem:[#allocation65_spill] sm:$0xff] }
 0x271   :  { %v1322_v17 = vsub.f32 %v4692_v0, %v4824_v7  ;;  %v1323_v4 = vsub.f32 %v4699_v12, %v4824_v7  ;;  %v1324_v24 = vsub.f32 %v4710_v20, %v4824_v7  ;;  %v1325_v18 = vsub.f32 %v4723_v22, %v4824_v7  ;;  %5187 = vst [vmem:[#allocation88_spill] sm:$0xff] %v4878_v50 }
 0x272   :  { %v1299_v30 = vadd.f32 1e-05, %v1298_v9  ;;  %v1326_v5 = vsub.f32 %v4732_v21, %v4824_v7  ;;  %v1327_v52 = vsub.f32 %v4741_v60, %v4824_v7  ;;  %v1328_v16 = vsub.f32 %v4752_v61, %v4824_v7  ;;  %v4876_v21 = vpop.permute.xlu0 %1549  ;;  %v5188_v60 = vld [vmem:[#allocation66_spill] sm:$0xff] }
 0x273   :  { %v1329_v0 = vsub.f32 %v4763_v8, %v4824_v7  ;;  %v1330_v12 = vsub.f32 %v4774_v45, %v4824_v7  ;;  %v1331_v20 = vsub.f32 %v4783_v3, %v4824_v7  ;;  %v1332_v22 = vsub.f32 %v4792_v42, %v4824_v7 }
 0x274   :  { %3646 = vrsqrt.f32 %v1299_v30  ;;  %v1301_v61 = vsub.f32 %v5188_v60, %v4824_v7  ;;  %v1302_v8 = vsub.f32 %v5189_v43, %v4824_v7  ;;  %v1303_v45 = vsub.f32 %v5190_v35, %v4824_v7  ;;  %v1699_v15 = vpop.permute.xlu1 %1698 }
 0x275   :  { %v1304_v3 = vsub.f32 %v4511_v38, %v4824_v7  ;;  %v1305_v9 = vsub.f32 %v4538_v49, %v4824_v7  ;;  %v1306_v42 = vsub.f32 %v4549_v53, %v4824_v7  ;;  %v1307_v30 = vsub.f32 %v4541_v62, %v4824_v7 }
 0x276   :  { %v1470_v60 = vpop.permute.xlu0 %1469  ;;  %v1308_v43 = vsub.f32 %v4552_v57, %v4824_v7  ;;  %v1309_v35 = vsub.f32 %v4573_v10, %v4824_v7  ;;  %v1311_v38 = vsub.f32 %v5191_v33, %v4824_v7  ;;  %v1312_v49 = vsub.f32 %v4590_v27, %v4824_v7 }
 0x27e   :  { %v3647_v37 = vpop.eup %3646 }
 0x27f   :  { %v1346_v56 = vmul.f32 %v3647_v37, %v1314_v6  ;;  %v1348_v51 = vmul.f32 %v3647_v37, %v1316_v55  ;;  %v1333_v53 = vmul.f32 %v3647_v37, %v1301_v61  ;;  %v1334_v44 = vmul.f32 %v3647_v37, %v1302_v8  ;;  %v1774_v8 = vpop.permute.xlu0 %1773 }
 0x280   :  { %v1335_v46 = vmul.f32 %v3647_v37, %v1303_v45  ;;  %v1336_v62 = vmul.f32 %v3647_v37, %v1304_v3  ;;  %v1337_v31 = vmul.f32 %v3647_v37, %v1305_v9  ;;  %v1338_v48 = vmul.f32 %v3647_v37, %v1306_v42 }
 0x281   :  { %v4903_v50 = vmul.f32 %v4813_v26, %v1346_v56  ;;  %v1572_v57 = vmul.f32 %v1475_v34, %v1348_v51  ;;  %v1339_v58 = vmul.f32 %v3647_v37, %v1307_v30  ;;  %v1340_v10 = vmul.f32 %v3647_v37, %v1308_v43  ;;  %v5193_v30 = vld [vmem:[#allocation41_spill] sm:$0xff] }
 0x282   :  { %v1341_v36 = vmul.f32 %v3647_v37, %v1309_v35  ;;  %v1342_v33 = vmul.f32 %v3647_v37, %v1310_v29  ;;  %v1343_v28 = vmul.f32 %v3647_v37, %v1311_v38  ;;  %v1344_v39 = vmul.f32 %v3647_v37, %v1312_v49 }
 0x283   :  { %v1796_v27 = vadd.f32 %v1699_v15, %v1572_v57  ;;  %v1345_v6 = vmul.f32 %v3647_v37, %v1313_v40  ;;  %v1349_v55 = vmul.f32 %v3647_v37, %v1317_v14  ;;  %v1350_v61 = vmul.f32 %v3647_v37, %v1318_v59  ;;  %v5197_v57 = vld [vmem:[#allocation57_spill] sm:$0xff] }
 0x284   :  { %v1351_v45 = vmul.f32 %v3647_v37, %v1319_v54  ;;  %v4905_v3 = vmul.f32 %v3647_v37, %v1320_v2  ;;  %v4907_v9 = vmul.f32 %v3647_v37, %v1321_v13  ;;  %v4909_v26 = vmul.f32 %v3647_v37, %v1322_v17 }
 0x285   :  { %v1828_v51 = vmax.f32 %v1796_v27, 0.0  ;;  %v4911_v56 = vmul.f32 %v3647_v37, %v1323_v4  ;;  %v4913_v34 = vmul.f32 %v3647_v37, %v1324_v24  ;;  %v4915_v29 = vmul.f32 %v3647_v37, %v1325_v18  ;;  %v5194_v4 = vld [vmem:[#allocation38_spill] sm:$0xff]  ;;  %v5195_v24 = vld [vmem:[#allocation49_spill] sm:$0xff] }
 0x286   :  { %v4917_v42 = vmul.f32 %v3647_v37, %v1326_v5  ;;  %v1359_v15 = vmul.f32 %v3647_v37, %v1327_v52  ;;  %v1360_v40 = vmul.f32 %v3647_v37, %v1328_v16  ;;  %v1361_v14 = vmul.f32 %v3647_v37, %v1329_v0  ;;  %v5196_v18 = vld [vmem:[#allocation46_spill] sm:$0xff] }
 0x287   :  { %v1362_v59 = vmul.f32 %v3647_v37, %v1330_v12  ;;  %v1363_v54 = vmul.f32 %v3647_v37, %v1331_v20  ;;  %v1364_v2 = vmul.f32 %v3647_v37, %v1332_v22  ;;  %v5192_v13 = vsub.f32 %v4615_v11, %v4824_v7  ;;  %v5198_v16 = vld [vmem:[#allocation54_spill] sm:$0xff]  ;;  %v5199_v12 = vld [vmem:[#allocation67_spill] sm:$0xff]  ;;  %v1694_v22 = vpop.permute.xlu0 %1693 }
 0x288   :  { %v1557_v43 = vmul.f32 %v5193_v30, %v1333_v53  ;;  %v1558_v35 = vmul.f32 %v5194_v4, %v1334_v44  ;;  %v1559_v38 = vmul.f32 %v5195_v24, %v1335_v46  ;;  %v1560_v49 = vmul.f32 %v5196_v18, %v1336_v62  ;;  %v5200_v27 = vld [vmem:[#allocation62_spill] sm:$0xff] }
 0x289   :  { %v1347_v17 = vmul.f32 %v3647_v37, %v5192_v13  ;;  %v1561_v52 = vmul.f32 %v5197_v57, %v1337_v31  ;;  %v1562_v0 = vmul.f32 %v5198_v16, %v1338_v48  ;;  %v4929_v20 = vmul.f32 %v5199_v12, %v1339_v58  ;;  %v5201_v44 = vld [vmem:[#allocation74_spill] sm:$0xff]  ;;  %v5211_v57 = vld [vmem:[#allocation40_spill] sm:$0xff]  ;;  %v5212_v12 = vld [vmem:[#allocation45_spill] sm:$0xff] }
 0x28a   :  { %v4932_v11 = vmul.f32 %v5200_v27, %v1340_v10  ;;  %v4935_v7 = vmul.f32 %v4617_v47, %v1341_v36  ;;  %v4938_v37 = vmul.f32 %v5201_v44, %v1342_v33  ;;  %v4941_v46 = vmul.f32 %v4747_v63, %v1343_v28  ;;  %v5202_v63 = vld [vmem:[#allocation86_spill] sm:$0xff] }
 0x28b   :  { %v1571_v5 = vmul.f32 %v1470_v60, %v1347_v17  ;;  %v4944_v31 = vmul.f32 %v4705_v19, %v1344_v39  ;;  %v4947_v48 = vmul.f32 %v4820_v41, %v1345_v6  ;;  %v1583_v58 = vmul.f32 %v4716_v1, %v1359_v15  ;;  %v5203_v33 = vld [vmem:[#allocation82_spill] sm:$0xff]  ;;  %v5204_v19 = vld [vmem:[#allocation39_spill] sm:$0xff]  ;;  %v5205_v17 = vld [vmem:[#allocation80_spill] sm:$0xff] }
 0x28c   :  { %v1584_v53 = vmul.f32 %v4674_v32, %v1360_v40  ;;  %v1585_v47 = vmul.f32 %v4816_v23, %v1361_v14  ;;  %v1586_v36 = vmul.f32 %v4798_v25, %v1362_v59  ;;  %v1587_v62 = vmul.f32 %v4876_v21, %v1363_v54  ;;  %v5206_v6 = vld [vmem:[#allocation85_spill] sm:$0xff]  ;;  %v5207_v1 = vld [vmem:[#allocation83_spill] sm:$0xff]  ;;  %v5208_v23 = vld [vmem:[#allocation88_spill] sm:$0xff] }
 0x28d   :  { %v1795_v60 = vadd.f32 %v1694_v22, %v1571_v5  ;;  %v1588_v28 = vmul.f32 %v5202_v63, %v1364_v2  ;;  %v1807_v13 = vadd.f32 %v5203_v33, %v1583_v58  ;;  %v1573_v39 = vmul.f32 %v5204_v19, %v1349_v55  ;;  %v5209_v21 = vld [vmem:[#allocation37_spill] sm:$0xff]  ;;  %v5210_v55 = vld [vmem:[#allocation43_spill] sm:$0xff] }
 0x28e   :  { %v1808_v41 = vadd.f32 %v5205_v17, %v1584_v53  ;;  %v1809_v30 = vadd.f32 %v5206_v6, %v1585_v47  ;;  %v1810_v15 = vadd.f32 %v5207_v1, %v1586_v36  ;;  %v1811_v32 = vadd.f32 %v1774_v8, %v1587_v62  ;;  %v5221_v1 = vld [vmem:[#allocation48_spill] sm:$0xff] }
 0x28f   :  { %v1827_v10 = vmax.f32 %v1795_v60, 0.0  ;;  %v1812_v25 = vadd.f32 %v5208_v23, %v1588_v28  ;;  %v1839_v14 = vmax.f32 %v1807_v13, 0.0  ;;  %v1574_v59 = vmul.f32 %v5209_v21, %v1350_v61  ;;  %v5214_v60 = vld [vmem:[#allocation47_spill] sm:$0xff]  ;;  %v5223_v21 = vld [vmem:[#allocation56_spill] sm:$0xff] }
 0x290   :  { %v1840_v54 = vmax.f32 %v1808_v41, 0.0  ;;  %v1841_v2 = vmax.f32 %v1809_v30, 0.0  ;;  %v1842_v4 = vmax.f32 %v1810_v15, 0.0  ;;  %v1843_v24 = vmax.f32 %v1811_v32, 0.0  ;;  %v5216_v28 = vld [vmem:[#allocation51_spill] sm:$0xff] }
 0x291   :  { %v4960_v40 = vpack.c.bf16 %v1828_v51, %v1827_v10  ;;  %v1844_v18 = vmax.f32 %v1812_v25, 0.0  ;;  %v1797_v5 = vadd.f32 %v5210_v55, %v1573_v39  ;;  %v1798_v16 = vadd.f32 %v5211_v57, %v1574_v59  ;;  %v5213_v51 = vld [vmem:[#allocation42_spill] sm:$0xff]  ;;  %v5215_v10 = vld [vmem:[#allocation44_spill] sm:$0xff]  ;;  %v5222_v25 = vld [vmem:[#allocation59_spill] sm:$0xff] }
 0x292   :  { %v1781_v22 = vadd.f32 %v5212_v12, %v1557_v43  ;;  %v4967_v27 = vpack.c.bf16 %v1840_v54, %v1839_v14  ;;  %v4969_v8 = vpack.c.bf16 %v1842_v4, %v1841_v2  ;;  %v1782_v44 = vadd.f32 %v5213_v51, %v1558_v35  ;;  %v5217_v43 = vld [vmem:[#allocation53_spill] sm:$0xff]  ;;  %v5218_v39 = vld [vmem:[#allocation50_spill] sm:$0xff]  ;;  %v5219_v35 = vld [vmem:[#allocation55_spill] sm:$0xff] }
 0x293   :  { %v1575_v58 = vmul.f32 %v5214_v60, %v1351_v45  ;;  %v4973_v61 = vpack.c.bf16 %v1844_v18, %v1843_v24  ;;  %v1829_v53 = vmax.f32 %v1797_v5, 0.0  ;;  %v1830_v47 = vmax.f32 %v1798_v16, 0.0  ;;  %v5220_v45 = vld [vmem:[#allocation52_spill] sm:$0xff]  ;;  %v5224_v59 = vld [vmem:[#allocation61_spill] sm:$0xff]  ;;  %v5225_v2 = vld [vmem:[#allocation58_spill] sm:$0xff] }
 0x294   :  { %v1813_v36 = vmax.f32 %v1781_v22, 0.0  ;;  %v1814_v62 = vmax.f32 %v1782_v44, 0.0  ;;  %v1576_v63 = vmul.f32 %v5215_v10, %v4905_v3  ;;  %v1783_v13 = vadd.f32 %v5217_v43, %v1559_v38  ;;  %v5226_v4 = vld [vmem:[#allocation63_spill] sm:$0xff]  ;;  %v5227_v24 = vld [vmem:[#allocation60_spill] sm:$0xff]  ;;  %v5228_v51 = vld [vmem:[#allocation70_spill] sm:$0xff] }
 0x295   :  { %v1799_v33 = vadd.f32 %v5216_v28, %v1575_v58  ;;  %v1885_v19 = vpack.c.bf16 %v1830_v47, %v1829_v53  ;;  %v1784_v17 = vadd.f32 %v5218_v39, %v1560_v49  ;;  %v1577_v41 = vmul.f32 %v5219_v35, %v4907_v9  ;;  %v5229_v60 = vld [vmem:[#allocation64_spill] sm:$0xff]  ;;  %v5231_v47 = vld [vmem:[#allocation69_spill] sm:$0xff]  ;;  %v5233_v28 = vld [vmem:[#allocation71_spill] sm:$0xff] }
 0x296   :  { %v1578_v6 = vmul.f32 %v5220_v45, %v4909_v26  ;;  %v1877_v30 = vpack.c.bf16 %v1814_v62, %v1813_v36  ;;  %v1800_v15 = vadd.f32 %v5221_v1, %v1576_v63  ;;  %v1815_v23 = vmax.f32 %v1783_v13, 0.0  ;;  %v5230_v53 = vld [vmem:[#allocation72_spill] sm:$0xff]  ;;  %v5232_v36 = vld [vmem:[#allocation75_spill] sm:$0xff] }
 0x297   :  { %v1831_v32 = vmax.f32 %v1799_v33, 0.0  ;;  %3183 = vmatprep.subr.bf16.mxu1 %v1885_v19  ;;  %v1816_v3 = vmax.f32 %v1784_v17, 0.0  ;;  %v1801_v14 = vadd.f32 %v5222_v25, %v1577_v41  ;;  %v1785_v54 = vadd.f32 %v5224_v59, %v1561_v52  ;;  %v5234_v19 = vld [vmem:[#allocation78_spill] sm:$0xff]  ;;  %v5236_v35 = vld [vmem:[#allocation76_spill] sm:$0xff] }
 0x298   :  { %v1802_v38 = vadd.f32 %v5223_v21, %v1578_v6  ;;  %3184 = vmatpush3.bf16.msra.mxu1 %v1877_v30  ;;  %v1832_v49 = vmax.f32 %v1800_v15, 0.0  ;;  %v1786_v9 = vadd.f32 %v5225_v2, %v1562_v0  ;;  %v1579_v26 = vmul.f32 %v5226_v4, %v4911_v56  ;;  %v5238_v6 = vld [vmem:[#allocation36_spill] sm:$0xff] }
 0x299   :  { %v1580_v18 = vmul.f32 %v5227_v24, %v4913_v34  ;;  %v1878_v55 = vpack.c.bf16 %v1816_v3, %v1815_v23  ;;  %v1833_v5 = vmax.f32 %v1801_v14, 0.0  ;;  %v1817_v16 = vmax.f32 %v1785_v54, 0.0  ;;  %v5241_v59 = vld [vmem:[#allocation84_spill] sm:$0xff] }
 0x29a   :  { %v1834_v57 = vmax.f32 %v1802_v38, 0.0  ;;  %v1886_v12 = vpack.c.bf16 %v1832_v49, %v1831_v32  ;;  %v1818_v22 = vmax.f32 %v1786_v9, 0.0  ;;  %v1803_v44 = vadd.f32 %v5228_v51, %v1579_v26  ;;  %v5239_v32 = vld [vmem:[#allocation81_spill] sm:$0xff] }
 0x29b   :  { %v1804_v52 = vadd.f32 %v5229_v60, %v1580_v18  ;;  %v1787_v0 = vadd.f32 %v5230_v53, %v4929_v20  ;;  %v1788_v56 = vadd.f32 %v5231_v47, %v4932_v11  ;;  %v1581_v34 = vmul.f32 %v5232_v36, %v4915_v29  ;;  %v5235_v20 = vld [vmem:[#allocation79_spill] sm:$0xff]  ;;  %v5237_v29 = vld [vmem:[#allocation77_spill] sm:$0xff] }
 0x29c   :  { %v1887_v58 = vpack.c.bf16 %v1834_v57, %v1833_v5  ;;  %3185 = vmatprep.subr.bf16.mxu1 %v1886_v12  ;;  %v1879_v62 = vpack.c.bf16 %v1818_v22, %v1817_v16  ;;  %v1835_v10 = vmax.f32 %v1803_v44, 0.0  ;;  %v1582_v33 = vmul.f32 %v5233_v28, %v4917_v42  ;;  %v3576_v26 = vld [vmem:[#allocation15 + $0x24] ss:$8 sps:$4 sm:$0xff]   ;;  %v3578_v24 = vld [vmem:[#allocation15 + $0x20] ss:$8 sps:$4 sm:$0xff]  }
 0x29d   :  { %v1836_v63 = vmax.f32 %v1804_v52, 0.0  ;;  %3186 = vmatpush3.bf16.msra.mxu1 %v1878_v55  ;;  %v1819_v43 = vmax.f32 %v1787_v0, 0.0  ;;  %v1820_v13 = vmax.f32 %v1788_v56, 0.0  ;;  %v1805_v39 = vadd.f32 %v5234_v19, %v1581_v34  ;;  %v3579_v18 = vld [vmem:[#allocation15 + $0x34] ss:$8 sps:$4 sm:$0xff]  }
 0x29e   :  { %v1789_v17 = vadd.f32 %v5235_v20, %v4935_v7  ;;  %3187 = vmatprep.subr.bf16.mxu1 %v1887_v58  ;;  %v1806_v41 = vadd.f32 %v5236_v35, %v1582_v33  ;;  %v1790_v45 = vadd.f32 %v5237_v29, %v4938_v37  ;;  %v1791_v30 = vadd.f32 %v5238_v6, %v4941_v46  ;;  %v5240_v7 = vld [vmem:[#allocation87_spill] sm:$0xff]  ;;  %v3582_v55 = vld [vmem:[#allocation15 + $0x44] ss:$8 sps:$4 sm:$0xff]   ;;  %v5021_v33 = vpop.permute.xlu0 %2007 }
 0x29f   :  { %v1888_v11 = vpack.c.bf16 %v1836_v63, %v1835_v10  ;;  %v1880_v1 = vpack.c.bf16 %v1820_v13, %v1819_v43  ;;  %v1837_v42 = vmax.f32 %v1805_v39, 0.0  ;;  %v1792_v23 = vadd.f32 %v5239_v32, %v4944_v31  ;;  %v3570_v31 = vld [vmem:[#allocation15] ss:$8 sps:$4 sm:$0xff]   ;;  %v3588_v5 = vld [vmem:[#allocation15 + $0x64] ss:$8 sps:$4 sm:$0xff]   ;;  %v5023_v43 = vpop.permute.xlu1 %2012 }
 0x2a0   :  { %v1821_v15 = vmax.f32 %v1789_v17, 0.0  ;;  %v1838_v3 = vmax.f32 %v1806_v41, 0.0  ;;  %v1822_v25 = vmax.f32 %v1790_v45, 0.0  ;;  %v1823_v14 = vmax.f32 %v1791_v30, 0.0  ;;  %v3590_v57 = vld [vmem:[#allocation15 + $0x60] ss:$8 sps:$4 sm:$0xff]  }
 0x2a1   :  { %v1793_v21 = vadd.f32 %v5240_v7, %v4947_v48  ;;  %3188 = vmatpush3.bf16.msra.mxu1 %v1879_v62  ;;  %v1824_v38 = vmax.f32 %v1792_v23, 0.0  ;;  %v1794_v37 = vadd.f32 %v5241_v59, %v4903_v50  ;;  %v3573_v50 = vld [vmem:[#allocation15 + $0x14] ss:$8 sps:$4 sm:$0xff]   ;;  %v3575_v48 = vld [vmem:[#allocation15 + $0x10] ss:$8 sps:$4 sm:$0xff]  }
 0x2a2   :  { %3189 = vmatprep.subr.bf16.mxu1 %v1888_v11  ;;  %v1889_v54 = vpack.c.bf16 %v1838_v3, %v1837_v42  ;;  %v1881_v46 = vpack.c.bf16 %v1822_v25, %v1821_v15  ;;  %v3591_v16 = vld [vmem:[#allocation15 + $0x74] ss:$8 sps:$4 sm:$0xff]   ;;  %v3593_v12 = vld [vmem:[#allocation15 + $0x70] ss:$8 sps:$4 sm:$0xff]   ;;  %v3594_v22 = vld [vmem:[#allocation15 + $0x84] ss:$8 sps:$4 sm:$0xff]   ;;  %v1928_v13 = vpop.permute.xlu0 %1927 }
 0x2a3   :  { %v1825_v49 = vmax.f32 %v1793_v21, 0.0  ;;  %v1882_v2 = vpack.c.bf16 %v1824_v38, %v1823_v14  ;;  %v1826_v9 = vmax.f32 %v1794_v37, 0.0  ;;  %v3596_v51 = vld [vmem:[#allocation15 + $0x80] ss:$8 sps:$4 sm:$0xff]   ;;  %v3597_v44 = vld [vmem:[#allocation15 + $0x94] ss:$8 sps:$4 sm:$0xff]   ;;  %v1933_v19 = vpop.permute.xlu1 %1932 }
 0x2a4   :  { %v3599_v60 = vld [vmem:[#allocation15 + $0x90] ss:$8 sps:$4 sm:$0xff]   ;;  %v3600_v52 = vld [vmem:[#allocation15 + $0xa4] ss:$8 sps:$4 sm:$0xff]   ;;  %v3602_v58 = vld [vmem:[#allocation15 + $0xa0] ss:$8 sps:$4 sm:$0xff]  }
 0x2a5   :  { %3190 = vmatpush3.bf16.msra.mxu1 %v1880_v1  ;;  %v1883_v4 = vpack.c.bf16 %v1826_v9, %v1825_v49  ;;  %v3603_v53 = vld [vmem:[#allocation15 + $0xb4] ss:$8 sps:$4 sm:$0xff]   ;;  %v3605_v0 = vld [vmem:[#allocation15 + $0xb0] ss:$8 sps:$4 sm:$0xff]   ;;  %v3606_v47 = vld [vmem:[#allocation15 + $0xc4] ss:$8 sps:$4 sm:$0xff]  }
 0x2a6   :  { %3191 = vmatprep.subr.bf16.mxu1 %v1889_v54  ;;  %v3608_v56 = vld [vmem:[#allocation15 + $0xc0] ss:$8 sps:$4 sm:$0xff]   ;;  %v3609_v36 = vld [vmem:[#allocation15 + $0xd4] ss:$8 sps:$4 sm:$0xff]   ;;  %v3611_v34 = vld [vmem:[#allocation15 + $0xd0] ss:$8 sps:$4 sm:$0xff]   ;;  %v5025_v39 = vpop.permute.xlu0 %2017 }
 0x2a7   :  { %v3612_v62 = vld [vmem:[#allocation15 + $0xe4] ss:$8 sps:$4 sm:$0xff]   ;;  %v3614_v10 = vld [vmem:[#allocation15 + $0xe0] ss:$8 sps:$4 sm:$0xff]   ;;  %v3615_v63 = vld [vmem:[#allocation15 + $0xf4] ss:$8 sps:$4 sm:$0xff]   ;;  %v5027_v20 = vpop.permute.xlu1 %2022 }
 0x2a8   :  { %v3617_v28 = vld [vmem:[#allocation15 + $0xf0] ss:$8 sps:$4 sm:$0xff]   ;;  %v3620_v25 = vld [vmem:[#allocation18 + $0x4] ss:$8 sps:$4 sm:$0xff]  }
 0x2a9   :  { %3192 = vmatpush3.bf16.msra.mxu1 %v1881_v46  ;;  %2678 = vmatprep.mubr.bf16.mxu0 %v3620_v25 }
 0x2aa   :  { %3193 = vmatprep.subr.bf16.mxu1 %v4967_v27  ;;  %v3581_v27 = vld [vmem:[#allocation15 + $0x30] ss:$8 sps:$4 sm:$0xff]   ;;  %v1938_v17 = vpop.permute.xlu0 %1937 }
 0x2ab   :  { %v1943_v11 = vpop.permute.xlu1 %1942 }
 0x2ad   :  { %3194 = vmatpush3.bf16.msra.mxu1 %v1882_v2 }
 0x2ae   :  { %3195 = vmatprep.subr.bf16.mxu1 %v4969_v8  ;;  %v3584_v8 = vld [vmem:[#allocation15 + $0x40] ss:$8 sps:$4 sm:$0xff]   ;;  %v5029_v35 = vpop.permute.xlu0 %2027 }
 0x2af   :  { %v5031_v41 = vpop.permute.xlu1 %2032 }
 0x2b1   :  { %3196 = vmatpush3.bf16.msra.mxu1 %v1883_v4 }
 0x2b2   :  { %3197 = vmatprep.subr.bf16.mxu1 %v4973_v61  ;;  %v3585_v61 = vld [vmem:[#allocation15 + $0x54] ss:$8 sps:$4 sm:$0xff]   ;;  %v1948_v29 = vpop.permute.xlu0 %1947 }
 0x2b3   :  { %v1953_v6 = vpop.permute.xlu1 %1952 }
 0x2b5   :  { %3198 = vmatpush3.bf16.msra.mxu1 %v4960_v40  ;;  %v3587_v40 = vld [vmem:[#allocation15 + $0x50] ss:$8 sps:$4 sm:$0xff]  }
 0x2b6   :  { %v5033_v3 = vpop.permute.xlu0 %2037 }
 0x2b7   :  { %v5035_v7 = vpop.permute.xlu1 %2042 }
 0x2b8   :  { %2278 = vmatmul.mubr.bf16.vlgmr.msra.gmra.mrb[16].mxu1 %v3570_v31 }
 0x2b9   :  { %2285 = vmatprep.mubr.bf16.mxu1 %v3573_v50 }
 0x2ba   :  { %v1958_v2 = vpop.permute.xlu0 %1957 }
 0x2bb   :  { %v1963_v50 = vpop.permute.xlu1 %1962 }
 0x2c0   :  { %2286 = vmatmul.mubr.bf16.gmra.mrb[20].mxu1 %v3575_v48 }
 0x2c1   :  { %2293 = vmatprep.mubr.bf16.mxu1 %v3576_v26 }
 0x2c8   :  { %2294 = vmatmul.mubr.bf16.gmra.mrb[24].mxu1 %v3578_v24 }
 0x2c9   :  { %2301 = vmatprep.mubr.bf16.mxu1 %v3579_v18 }
 0x2d0   :  { %2302 = vmatmul.mubr.bf16.gmra.mrb[28].mxu1 %v3581_v27  ;;  %v5039_v27 = vpop.permute.xlu0 %2047 }
 0x2d1   :  { %2309 = vmatprep.mubr.bf16.mxu1 %v3582_v55 }
 0x2d8   :  { %2310 = vmatmul.mubr.bf16.gmra.mrb[32].mxu1 %v3584_v8 }
 0x2d9   :  { %2317 = vmatprep.mubr.bf16.mxu1 %v3585_v61 }
 0x2e0   :  { %2318 = vmatmul.mubr.bf16.gmra.mrb[36].mxu1 %v3587_v40 }
 0x2e1   :  { %2325 = vmatprep.mubr.bf16.mxu1 %v3588_v5  ;;  %v5043_v5 = vpop.permute.xlu1 %2052 }
 0x2e8   :  { %2326 = vmatmul.mubr.bf16.gmra.mrb[40].mxu1 %v3590_v57 }
 0x2e9   :  { %2333 = vmatprep.mubr.bf16.mxu1 %v3591_v16 }
 0x2f0   :  { %2334 = vmatmul.mubr.bf16.gmra.mrb[44].mxu1 %v3593_v12 }
 0x2f1   :  { %2341 = vmatprep.mubr.bf16.mxu1 %v3594_v22 }
 0x2f8   :  { %2342 = vmatmul.mubr.bf16.gmra.mrb[48].mxu1 %v3596_v51  ;;  %v1968_v51 = vpop.permute.xlu0 %1967 }
 0x2f9   :  { %2349 = vmatprep.mubr.bf16.mxu1 %v3597_v44 }
 0x300   :  { %2350 = vmatmul.mubr.bf16.gmra.mrb[52].mxu1 %v3599_v60 }
 0x301   :  { %2357 = vmatprep.mubr.bf16.mxu1 %v3600_v52 }
 0x308   :  { %2358 = vmatmul.mubr.bf16.gmra.mrb[56].mxu1 %v3602_v58  ;;  %v1973_v58 = vpop.permute.xlu1 %1972 }
 0x309   :  { %2365 = vmatprep.mubr.bf16.mxu1 %v3603_v53 }
 0x310   :  { %2366 = vmatmul.mubr.bf16.gmra.mrb[60].mxu1 %v3605_v0 }
 0x311   :  { %2373 = vmatprep.mubr.bf16.mxu1 %v3606_v47 }
 0x318   :  { %2374 = vmatmul.mubr.bf16.gmra.mrb[64].mxu1 %v3608_v56 }
 0x319   :  { %2381 = vmatprep.mubr.bf16.mxu1 %v3609_v36 }
 0x320   :  { %2382 = vmatmul.mubr.bf16.gmra.mrb[68].mxu1 %v3611_v34 }
 0x321   :  { %2389 = vmatprep.mubr.bf16.mxu1 %v3612_v62 }
 0x328   :  { %2390 = vmatmul.mubr.bf16.gmra.mrb[72].mxu1 %v3614_v10  ;;  %v5047_v10 = vpop.permute.xlu0 %2057 }
 0x329   :  { %2397 = vmatprep.mubr.bf16.mxu1 %v3615_v63 }
 0x330   :  { %2398 = vmatmul.mubr.bf16.gmra.mrb[76].mxu1 %v3617_v28  ;;  %v5049_v28 = vpop.permute.xlu1 %2062 }
 0x38b   :  { %v3199_v45 = vpop.f32.mrb[16].mxu1 }
 0x38c   :  { %v3200_v30 = vpop.f32.mrb[17].mxu1 }
 0x38d   :  { %v3201_v1 = vadd.f32 %v3200_v30, %v3199_v45  ;;  %v3202_v42 = vpop.f32.mrb[18].mxu1  ;;  %v1978_v30 = vpop.permute.xlu0 %1977 }
 0x38e   :  { %v3203_v15 = vpop.f32.mrb[19].mxu1 }
 0x38f   :  { %v2280_v32 = vadd.f32 %v3201_v1, %v1928_v13  ;;  %v3204_v23 = vadd.f32 %v3203_v15, %v3202_v42 }
 0x391   :  { %v2283_v14 = vadd.f32 %v3204_v23, %v1933_v19  ;;  %v2406_v21 = vmax.f32 %v2280_v32, 0.0  ;;  %v1983_v32 = vpop.permute.xlu1 %1982 }
 0x393   :  { %v2407_v38 = vmax.f32 %v2283_v14, 0.0  ;;  %v3205_v59 = vpop.f32.mrb[20].mxu1 }
 0x394   :  { %v3206_v37 = vpop.f32.mrb[21].mxu1 }
 0x395   :  { %v5037_v54 = vpack.c.bf16 %v2407_v38, %v2406_v21  ;;  %v3207_v46 = vadd.f32 %v3206_v37, %v3205_v59  ;;  %v3208_v49 = vpop.f32.mrb[22].mxu1  ;;  %v5053_v38 = vpop.permute.xlu0 %2067 }
 0x396   :  { %v3209_v9 = vpop.f32.mrb[23].mxu1 }
 0x397   :  { %v2288_v4 = vadd.f32 %v3207_v46, %v1938_v17  ;;  %v3210_v31 = vadd.f32 %v3209_v9, %v3208_v49 }
 0x399   :  { %v2291_v48 = vadd.f32 %v3210_v31, %v1943_v11  ;;  %v2408_v26 = vmax.f32 %v2288_v4, 0.0 }
 0x39b   :  { %v2409_v24 = vmax.f32 %v2291_v48, 0.0  ;;  %v3211_v18 = vpop.f32.mrb[24].mxu1  ;;  %v1988_v48 = vpop.permute.xlu0 %1987 }
 0x39c   :  { %v3212_v55 = vpop.f32.mrb[25].mxu1 }
 0x39d   :  { %v5041_v8 = vpack.c.bf16 %v2409_v24, %v2408_v26  ;;  %v3213_v61 = vadd.f32 %v3212_v55, %v3211_v18  ;;  %v3214_v40 = vpop.f32.mrb[26].mxu1 }
 0x39e   :  { %v3215_v57 = vpop.f32.mrb[27].mxu1 }
 0x39f   :  { %v2296_v16 = vadd.f32 %v3213_v61, %v1948_v29  ;;  %v3216_v12 = vadd.f32 %v3215_v57, %v3214_v40 }
 0x3a1   :  { %v2299_v22 = vadd.f32 %v3216_v12, %v1953_v6  ;;  %v2410_v44 = vmax.f32 %v2296_v16, 0.0 }
 0x3a3   :  { %v2411_v60 = vmax.f32 %v2299_v22, 0.0  ;;  %v3217_v52 = vpop.f32.mrb[28].mxu1 }
 0x3a4   :  { %v3218_v53 = vpop.f32.mrb[29].mxu1 }
 0x3a5   :  { %v5045_v0 = vpack.c.bf16 %v2411_v60, %v2410_v44  ;;  %v3219_v47 = vadd.f32 %v3218_v53, %v3217_v52  ;;  %v3220_v56 = vpop.f32.mrb[30].mxu1  ;;  %v5061_v44 = vpop.permute.xlu0 %2077 }
 0x3a6   :  { %v3221_v36 = vpop.f32.mrb[31].mxu1 }
 0x3a7   :  { %v2304_v34 = vadd.f32 %v3219_v47, %v1958_v2  ;;  %v3222_v62 = vadd.f32 %v3221_v36, %v3220_v56  ;;  %v5057_v2 = vpop.permute.xlu1 %2072 }
 0x3a9   :  { %v2307_v63 = vadd.f32 %v3222_v62, %v1963_v50  ;;  %v2412_v13 = vmax.f32 %v2304_v34, 0.0 }
 0x3ab   :  { %v2413_v19 = vmax.f32 %v2307_v63, 0.0  ;;  %v3223_v17 = vpop.f32.mrb[32].mxu1  ;;  %v1993_v55 = vpop.permute.xlu1 %1992 }
 0x3ac   :  { %v3224_v11 = vpop.f32.mrb[33].mxu1  ;;  %v1998_v63 = vpop.permute.xlu0 %1997 }
 0x3ad   :  { %v5051_v29 = vpack.c.bf16 %v2413_v19, %v2412_v13  ;;  %v3225_v45 = vadd.f32 %v3224_v11, %v3223_v17  ;;  %v3226_v6 = vpop.f32.mrb[34].mxu1 }
 0x3ae   :  { %v3227_v1 = vpop.f32.mrb[35].mxu1 }
 0x3af   :  { %v2312_v42 = vadd.f32 %v3225_v45, %v1968_v51  ;;  %v3228_v15 = vadd.f32 %v3227_v1, %v3226_v6  ;;  %v5063_v52 = vpop.permute.xlu1 %2082 }
 0x3b1   :  { %v2315_v23 = vadd.f32 %v3228_v15, %v1973_v58  ;;  %v2414_v25 = vmax.f32 %v2312_v42, 0.0 }
 0x3b3   :  { %v2415_v14 = vmax.f32 %v2315_v23, 0.0  ;;  %v3229_v21 = vpop.f32.mrb[36].mxu1  ;;  %v2003_v11 = vpop.permute.xlu1 %2002 }
 0x3b4   :  { %v3230_v59 = vpop.f32.mrb[37].mxu1 }
 0x3b5   :  { %v5055_v37 = vpack.c.bf16 %v2415_v14, %v2414_v25  ;;  %v3231_v46 = vadd.f32 %v3230_v59, %v3229_v21  ;;  %v3232_v49 = vpop.f32.mrb[38].mxu1 }
 0x3b6   :  { %v3233_v9 = vpop.f32.mrb[39].mxu1 }
 0x3b7   :  { %v2320_v4 = vadd.f32 %v3231_v46, %v1978_v30  ;;  %v3234_v31 = vadd.f32 %v3233_v9, %v3232_v49 }
 0x3b9   :  { %v2323_v50 = vadd.f32 %v3234_v31, %v1983_v32  ;;  %v2416_v26 = vmax.f32 %v2320_v4, 0.0 }
 0x3bb   :  { %v2417_v24 = vmax.f32 %v2323_v50, 0.0  ;;  %v3235_v18 = vpop.f32.mrb[40].mxu1 }
 0x3bc   :  { %v3236_v61 = vpop.f32.mrb[41].mxu1 }
 0x3bd   :  { %v5059_v40 = vpack.c.bf16 %v2417_v24, %v2416_v26  ;;  %v3237_v57 = vadd.f32 %v3236_v61, %v3235_v18  ;;  %v3238_v16 = vpop.f32.mrb[42].mxu1 }
 0x3be   :  { %v3239_v12 = vpop.f32.mrb[43].mxu1 }
 0x3bf   :  { %v2328_v22 = vadd.f32 %v3237_v57, %v1988_v48  ;;  %v3240_v51 = vadd.f32 %v3239_v12, %v3238_v16 }
 0x3c1   :  { %v2331_v60 = vadd.f32 %v3240_v51, %v1993_v55  ;;  %v2418_v58 = vmax.f32 %v2328_v22, 0.0 }
 0x3c3   :  { %v2419_v53 = vmax.f32 %v2331_v60, 0.0  ;;  %v3241_v47 = vpop.f32.mrb[44].mxu1 }
 0x3c4   :  { %v3242_v56 = vpop.f32.mrb[45].mxu1 }
 0x3c5   :  { %v5065_v36 = vpack.c.bf16 %v2419_v53, %v2418_v58  ;;  %v3243_v34 = vadd.f32 %v3242_v56, %v3241_v47  ;;  %v3244_v62 = vpop.f32.mrb[46].mxu1 }
 0x3c6   :  { %v3245_v13 = vpop.f32.mrb[47].mxu1 }
 0x3c7   :  { %v2336_v19 = vadd.f32 %v3243_v34, %v1998_v63  ;;  %v3246_v17 = vadd.f32 %v3245_v13, %v3244_v62 }
 0x3c9   :  { %v2339_v45 = vadd.f32 %v3246_v17, %v2003_v11  ;;  %v2420_v6 = vmax.f32 %v2336_v19, 0.0 }
 0x3cb   :  { %v2421_v30 = vmax.f32 %v2339_v45, 0.0  ;;  %v3247_v1 = vpop.f32.mrb[48].mxu1 }
 0x3cc   :  { %v3248_v42 = vpop.f32.mrb[49].mxu1 }
 0x3cd   :  { %v5067_v15 = vpack.c.bf16 %v2421_v30, %v2420_v6  ;;  %v3249_v32 = vadd.f32 %v3248_v42, %v3247_v1  ;;  %v3250_v23 = vpop.f32.mrb[50].mxu1 }
 0x3ce   :  { %v3251_v25 = vpop.f32.mrb[51].mxu1 }
 0x3cf   :  { %v2344_v14 = vadd.f32 %v3249_v32, %v5021_v33  ;;  %v3252_v21 = vadd.f32 %v3251_v25, %v3250_v23 }
 0x3d1   :  { %v2347_v59 = vadd.f32 %v3252_v21, %v5023_v43  ;;  %v2422_v46 = vmax.f32 %v2344_v14, 0.0 }
 0x3d3   :  { %v2423_v49 = vmax.f32 %v2347_v59, 0.0  ;;  %v3253_v9 = vpop.f32.mrb[52].mxu1 }
 0x3d4   :  { %v3254_v4 = vpop.f32.mrb[53].mxu1 }
 0x3d5   :  { %v3255_v31 = vadd.f32 %v3254_v4, %v3253_v9  ;;  %v3256_v50 = vpop.f32.mrb[54].mxu1  ;;  %v2462_v48 = vpack.c.bf16 %v2423_v49, %v2422_v46 }
 0x3d6   :  { %v3257_v26 = vpop.f32.mrb[55].mxu1 }
 0x3d7   :  { %v2352_v24 = vadd.f32 %v3255_v31, %v5025_v39  ;;  %v3258_v18 = vadd.f32 %v3257_v26, %v3256_v50  ;;  %3295 = vmatprep.subr.bf16.mxu0 %v2462_v48 }
 0x3d8   :  { %3296 = vmatpush3.bf16.msra.mxu0 %v5037_v54 }
 0x3d9   :  { %v2355_v55 = vadd.f32 %v3258_v18, %v5027_v20  ;;  %v2424_v33 = vmax.f32 %v2352_v24, 0.0 }
 0x3db   :  { %v2425_v61 = vmax.f32 %v2355_v55, 0.0  ;;  %v3259_v57 = vpop.f32.mrb[56].mxu1 }
 0x3dc   :  { %v3260_v43 = vpop.f32.mrb[57].mxu1 }
 0x3dd   :  { %v3261_v16 = vadd.f32 %v3260_v43, %v3259_v57  ;;  %v3262_v12 = vpop.f32.mrb[58].mxu1  ;;  %v2463_v22 = vpack.c.bf16 %v2425_v61, %v2424_v33 }
 0x3de   :  { %v3263_v51 = vpop.f32.mrb[59].mxu1 }
 0x3df   :  { %v2360_v60 = vadd.f32 %v3261_v16, %v5029_v35  ;;  %v3264_v58 = vadd.f32 %v3263_v51, %v3262_v12  ;;  %3297 = vmatprep.subr.bf16.mxu0 %v2463_v22 }
 0x3e0   :  { %3298 = vmatpush3.bf16.msra.mxu0 %v5041_v8 }
 0x3e1   :  { %v2363_v39 = vadd.f32 %v3264_v58, %v5031_v41  ;;  %v2426_v53 = vmax.f32 %v2360_v60, 0.0 }
 0x3e3   :  { %v2427_v54 = vmax.f32 %v2363_v39, 0.0  ;;  %v3265_v47 = vpop.f32.mrb[60].mxu1  ;;  %v3621_v39 = vld [vmem:[#allocation18 + $0x14] ss:$8 sps:$4 sm:$0xff]  }
 0x3e4   :  { %v3266_v20 = vpop.f32.mrb[61].mxu1 }
 0x3e5   :  { %v3267_v56 = vadd.f32 %v3266_v20, %v3265_v47  ;;  %v3268_v34 = vpop.f32.mrb[62].mxu1  ;;  %v2464_v62 = vpack.c.bf16 %v2427_v54, %v2426_v53  ;;  %v3623_v53 = vld [vmem:[#allocation18 + $0x10] ss:$8 sps:$4 sm:$0xff]   ;;  %v3624_v54 = vld [vmem:[#allocation18 + $0x24] ss:$8 sps:$4 sm:$0xff]  }
 0x3e6   :  { %v3269_v63 = vpop.f32.mrb[63].mxu1  ;;  %v3627_v47 = vld [vmem:[#allocation18 + $0x34] ss:$8 sps:$4 sm:$0xff]   ;;  %v3632_v20 = vld [vmem:[#allocation18 + $0x40] ss:$8 sps:$4 sm:$0xff]  }
 0x3e7   :  { %v2368_v13 = vadd.f32 %v3267_v56, %v5033_v3  ;;  %v3270_v19 = vadd.f32 %v3269_v63, %v3268_v34  ;;  %3299 = vmatprep.subr.bf16.mxu0 %v2464_v62  ;;  %v3633_v56 = vld [vmem:[#allocation18 + $0x54] ss:$8 sps:$4 sm:$0xff]   ;;  %v3636_v34 = vld [vmem:[#allocation18 + $0x64] ss:$8 sps:$4 sm:$0xff]   ;;  %v3638_v62 = vld [vmem:[#allocation18 + $0x60] ss:$8 sps:$4 sm:$0xff]  }
 0x3e8   :  { %3300 = vmatpush3.bf16.msra.mxu0 %v5045_v0  ;;  %v3639_v63 = vld [vmem:[#allocation18 + $0x74] ss:$8 sps:$4 sm:$0xff]  }
 0x3e9   :  { %v2371_v35 = vadd.f32 %v3270_v19, %v5035_v7  ;;  %v2428_v17 = vmax.f32 %v2368_v13, 0.0  ;;  %v3641_v13 = vld [vmem:[#allocation18 + $0x70] ss:$8 sps:$4 sm:$0xff]   ;;  %v3642_v19 = vld [vmem:[#allocation21] sm:$0xff]  }
 0x3eb   :  { %v2429_v8 = vmax.f32 %v2371_v35, 0.0  ;;  %v3271_v11 = vpop.f32.mrb[64].mxu1  ;;  %v3643_v35 = vld [vmem:[#allocation21 + $0x10] sm:$0xff]  }
 0x3ec   :  { %v3272_v41 = vpop.f32.mrb[65].mxu1  ;;  %3459 = vmatprep.mubr.bf16.mxu1 %v3643_v35 }
 0x3ed   :  { %v3273_v45 = vadd.f32 %v3272_v41, %v3271_v11  ;;  %v3274_v6 = vpop.f32.mrb[66].mxu1  ;;  %v2465_v30 = vpack.c.bf16 %v2429_v8, %v2428_v17 }
 0x3ee   :  { %v3275_v1 = vpop.f32.mrb[67].mxu1 }
 0x3ef   :  { %v2376_v42 = vadd.f32 %v3273_v45, %v5039_v27  ;;  %v3276_v32 = vadd.f32 %v3275_v1, %v3274_v6  ;;  %3301 = vmatprep.subr.bf16.mxu0 %v2465_v30  ;;  %v2489_v45 = vpop.permute.xlu0 %2488 }
 0x3f0   :  { %3302 = vmatpush3.bf16.msra.mxu0 %v5051_v29 }
 0x3f1   :  { %v2379_v3 = vadd.f32 %v3276_v32, %v5043_v5  ;;  %v2430_v23 = vmax.f32 %v2376_v42, 0.0  ;;  %v2494_v42 = vpop.permute.xlu1 %2493 }
 0x3f3   :  { %v2431_v0 = vmax.f32 %v2379_v3, 0.0  ;;  %v3277_v25 = vpop.f32.mrb[68].mxu1 }
 0x3f4   :  { %v3278_v7 = vpop.f32.mrb[69].mxu1 }
 0x3f5   :  { %v3279_v14 = vadd.f32 %v3278_v7, %v3277_v25  ;;  %v3280_v21 = vpop.f32.mrb[70].mxu1  ;;  %v2466_v59 = vpack.c.bf16 %v2431_v0, %v2430_v23 }
 0x3f6   :  { %v3281_v46 = vpop.f32.mrb[71].mxu1 }
 0x3f7   :  { %v2384_v49 = vadd.f32 %v3279_v14, %v5047_v10  ;;  %v3282_v9 = vadd.f32 %v3281_v46, %v3280_v21  ;;  %3303 = vmatprep.subr.bf16.mxu0 %v2466_v59  ;;  %v2499_v59 = vpop.permute.xlu0 %2498 }
 0x3f8   :  { %3304 = vmatpush3.bf16.msra.mxu0 %v5055_v37 }
 0x3f9   :  { %v2387_v27 = vadd.f32 %v3282_v9, %v5049_v28  ;;  %v2432_v4 = vmax.f32 %v2384_v49, 0.0 }
 0x3fb   :  { %v2433_v29 = vmax.f32 %v2387_v27, 0.0  ;;  %v3283_v31 = vpop.f32.mrb[72].mxu1  ;;  %v2504_v27 = vpop.permute.xlu1 %2503 }
 0x3fc   :  { %v3284_v5 = vpop.f32.mrb[73].mxu1 }
 0x3fd   :  { %v3285_v50 = vadd.f32 %v3284_v5, %v3283_v31  ;;  %v3286_v48 = vpop.f32.mrb[74].mxu1  ;;  %v2467_v26 = vpack.c.bf16 %v2433_v29, %v2432_v4 }
 0x3fe   :  { %v3287_v24 = vpop.f32.mrb[75].mxu1 }
 0x3ff   :  { %v2392_v18 = vadd.f32 %v3285_v50, %v5053_v38  ;;  %v3288_v55 = vadd.f32 %v3287_v24, %v3286_v48  ;;  %3305 = vmatprep.subr.bf16.mxu0 %v2467_v26 }
 0x400   :  { %3306 = vmatpush3.bf16.msra.mxu0 %v5059_v40 }
 0x401   :  { %v2395_v10 = vadd.f32 %v3288_v55, %v5057_v2  ;;  %v2434_v33 = vmax.f32 %v2392_v18, 0.0  ;;  %v3618_v2 = vld [vmem:[#allocation18] ss:$8 sps:$4 sm:$0xff]   ;;  %v2509_v18 = vpop.permute.xlu0 %2508 }
 0x403   :  { %v2435_v37 = vmax.f32 %v2395_v10, 0.0  ;;  %v3289_v61 = vpop.f32.mrb[76].mxu1 }
 0x404   :  { %v3290_v28 = vpop.f32.mrb[77].mxu1 }
 0x405   :  { %v3291_v57 = vadd.f32 %v3290_v28, %v3289_v61  ;;  %v3292_v43 = vpop.f32.mrb[78].mxu1  ;;  %v2468_v16 = vpack.c.bf16 %v2435_v37, %v2434_v33  ;;  %v2514_v37 = vpop.permute.xlu1 %2513 }
 0x406   :  { %v3293_v12 = vpop.f32.mrb[79].mxu1 }
 0x407   :  { %v2400_v22 = vadd.f32 %v3291_v57, %v5061_v44  ;;  %v3294_v51 = vadd.f32 %v3293_v12, %v3292_v43  ;;  %3307 = vmatprep.subr.bf16.mxu0 %v2468_v16  ;;  %v3626_v44 = vld [vmem:[#allocation18 + $0x20] ss:$8 sps:$4 sm:$0xff]  }
 0x408   :  { %3308 = vmatpush3.bf16.msra.mxu0 %v5065_v36  ;;  %v3629_v36 = vld [vmem:[#allocation18 + $0x30] ss:$8 sps:$4 sm:$0xff]  }
 0x409   :  { %v2403_v38 = vadd.f32 %v3294_v51, %v5063_v52  ;;  %v2436_v60 = vmax.f32 %v2400_v22, 0.0  ;;  %v3630_v52 = vld [vmem:[#allocation18 + $0x44] ss:$8 sps:$4 sm:$0xff]  }
 0x40b   :  { %v2437_v40 = vmax.f32 %v2403_v38, 0.0  ;;  %v2519_v38 = vpop.permute.xlu0 %2518 }
 0x40d   :  { %v2469_v58 = vpack.c.bf16 %v2437_v40, %v2436_v60 }
 0x40f   :  { %3309 = vmatprep.subr.bf16.mxu0 %v2469_v58 }
 0x410   :  { %3310 = vmatpush3.bf16.msra.mxu0 %v5067_v15  ;;  %v3635_v15 = vld [vmem:[#allocation18 + $0x50] ss:$8 sps:$4 sm:$0xff]  }
 0x413   :  { %2679 = vmatmul.mubr.bf16.vlgmr.msra.gmra.mrb[32].mxu0 %v3618_v2  ;;  %v2524_v2 = vpop.permute.xlu1 %2523 }
 0x414   :  { %2686 = vmatprep.mubr.bf16.mxu0 %v3621_v39 }
 0x41b   :  { %2687 = vmatmul.mubr.bf16.gmra.mrb[36].mxu0 %v3623_v53 }
 0x41c   :  { %2694 = vmatprep.mubr.bf16.mxu0 %v3624_v54 }
 0x423   :  { %2695 = vmatmul.mubr.bf16.gmra.mrb[40].mxu0 %v3626_v44 }
 0x424   :  { %2702 = vmatprep.mubr.bf16.mxu0 %v3627_v47 }
 0x42b   :  { %2703 = vmatmul.mubr.bf16.gmra.mrb[44].mxu0 %v3629_v36 }
 0x42c   :  { %2710 = vmatprep.mubr.bf16.mxu0 %v3630_v52 }
 0x433   :  { %2711 = vmatmul.mubr.bf16.gmra.mrb[48].mxu0 %v3632_v20 }
 0x434   :  { %2718 = vmatprep.mubr.bf16.mxu0 %v3633_v56  ;;  %v2529_v56 = vpop.permute.xlu0 %2528 }
 0x43b   :  { %2719 = vmatmul.mubr.bf16.gmra.mrb[52].mxu0 %v3635_v15 }
 0x43c   :  { %2726 = vmatprep.mubr.bf16.mxu0 %v3636_v34 }
 0x443   :  { %2727 = vmatmul.mubr.bf16.gmra.mrb[56].mxu0 %v3638_v62 }
 0x444   :  { %2734 = vmatprep.mubr.bf16.mxu0 %v3639_v63  ;;  %v2534_v63 = vpop.permute.xlu1 %2533 }
 0x44b   :  { %2735 = vmatmul.mubr.bf16.gmra.mrb[60].mxu0 %v3641_v13 }
 0x44c   :  { %3455 = vmatprep.mubr.bf16.mxu0 %v3642_v19 }
 0x4e6   :  { %v3311_v17 = vpop.f32.mrb[32].mxu0 }
 0x4e7   :  { %v3312_v8 = vpop.f32.mrb[33].mxu0 }
 0x4e8   :  { %v3313_v11 = vadd.f32 %v3312_v8, %v3311_v17  ;;  %v3314_v41 = vpop.f32.mrb[34].mxu0 }
 0x4e9   :  { %v3315_v6 = vpop.f32.mrb[35].mxu0 }
 0x4ea   :  { %v2681_v30 = vadd.f32 %v3313_v11, %v2489_v45  ;;  %v3316_v1 = vadd.f32 %v3315_v6, %v3314_v41  ;;  %v2539_v6 = vpop.permute.xlu0 %2538 }
 0x4ec   :  { %v2684_v32 = vadd.f32 %v3316_v1, %v2494_v42  ;;  %v2743_v3 = vmax.f32 %v2681_v30, 0.0 }
 0x4ee   :  { %v2744_v23 = vmax.f32 %v2684_v32, 0.0  ;;  %v3317_v0 = vpop.f32.mrb[36].mxu0  ;;  %v2544_v32 = vpop.permute.xlu1 %2543 }
 0x4ef   :  { %v3318_v25 = vpop.f32.mrb[37].mxu0 }
 0x4f0   :  { %v2767_v7 = vpack.c.bf16 %v2744_v23, %v2743_v3  ;;  %v3319_v14 = vadd.f32 %v3318_v25, %v3317_v0  ;;  %v3320_v21 = vpop.f32.mrb[38].mxu0 }
 0x4f1   :  { %v3321_v46 = vpop.f32.mrb[39].mxu0 }
 0x4f2   :  { %v2689_v49 = vadd.f32 %v3319_v14, %v2499_v59  ;;  %v3322_v9 = vadd.f32 %v3321_v46, %v3320_v21  ;;  %3439 = vmatprep.subr.bf16.mxu0 %v2767_v7  ;;  %3465 = vmatprep.subr.bf16.mxu1 %v2767_v7  ;;  %v2549_v46 = vpop.permute.xlu0 %2548 }
 0x4f3   :  { %3440 = vmatpush3.bf16.msra.mxu0 %v2767_v7  ;;  %3473 = vmatpush3.bf16.msra.mxu1 %v2767_v7 }
 0x4f4   :  { %v2692_v4 = vadd.f32 %v3322_v9, %v2504_v27  ;;  %v2745_v29 = vmax.f32 %v2689_v49, 0.0 }
 0x4f6   :  { %v2746_v31 = vmax.f32 %v2692_v4, 0.0  ;;  %v3323_v5 = vpop.f32.mrb[40].mxu0  ;;  %v2554_v4 = vpop.permute.xlu1 %2553 }
 0x4f7   :  { %v3324_v50 = vpop.f32.mrb[41].mxu0 }
 0x4f8   :  { %v2768_v48 = vpack.c.bf16 %v2746_v31, %v2745_v29  ;;  %v3325_v26 = vadd.f32 %v3324_v50, %v3323_v5  ;;  %v3326_v24 = vpop.f32.mrb[42].mxu0 }
 0x4f9   :  { %v3327_v55 = vpop.f32.mrb[43].mxu0 }
 0x4fa   :  { %v2697_v10 = vadd.f32 %v3325_v26, %v2509_v18  ;;  %v3328_v33 = vadd.f32 %v3327_v55, %v3326_v24  ;;  %3441 = vmatprep.subr.bf16.mxu0 %v2768_v48  ;;  %3466 = vmatprep.subr.bf16.mxu1 %v2768_v48  ;;  %v2559_v55 = vpop.permute.xlu0 %2558 }
 0x4fb   :  { %3442 = vmatpush3.bf16.msra.mxu0 %v2768_v48  ;;  %3474 = vmatpush3.bf16.msra.mxu1 %v2768_v48 }
 0x4fc   :  { %v2700_v61 = vadd.f32 %v3328_v33, %v2514_v37  ;;  %v2747_v28 = vmax.f32 %v2697_v10, 0.0 }
 0x4fe   :  { %v2748_v57 = vmax.f32 %v2700_v61, 0.0  ;;  %v3329_v43 = vpop.f32.mrb[44].mxu0  ;;  %v2564_v61 = vpop.permute.xlu1 %2563 }
 0x4ff   :  { %v3330_v16 = vpop.f32.mrb[45].mxu0 }
 0x500   :  { %v2769_v12 = vpack.c.bf16 %v2748_v57, %v2747_v28  ;;  %v3331_v22 = vadd.f32 %v3330_v16, %v3329_v43  ;;  %v3332_v51 = vpop.f32.mrb[46].mxu0 }
 0x501   :  { %v3333_v60 = vpop.f32.mrb[47].mxu0 }
 0x502   :  { %v2705_v40 = vadd.f32 %v3331_v22, %v2519_v38  ;;  %v3334_v58 = vadd.f32 %v3333_v60, %v3332_v51  ;;  %3443 = vmatprep.subr.bf16.mxu0 %v2769_v12  ;;  %3467 = vmatprep.subr.bf16.mxu1 %v2769_v12  ;;  %v3645_v22 = vld [vmem:[#allocation21 + $0x18] sm:$0xff]   ;;  %v2786_v51 = vpop.permute.xlu0 %2785  ;;  %v2791_v38 = vpop.permute.xlu1 %2790 }
 0x503   :  { %3444 = vmatpush3.bf16.msra.mxu0 %v2769_v12  ;;  %3475 = vmatpush3.bf16.msra.mxu1 %v2769_v12  ;;  %v3644_v12 = vld [vmem:[#allocation21 + $0x8] sm:$0xff]  }
 0x504   :  { %v2708_v39 = vadd.f32 %v3334_v58, %v2524_v2  ;;  %v2749_v53 = vmax.f32 %v2705_v40, 0.0 }
 0x506   :  { %v2750_v54 = vmax.f32 %v2708_v39, 0.0  ;;  %v3335_v44 = vpop.f32.mrb[48].mxu0  ;;  %v2796_v60 = vpop.permute.xlu0 %2795 }
 0x507   :  { %v3336_v47 = vpop.f32.mrb[49].mxu0  ;;  %v2801_v40 = vpop.permute.xlu1 %2800 }
 0x508   :  { %v2770_v36 = vpack.c.bf16 %v2750_v54, %v2749_v53  ;;  %v3337_v52 = vadd.f32 %v3336_v47, %v3335_v44  ;;  %v3338_v20 = vpop.f32.mrb[50].mxu0 }
 0x509   :  { %v3339_v15 = vpop.f32.mrb[51].mxu0 }
 0x50a   :  { %v2713_v34 = vadd.f32 %v3337_v52, %v2529_v56  ;;  %v3340_v62 = vadd.f32 %v3339_v15, %v3338_v20  ;;  %3445 = vmatprep.subr.bf16.mxu0 %v2770_v36  ;;  %3468 = vmatprep.subr.bf16.mxu1 %v2770_v36  ;;  %v2931_v58 = vpop.permute.xlu0 %2930 }
 0x50b   :  { %3446 = vmatpush3.bf16.msra.mxu0 %v2770_v36  ;;  %3476 = vmatpush3.bf16.msra.mxu1 %v2770_v36  ;;  %v2936_v2 = vpop.permute.xlu1 %2935 }
 0x50c   :  { %v2716_v13 = vadd.f32 %v3340_v62, %v2534_v63  ;;  %v2751_v19 = vmax.f32 %v2713_v34, 0.0 }
 0x50e   :  { %v2752_v35 = vmax.f32 %v2716_v13, 0.0  ;;  %v3341_v17 = vpop.f32.mrb[52].mxu0  ;;  %v2806_v39 = vpop.permute.xlu0 %2805 }
 0x50f   :  { %v3342_v8 = vpop.f32.mrb[53].mxu0  ;;  %v2941_v53 = vpop.permute.xlu1 %2940 }
 0x510   :  { %v2771_v11 = vpack.c.bf16 %v2752_v35, %v2751_v19  ;;  %v3343_v41 = vadd.f32 %v3342_v8, %v3341_v17  ;;  %v3344_v45 = vpop.f32.mrb[54].mxu0 }
 0x511   :  { %v3345_v30 = vpop.f32.mrb[55].mxu0 }
 0x512   :  { %v2721_v1 = vadd.f32 %v3343_v41, %v2539_v6  ;;  %v3346_v42 = vadd.f32 %v3345_v30, %v3344_v45  ;;  %3447 = vmatprep.subr.bf16.mxu0 %v2771_v11  ;;  %3469 = vmatprep.subr.bf16.mxu1 %v2771_v11  ;;  %v2811_v54 = vpop.permute.xlu0 %2810 }
 0x513   :  { %3448 = vmatpush3.bf16.msra.mxu0 %v2771_v11  ;;  %3477 = vmatpush3.bf16.msra.mxu1 %v2771_v11  ;;  %v2946_v44 = vpop.permute.xlu1 %2945 }
 0x514   :  { %v2724_v3 = vadd.f32 %v3346_v42, %v2544_v32  ;;  %v2753_v23 = vmax.f32 %v2721_v1, 0.0 }
 0x516   :  { %v2754_v0 = vmax.f32 %v2724_v3, 0.0  ;;  %v3347_v25 = vpop.f32.mrb[56].mxu0  ;;  %v2816_v47 = vpop.permute.xlu0 %2815 }
 0x517   :  { %v3348_v7 = vpop.f32.mrb[57].mxu0  ;;  %v2951_v45 = vpop.permute.xlu1 %2950 }
 0x518   :  { %v2772_v14 = vpack.c.bf16 %v2754_v0, %v2753_v23  ;;  %v3349_v21 = vadd.f32 %v3348_v7, %v3347_v25  ;;  %v3350_v59 = vpop.f32.mrb[58].mxu0 }
 0x519   :  { %v3351_v49 = vpop.f32.mrb[59].mxu0 }
 0x51a   :  { %v2729_v9 = vadd.f32 %v3349_v21, %v2549_v46  ;;  %v3352_v27 = vadd.f32 %v3351_v49, %v3350_v59  ;;  %3449 = vmatprep.subr.bf16.mxu0 %v2772_v14  ;;  %3470 = vmatprep.subr.bf16.mxu1 %v2772_v14  ;;  %v2821_v32 = vpop.permute.xlu0 %2820 }
 0x51b   :  { %3450 = vmatpush3.bf16.msra.mxu0 %v2772_v14  ;;  %3478 = vmatpush3.bf16.msra.mxu1 %v2772_v14  ;;  %v2956_v49 = vpop.permute.xlu1 %2955 }
 0x51c   :  { %v2732_v29 = vadd.f32 %v3352_v27, %v2554_v4  ;;  %v2755_v31 = vmax.f32 %v2729_v9, 0.0 }
 0x51e   :  { %v2756_v5 = vmax.f32 %v2732_v29, 0.0  ;;  %v3353_v50 = vpop.f32.mrb[60].mxu0 }
 0x51f   :  { %v3354_v48 = vpop.f32.mrb[61].mxu0 }
 0x520   :  { %v2773_v26 = vpack.c.bf16 %v2756_v5, %v2755_v31  ;;  %v3355_v24 = vadd.f32 %v3354_v48, %v3353_v50  ;;  %v3356_v18 = vpop.f32.mrb[62].mxu0 }
 0x521   :  { %v3357_v10 = vpop.f32.mrb[63].mxu0 }
 0x522   :  { %v2737_v33 = vadd.f32 %v3355_v24, %v2559_v55  ;;  %v3358_v37 = vadd.f32 %v3357_v10, %v3356_v18  ;;  %3451 = vmatprep.subr.bf16.mxu0 %v2773_v26  ;;  %3471 = vmatprep.subr.bf16.mxu1 %v2773_v26  ;;  %v2966_v10 = vpop.permute.xlu1 %2965 }
 0x523   :  { %3452 = vmatpush3.bf16.msra.mxu0 %v2773_v26  ;;  %3479 = vmatpush3.bf16.msra.mxu1 %v2773_v26  ;;  %v2961_v26 = vpop.permute.xlu0 %2960 }
 0x524   :  { %v2740_v28 = vadd.f32 %v3358_v37, %v2564_v61  ;;  %v2757_v57 = vmax.f32 %v2737_v33, 0.0 }
 0x526   :  { %v2758_v43 = vmax.f32 %v2740_v28, 0.0 }
 0x528   :  { %v2774_v16 = vpack.c.bf16 %v2758_v43, %v2757_v57 }
 0x52a   :  { %3453 = vmatprep.subr.bf16.mxu0 %v2774_v16  ;;  %3472 = vmatprep.subr.bf16.mxu1 %v2774_v16 }
 0x52b   :  { %3454 = vmatpush3.bf16.msra.mxu0 %v2774_v16  ;;  %3480 = vmatpush3.bf16.msra.mxu1 %v2774_v16 }
 0x52e   :  { %3456 = vmatmul.mubr.bf16.vlgmr.msra.gmra.mrb[64].mxu0 %v3644_v12  ;;  %3460 = vmatmul.mubr.bf16.vlgmr.msra.gmra.mrb[80].mxu1 %v3645_v22  ;;  %v3003_v12 = vlaneseq }
 0x601   :  { %v3457_v36 = vpop.f32.mrb[64].mxu0  ;;  %v3461_v52 = vpop.f32.mrb[80].mxu1 }
 0x602   :  { %v2890_v20 = vadd.f32 %v3457_v36, %v2796_v60  ;;  %v2881_v56 = vpop.f32.mrb[65].mxu0  ;;  %v2897_v15 = vpop.f32.mrb[81].mxu1  ;;  %v2906_v23 = vadd.f32 %v3461_v52, %v2816_v47 }
 0x603   :  { %v2882_v34 = vadd.f32 %v2881_v56, %v2786_v51  ;;  %v3458_v62 = vpop.f32.mrb[66].mxu0  ;;  %v3462_v63 = vpop.f32.mrb[82].mxu1  ;;  %v2898_v11 = vadd.f32 %v2897_v15, %v2806_v39 }
 0x604   :  { %v2893_v13 = vadd.f32 %v3458_v62, %v2801_v40  ;;  %v2884_v19 = vpop.f32.mrb[67].mxu0  ;;  %v2900_v35 = vpop.f32.mrb[83].mxu1  ;;  %v2914_v17 = vmax.f32 %v2890_v20, 0.0  ;;  %v2909_v7 = vadd.f32 %v3462_v63, %v2821_v32  ;;  %v2918_v4 = vmax.f32 %v2906_v23, 0.0 }
 0x605   :  { %v2912_v8 = vmax.f32 %v2882_v34, 0.0  ;;  %v2885_v41 = vadd.f32 %v2884_v19, %v2791_v38  ;;  %v2901_v42 = vadd.f32 %v2900_v35, %v2811_v54  ;;  %v2916_v0 = vmax.f32 %v2898_v11, 0.0  ;;  %v3001_v39 = vpop.permute.xlu0 %3000 }
 0x606   :  { %v2915_v30 = vmax.f32 %v2893_v13, 0.0  ;;  %v2970_v3 = vmul.f32 %v2941_v53, %v2914_v17  ;;  %v2919_v50 = vmax.f32 %v2909_v7, 0.0  ;;  %v2974_v18 = vmul.f32 %v2961_v26, %v2918_v4 }
 0x607   :  { %v2968_v6 = vmul.f32 %v2931_v58, %v2912_v8  ;;  %v2913_v1 = vmax.f32 %v2885_v41, 0.0  ;;  %v2917_v46 = vmax.f32 %v2901_v42, 0.0  ;;  %v2972_v29 = vmul.f32 %v2951_v45, %v2916_v0 }
 0x608   :  { %v2971_v21 = vmul.f32 %v2946_v44, %v2915_v30  ;;  %v2979_v27 = vsel %vm1124_vm2, %v2970_v3, 0.0  ;;  %v2975_v37 = vmul.f32 %v2966_v10, %v2919_v50  ;;  %v2987_v57 = vsel %vm1124_vm2, %v2974_v18, 0.0 }
 0x609   :  { %v2969_v25 = vmul.f32 %v2936_v2, %v2913_v1  ;;  %v2976_v14 = vsel %vm1124_vm2, %v2968_v6, 0.0  ;;  %v2973_v48 = vmul.f32 %v2956_v49, %v2917_v46  ;;  %v2983_v55 = vsel %vm1124_vm2, %v2972_v29, 0.0 }
 0x60a   :  { %v2981_v5 = vsel %vm1124_vm2, %v2971_v21, 0.0  ;;  %v2989_v16 = vsel %vm1124_vm2, %v2975_v37, 0.0  ;;  %v3004_v38 = vshrl.u32 %v3003_v12, 7 }
 0x60b   :  { %v2977_v59 = vsel %vm1124_vm2, %v2969_v25, 0.0  ;;  %v2985_v61 = vsel %vm1124_vm2, %v2973_v48, 0.0 }
 0x60c   :  { %v2978_v9 = vadd.f32 %v2977_v59, %v2976_v14  ;;  %v3005_v58 = vsub.s32 0, %v3004_v38 }
 0x60e   :  { %v2980_v31 = vadd.f32 %v2979_v27, %v2978_v9  ;;  %v3006_v54 = vrot.slane %v3001_v39, %v3005_v58 }
 0x610   :  { %v2982_v24 = vadd.f32 %v2981_v5, %v2980_v31 }
 0x612   :  { %v2984_v33 = vadd.f32 %v2983_v55, %v2982_v24 }
 0x614   :  { %v2986_v28 = vadd.f32 %v2985_v61, %v2984_v33 }
 0x616   :  { %v2988_v43 = vadd.f32 %v2987_v57, %v2986_v28 }
 0x618   :  { %v2990_v22 = vadd.f32 %v2989_v16, %v2988_v43 }
 0x61a   :  { %v2991_v51 = vrot.slane %v2990_v22, 4 }
 0x61c   :  { %v2992_v60 = vadd.f32 %v2991_v51, %v2990_v22 }
 0x61e   :  { %v2993_v40 = vrot.slane %v2992_v60, 2 }
 0x620   :  { %v2994_v2 = vadd.f32 %v2993_v40, %v2992_v60 }
 0x622   :  { %v2995_v53 = vrot.slane %v2994_v2, 1 }
 0x624   :  { %v2996_v44 = vadd.f32 %v2995_v53, %v2994_v2 }
 0x626   :  { %v3007_v47 = vadd.f32 %v3006_v54, %v2996_v44 }
 0x628   :  { %3648 = vtanh.f32 %v3007_v47 }
 0x632   :  { %v3649_v36 = vpop.eup %3648 }
 0x633   :  { %3010 = vst.msk [vmem:[#allocation26] sm:$0x1] %vm3009_vm3, %v3649_v36 }
 0x634   :  { %3969 = shalt.err (!%p3966_p4)
}
 0x635   :  { %s3970_s26 = scalar_lea.hbm %s5128_s15, 16 }
 0x636   :  { %p3971_p5 = scmp.ne.s32.totalorder %s5128_s15, %s3970_s26  ;;  %p3974_p6 = scmp.lt.u32.totalorder %s3970_s26, %s5128_s15 }
 0x638   :  { %p3976_p7 = pnand %p3974_p6, %p3971_p5 }
 0x63a   :  { %3979 = shalt.err (!%p3976_p7)
}
 0x63b   :  { %3020 = dma.vmem_to_hbm [thread:$0]  %s3018_s29, 16, %s5128_s15, [#allocation5]  }
 0x63c   :  { %3996 = dma.done.wait [#allocation5], 16  }
 0x63d   :  { %3997 = vsyncadd [#allocation5], 4294967280 }
 0x63e   :  { %3024 = vsyncpa [#allocation4], 1 }
 0x63f   :  { %3025 = vsyncpa [#allocation7], 1 }
 0x640   :  { %3026 = vsyncpa [#allocation10], 1 }
 0x641   :  { %3027 = vsyncpa [#allocation13], 1 }
 0x642   :  { %3028 = vsyncpa [#allocation16], 1 }
 0x643   :  { %3029 = vsyncpa [#allocation19], 1 }
 0x644   :  { %3030 = vsyncpa [#allocation22], 1 }
 0x645   :  { %3031 = vsyncpa [#allocation25], 1 }
 0x646   :  { %3032 = vsyncpa [#allocation5], 1 }

</bundles_post_ra>
